<compile_context>
chip_gen: v5e
topology: v5e:2x2
jax: 0.10.0
libtpu: 0.0.40
codegen_flags: <defaults>
</compile_context>

<pallas_src>
import numpy as np
import jax
import jax.numpy as jnp
from jax import lax
from jax.experimental import pallas as pl
from jax.experimental.pallas import tpu as pltpu


def get_upsampling_weight(in_channels, out_channels, kernel_size):
    """2D bilinear kernel for upsampling — same math as the PyTorch helper."""
    factor = (kernel_size + 1) // 2
    if kernel_size % 2 == 1:
        center = factor - 1
    else:
        center = factor - 0.5
    og = np.ogrid[:kernel_size, :kernel_size]
    bilinear_filter = (1 - abs(og[0] - center) / factor) * (1 - abs(og[1] - center) / factor)
    weight = np.zeros((in_channels, out_channels, kernel_size, kernel_size), dtype=np.float32)
    weight[range(in_channels), range(out_channels), :, :] = bilinear_filter
    return jnp.asarray(weight)


def _phase_taps(K, s, p, H, O):
    """Static per-phase tap bookkeeping for one spatial axis of the transposed conv.

    For output index o = q*s + r the contributing kernel taps are k = ((r+p)%s) + j*s with input
    index i = q + (r+p)//s - j.  Returns (O_s, pad_lo, pad_hi, taps) where taps[r] is a list of
    (input_offset_in_padded_coords, kernel_position) for the *valid* taps only.
    """
    O_s = O // s
    raw = []
    for r in range(s):
        pr_r = (r + p) % s
        d_r = (r + p) // s
        nk_r = 0 if pr_r >= K else (K - pr_r + s - 1) // s
        raw.append([(d_r - j, pr_r + j * s) for j in range(nk_r)])
    all_off = [off for row in raw for (off, _) in row]
    pad_lo = max([0] + [-off for off in all_off])
    pad_hi = max([0] + [(O_s - 1) + off - (H - 1) for off in all_off])
    taps = [[(off + pad_lo, kp) for (off, kp) in row] for row in raw]
    return O_s, pad_lo, pad_hi, taps


def _make_kernel(CI, CO, T, S, PH, sched_by_ci):
    """sched_by_ci[ci] = list of (phase, shift_index, weight_base) — all static Python data."""

    def kernel(w_ref, x_ref, o_ref):
        # w_ref : f32[n_rows*CO] in SMEM   — per-(phase, tap, ci) weight rows of length CO
        # x_ref : (1, CI*T, S) in VMEM     — lane-dense shifted patches, row = ci*T + t
        # o_ref : (1, PH*CO, S) in VMEM    — lane-dense per-phase output slab, row = ph*CO + co
        accs = [[jnp.zeros((1, S), jnp.float32) for _ in range(CO)] for _ in range(PH)]
        for ci in range(CI):
            patches = {}  # dedup: each (ci, shift) row loaded once, reused across phases/taps/co
            for (ph, t, w_base) in sched_by_ci[ci]:
                if t not in patches:
                    patches[t] = x_ref[0, pl.ds(ci * T + t, 1), :].astype(jnp.float32)
                patch = patches[t]
                for co in range(CO):
                    accs[ph][co] = accs[ph][co] + w_ref[w_base + co] * patch
        rows = [accs[ph][co] for ph in range(PH) for co in range(CO)]
        o_ref[0] = jnp.concatenate(rows, axis=0).astype(o_ref.dtype)

    return kernel


def bilinear_upsampling_forward(x, weight, stride, padding):
    """Forward of nn.ConvTranspose2d(CI, CO, ks, stride, padding, bias=False)."""
    N, CI, H, W = x.shape
    CI_w, CO, KH, KW = weight.shape
    assert CI == CI_w
    s = int(stride)

    OH = (H - 1) * s - 2 * padding + KH
    OW = (W - 1) * s - 2 * padding + KW
    assert OH % s == 0 and OW % s == 0, "phase decomposition assumes stride | output size"

    OH_s, PT, PB, h_taps = _phase_taps(KH, s, padding, H, OH)
    OW_s, PL, PR, w_taps = _phase_taps(KW, s, padding, W, OW)
    HP, WP = H + PT + PB, W + PL + PR
    PH = s * s
    S = OH_s * OW_s

    # Distinct (row_offset, col_offset) shift pairs used across all phases/taps (static dedup).
    pair_index = {}
    for rh in range(s):
        for rw in range(s):
            for (ro, _kh) in h_taps[rh]:
                for (cf, _kw) in w_taps[rw]:
                    if (ro, cf) not in pair_index:
                        pair_index[(ro, cf)] = len(pair_index)

    if not pair_index:  # degenerate config: no valid taps at all
        return jnp.zeros((N, CO, OH, OW), x.dtype)

    T = len(pair_index)
    pairs_sorted = [p for p, _ in sorted(pair_index.items(), key=lambda kv: kv[1])]

    # Provably in-bounds static slices (no runtime OOB check exists on VMEM refs).
    for (ro, cf) in pairs_sorted:
        assert 0 <= ro and ro + OH_s <= HP, (ro, OH_s, HP)
        assert 0 <= cf and cf + OW_s <= WP, (cf, OW_s, WP)

    # Small halo pad + im2col-lite: T shifted views, spatial flattened onto the lane axis.
    x_pad = jnp.pad(x, ((0, 0), (0, 0), (PT, PB), (PL, PR)))
    shift_views = [x_pad[:, :, ro:ro + OH_s, cf:cf + OW_s] for (ro, cf) in pairs_sorted]
    x_shift = jnp.stack(shift_views, axis=2)                    # (N, CI, T, OH_s, OW_s)
    x_shift = x_shift.reshape(N, CI * T, S)                     # lane-dense rows, row = ci*T + t

    # Static MAC schedule + flat SMEM weight rows (one (CO,) row per (phase, tap, ci)).
    w_rows = []
    sched_by_ci = [[] for _ in range(CI)]
    for rh in range(s):
        for rw in range(s):
            ph = rh * s + rw
            for (ro, kh) in h_taps[rh]:
                for (cf, kw) in w_taps[rw]:
                    t = pair_index[(ro, cf)]
                    for ci in range(CI):
                        w_base = len(w_rows) * CO
                        w_rows.append(weight[ci, :, kh, kw])    # (CO,)
                        sched_by_ci[ci].append((ph, t, w_base))
    w_flat = jnp.concatenate(w_rows).astype(jnp.float32)

    kernel = _make_kernel(CI, CO, T, S, PH, sched_by_ci)

    out_flat = pl.pallas_call(
        kernel,
        out_shape=jax.ShapeDtypeStruct((N, PH * CO, S), x.dtype),
        grid=(N,),
        in_specs=[
            pl.BlockSpec(memory_space=pltpu.MemorySpace.SMEM),        # flat sub-filter weights
            pl.BlockSpec((1, CI * T, S), lambda n: (n, 0, 0)),        # shifted patches, one image
        ],
        out_specs=pl.BlockSpec((1, PH * CO, S), lambda n: (n, 0, 0)),
        compiler_params=pltpu.CompilerParams(
            dimension_semantics=("parallel",)),                       # 2 images -> 2 TCs on v7x
    )(w_flat, x_shift)

    # Un-flatten + interleave the phase slabs back to NCHW (wrapper-side layout plumbing).
    out = out_flat.reshape(N, s, s, CO, OH_s, OW_s)                   # (n, rh, rw, co, qh, qw)
    out = jnp.transpose(out, (0, 3, 4, 1, 5, 2)).reshape(N, CO, OH, OW)
    return out


if __name__ == "__main__":
    # Small shapes consistent with the module: classic 2x bilinear upsampling config.
    N, CI, CO = 2, 4, 4
    H, W = 16, 16
    ks, stride, padding = 4, 2, 1

    key = jax.random.PRNGKey(0)
    x = jax.random.normal(key, (N, CI, H, W), dtype=jnp.float32)

    # Deterministic parameter init: matches module.initialize_weights() (bilinear filter).
    weight = get_upsampling_weight(CI, CO, ks)  # (CI, CO, KH, KW)

    out = bilinear_upsampling_forward(x, weight, stride, padding)
    out = jax.block_until_ready(out)
    assert out.shape == (N, CO, 2 * H, 2 * W), out.shape

    # Sanity check against an XLA reference for ConvTranspose2d semantics.
    wf_oihw = jnp.transpose(jnp.flip(weight, axis=(2, 3)), (1, 0, 2, 3))  # (CO, CI, KH, KW)
    ref = lax.conv_general_dilated(
        x, wf_oihw,
        window_strides=(1, 1),
        padding=[(ks - 1 - padding, ks - 1 - padding)] * 2,
        lhs_dilation=(stride, stride),
        dimension_numbers=("NCHW", "OIHW", "NCHW"),
    )
    np.testing.assert_allclose(np.asarray(out), np.asarray(ref), rtol=1e-5, atol=1e-5)

    print("KERNEL_OK")
</pallas_src>

<mosaic_0001>
module attributes {stable_mosaic.version = 11 : i64} {
  func.func @kernel(%arg0: i32, %arg1: memref<256xf32, #tpu.memory_space<smem>>, %arg2: memref<1x36x256xf32, #tpu.memory_space<vmem>>, %arg3: memref<1x16x256xf32, #tpu.memory_space<vmem>>) attributes {dimension_semantics = [#tpu.dimension_semantics<parallel>], iteration_bounds = array<i64: 2>, scalar_prefetch = 0 : i64, scratch_operands = 0 : i64, tpu.core_type = #tpu.core_type<tc>, window_params = [{transform_indices = @transform_0, window_bounds = array<i64: 256>}, {transform_indices = @transform_1, window_bounds = array<i64: 1, 36, 256>}, {transform_indices = @transform_2, window_bounds = array<i64: 1, 16, 256>}]} {
    %cst = arith.constant 0.000000e+00 : f32
    %0 = vector.broadcast %cst : f32 to vector<1x256xf32>
    %cst_0 = arith.constant 0.000000e+00 : f32
    %1 = vector.broadcast %cst_0 : f32 to vector<1x256xf32>
    %cst_1 = arith.constant 0.000000e+00 : f32
    %2 = vector.broadcast %cst_1 : f32 to vector<1x256xf32>
    %cst_2 = arith.constant 0.000000e+00 : f32
    %3 = vector.broadcast %cst_2 : f32 to vector<1x256xf32>
    %cst_3 = arith.constant 0.000000e+00 : f32
    %4 = vector.broadcast %cst_3 : f32 to vector<1x256xf32>
    %cst_4 = arith.constant 0.000000e+00 : f32
    %5 = vector.broadcast %cst_4 : f32 to vector<1x256xf32>
    %cst_5 = arith.constant 0.000000e+00 : f32
    %6 = vector.broadcast %cst_5 : f32 to vector<1x256xf32>
    %cst_6 = arith.constant 0.000000e+00 : f32
    %7 = vector.broadcast %cst_6 : f32 to vector<1x256xf32>
    %cst_7 = arith.constant 0.000000e+00 : f32
    %8 = vector.broadcast %cst_7 : f32 to vector<1x256xf32>
    %cst_8 = arith.constant 0.000000e+00 : f32
    %9 = vector.broadcast %cst_8 : f32 to vector<1x256xf32>
    %cst_9 = arith.constant 0.000000e+00 : f32
    %10 = vector.broadcast %cst_9 : f32 to vector<1x256xf32>
    %cst_10 = arith.constant 0.000000e+00 : f32
    %11 = vector.broadcast %cst_10 : f32 to vector<1x256xf32>
    %cst_11 = arith.constant 0.000000e+00 : f32
    %12 = vector.broadcast %cst_11 : f32 to vector<1x256xf32>
    %cst_12 = arith.constant 0.000000e+00 : f32
    %13 = vector.broadcast %cst_12 : f32 to vector<1x256xf32>
    %cst_13 = arith.constant 0.000000e+00 : f32
    %14 = vector.broadcast %cst_13 : f32 to vector<1x256xf32>
    %cst_14 = arith.constant 0.000000e+00 : f32
    %15 = vector.broadcast %cst_14 : f32 to vector<1x256xf32>
    %c0 = arith.constant 0 : index
    %c0_15 = arith.constant 0 : index
    %c0_16 = arith.constant 0 : index
    %16 = vector.load %arg2[%c0, %c0_15, %c0_16] : memref<1x36x256xf32, #tpu.memory_space<vmem>>, vector<1x1x256xf32>
    %17 = vector.shape_cast %16 : vector<1x1x256xf32> to vector<1x256xf32>
    %c0_17 = arith.constant 0 : index
    %18 = memref.load %arg1[%c0_17] : memref<256xf32, #tpu.memory_space<smem>>
    %19 = vector.broadcast %18 : f32 to vector<1x256xf32>
    %20 = arith.mulf %19, %17 : vector<1x256xf32>
    %21 = arith.addf %0, %20 : vector<1x256xf32>
    %c1 = arith.constant 1 : index
    %22 = memref.load %arg1[%c1] : memref<256xf32, #tpu.memory_space<smem>>
    %23 = vector.broadcast %22 : f32 to vector<1x256xf32>
    %24 = arith.mulf %23, %17 : vector<1x256xf32>
    %25 = arith.addf %1, %24 : vector<1x256xf32>
    %c2 = arith.constant 2 : index
    %26 = memref.load %arg1[%c2] : memref<256xf32, #tpu.memory_space<smem>>
    %27 = vector.broadcast %26 : f32 to vector<1x256xf32>
    %28 = arith.mulf %27, %17 : vector<1x256xf32>
    %29 = arith.addf %2, %28 : vector<1x256xf32>
    %c3 = arith.constant 3 : index
    %30 = memref.load %arg1[%c3] : memref<256xf32, #tpu.memory_space<smem>>
    %31 = vector.broadcast %30 : f32 to vector<1x256xf32>
    %32 = arith.mulf %31, %17 : vector<1x256xf32>
    %33 = arith.addf %3, %32 : vector<1x256xf32>
    %c0_18 = arith.constant 0 : index
    %c1_19 = arith.constant 1 : index
    %c0_20 = arith.constant 0 : index
    %34 = vector.load %arg2[%c0_18, %c1_19, %c0_20] : memref<1x36x256xf32, #tpu.memory_space<vmem>>, vector<1x1x256xf32>
    %35 = vector.shape_cast %34 : vector<1x1x256xf32> to vector<1x256xf32>
    %c16 = arith.constant 16 : index
    %36 = memref.load %arg1[%c16] : memref<256xf32, #tpu.memory_space<smem>>
    %37 = vector.broadcast %36 : f32 to vector<1x256xf32>
    %38 = arith.mulf %37, %35 : vector<1x256xf32>
    %39 = arith.addf %21, %38 : vector<1x256xf32>
    %c17 = arith.constant 17 : index
    %40 = memref.load %arg1[%c17] : memref<256xf32, #tpu.memory_space<smem>>
    %41 = vector.broadcast %40 : f32 to vector<1x256xf32>
    %42 = arith.mulf %41, %35 : vector<1x256xf32>
    %43 = arith.addf %25, %42 : vector<1x256xf32>
    %c18 = arith.constant 18 : index
    %44 = memref.load %arg1[%c18] : memref<256xf32, #tpu.memory_space<smem>>
    %45 = vector.broadcast %44 : f32 to vector<1x256xf32>
    %46 = arith.mulf %45, %35 : vector<1x256xf32>
    %47 = arith.addf %29, %46 : vector<1x256xf32>
    %c19 = arith.constant 19 : index
    %48 = memref.load %arg1[%c19] : memref<256xf32, #tpu.memory_space<smem>>
    %49 = vector.broadcast %48 : f32 to vector<1x256xf32>
    %50 = arith.mulf %49, %35 : vector<1x256xf32>
    %51 = arith.addf %33, %50 : vector<1x256xf32>
    %c0_21 = arith.constant 0 : index
    %c2_22 = arith.constant 2 : index
    %c0_23 = arith.constant 0 : index
    %52 = vector.load %arg2[%c0_21, %c2_22, %c0_23] : memref<1x36x256xf32, #tpu.memory_space<vmem>>, vector<1x1x256xf32>
    %53 = vector.shape_cast %52 : vector<1x1x256xf32> to vector<1x256xf32>
    %c32 = arith.constant 32 : index
    %54 = memref.load %arg1[%c32] : memref<256xf32, #tpu.memory_space<smem>>
    %55 = vector.broadcast %54 : f32 to vector<1x256xf32>
    %56 = arith.mulf %55, %53 : vector<1x256xf32>
    %57 = arith.addf %39, %56 : vector<1x256xf32>
    %c33 = arith.constant 33 : index
    %58 = memref.load %arg1[%c33] : memref<256xf32, #tpu.memory_space<smem>>
    %59 = vector.broadcast %58 : f32 to vector<1x256xf32>
    %60 = arith.mulf %59, %53 : vector<1x256xf32>
    %61 = arith.addf %43, %60 : vector<1x256xf32>
    %c34 = arith.constant 34 : index
    %62 = memref.load %arg1[%c34] : memref<256xf32, #tpu.memory_space<smem>>
    %63 = vector.broadcast %62 : f32 to vector<1x256xf32>
    %64 = arith.mulf %63, %53 : vector<1x256xf32>
    %65 = arith.addf %47, %64 : vector<1x256xf32>
    %c35 = arith.constant 35 : index
    %66 = memref.load %arg1[%c35] : memref<256xf32, #tpu.memory_space<smem>>
    %67 = vector.broadcast %66 : f32 to vector<1x256xf32>
    %68 = arith.mulf %67, %53 : vector<1x256xf32>
    %69 = arith.addf %51, %68 : vector<1x256xf32>
    %c0_24 = arith.constant 0 : index
    %c3_25 = arith.constant 3 : index
    %c0_26 = arith.constant 0 : index
    %70 = vector.load %arg2[%c0_24, %c3_25, %c0_26] : memref<1x36x256xf32, #tpu.memory_space<vmem>>, vector<1x1x256xf32>
    %71 = vector.shape_cast %70 : vector<1x1x256xf32> to vector<1x256xf32>
    %c48 = arith.constant 48 : index
    %72 = memref.load %arg1[%c48] : memref<256xf32, #tpu.memory_space<smem>>
    %73 = vector.broadcast %72 : f32 to vector<1x256xf32>
    %74 = arith.mulf %73, %71 : vector<1x256xf32>
    %75 = arith.addf %57, %74 : vector<1x256xf32>
    %c49 = arith.constant 49 : index
    %76 = memref.load %arg1[%c49] : memref<256xf32, #tpu.memory_space<smem>>
    %77 = vector.broadcast %76 : f32 to vector<1x256xf32>
    %78 = arith.mulf %77, %71 : vector<1x256xf32>
    %79 = arith.addf %61, %78 : vector<1x256xf32>
    %c50 = arith.constant 50 : index
    %80 = memref.load %arg1[%c50] : memref<256xf32, #tpu.memory_space<smem>>
    %81 = vector.broadcast %80 : f32 to vector<1x256xf32>
    %82 = arith.mulf %81, %71 : vector<1x256xf32>
    %83 = arith.addf %65, %82 : vector<1x256xf32>
    %c51 = arith.constant 51 : index
    %84 = memref.load %arg1[%c51] : memref<256xf32, #tpu.memory_space<smem>>
    %85 = vector.broadcast %84 : f32 to vector<1x256xf32>
    %86 = arith.mulf %85, %71 : vector<1x256xf32>
    %87 = arith.addf %69, %86 : vector<1x256xf32>
    %c0_27 = arith.constant 0 : index
    %c4 = arith.constant 4 : index
    %c0_28 = arith.constant 0 : index
    %88 = vector.load %arg2[%c0_27, %c4, %c0_28] : memref<1x36x256xf32, #tpu.memory_space<vmem>>, vector<1x1x256xf32>
    %89 = vector.shape_cast %88 : vector<1x1x256xf32> to vector<1x256xf32>
    %c64 = arith.constant 64 : index
    %90 = memref.load %arg1[%c64] : memref<256xf32, #tpu.memory_space<smem>>
    %91 = vector.broadcast %90 : f32 to vector<1x256xf32>
    %92 = arith.mulf %91, %89 : vector<1x256xf32>
    %93 = arith.addf %4, %92 : vector<1x256xf32>
    %c65 = arith.constant 65 : index
    %94 = memref.load %arg1[%c65] : memref<256xf32, #tpu.memory_space<smem>>
    %95 = vector.broadcast %94 : f32 to vector<1x256xf32>
    %96 = arith.mulf %95, %89 : vector<1x256xf32>
    %97 = arith.addf %5, %96 : vector<1x256xf32>
    %c66 = arith.constant 66 : index
    %98 = memref.load %arg1[%c66] : memref<256xf32, #tpu.memory_space<smem>>
    %99 = vector.broadcast %98 : f32 to vector<1x256xf32>
    %100 = arith.mulf %99, %89 : vector<1x256xf32>
    %101 = arith.addf %6, %100 : vector<1x256xf32>
    %c67 = arith.constant 67 : index
    %102 = memref.load %arg1[%c67] : memref<256xf32, #tpu.memory_space<smem>>
    %103 = vector.broadcast %102 : f32 to vector<1x256xf32>
    %104 = arith.mulf %103, %89 : vector<1x256xf32>
    %105 = arith.addf %7, %104 : vector<1x256xf32>
    %c80 = arith.constant 80 : index
    %106 = memref.load %arg1[%c80] : memref<256xf32, #tpu.memory_space<smem>>
    %107 = vector.broadcast %106 : f32 to vector<1x256xf32>
    %108 = arith.mulf %107, %17 : vector<1x256xf32>
    %109 = arith.addf %93, %108 : vector<1x256xf32>
    %c81 = arith.constant 81 : index
    %110 = memref.load %arg1[%c81] : memref<256xf32, #tpu.memory_space<smem>>
    %111 = vector.broadcast %110 : f32 to vector<1x256xf32>
    %112 = arith.mulf %111, %17 : vector<1x256xf32>
    %113 = arith.addf %97, %112 : vector<1x256xf32>
    %c82 = arith.constant 82 : index
    %114 = memref.load %arg1[%c82] : memref<256xf32, #tpu.memory_space<smem>>
    %115 = vector.broadcast %114 : f32 to vector<1x256xf32>
    %116 = arith.mulf %115, %17 : vector<1x256xf32>
    %117 = arith.addf %101, %116 : vector<1x256xf32>
    %c83 = arith.constant 83 : index
    %118 = memref.load %arg1[%c83] : memref<256xf32, #tpu.memory_space<smem>>
    %119 = vector.broadcast %118 : f32 to vector<1x256xf32>
    %120 = arith.mulf %119, %17 : vector<1x256xf32>
    %121 = arith.addf %105, %120 : vector<1x256xf32>
    %c0_29 = arith.constant 0 : index
    %c5 = arith.constant 5 : index
    %c0_30 = arith.constant 0 : index
    %122 = vector.load %arg2[%c0_29, %c5, %c0_30] : memref<1x36x256xf32, #tpu.memory_space<vmem>>, vector<1x1x256xf32>
    %123 = vector.shape_cast %122 : vector<1x1x256xf32> to vector<1x256xf32>
    %c96 = arith.constant 96 : index
    %124 = memref.load %arg1[%c96] : memref<256xf32, #tpu.memory_space<smem>>
    %125 = vector.broadcast %124 : f32 to vector<1x256xf32>
    %126 = arith.mulf %125, %123 : vector<1x256xf32>
    %127 = arith.addf %109, %126 : vector<1x256xf32>
    %c97 = arith.constant 97 : index
    %128 = memref.load %arg1[%c97] : memref<256xf32, #tpu.memory_space<smem>>
    %129 = vector.broadcast %128 : f32 to vector<1x256xf32>
    %130 = arith.mulf %129, %123 : vector<1x256xf32>
    %131 = arith.addf %113, %130 : vector<1x256xf32>
    %c98 = arith.constant 98 : index
    %132 = memref.load %arg1[%c98] : memref<256xf32, #tpu.memory_space<smem>>
    %133 = vector.broadcast %132 : f32 to vector<1x256xf32>
    %134 = arith.mulf %133, %123 : vector<1x256xf32>
    %135 = arith.addf %117, %134 : vector<1x256xf32>
    %c99 = arith.constant 99 : index
    %136 = memref.load %arg1[%c99] : memref<256xf32, #tpu.memory_space<smem>>
    %137 = vector.broadcast %136 : f32 to vector<1x256xf32>
    %138 = arith.mulf %137, %123 : vector<1x256xf32>
    %139 = arith.addf %121, %138 : vector<1x256xf32>
    %c112 = arith.constant 112 : index
    %140 = memref.load %arg1[%c112] : memref<256xf32, #tpu.memory_space<smem>>
    %141 = vector.broadcast %140 : f32 to vector<1x256xf32>
    %142 = arith.mulf %141, %53 : vector<1x256xf32>
    %143 = arith.addf %127, %142 : vector<1x256xf32>
    %c113 = arith.constant 113 : index
    %144 = memref.load %arg1[%c113] : memref<256xf32, #tpu.memory_space<smem>>
    %145 = vector.broadcast %144 : f32 to vector<1x256xf32>
    %146 = arith.mulf %145, %53 : vector<1x256xf32>
    %147 = arith.addf %131, %146 : vector<1x256xf32>
    %c114 = arith.constant 114 : index
    %148 = memref.load %arg1[%c114] : memref<256xf32, #tpu.memory_space<smem>>
    %149 = vector.broadcast %148 : f32 to vector<1x256xf32>
    %150 = arith.mulf %149, %53 : vector<1x256xf32>
    %151 = arith.addf %135, %150 : vector<1x256xf32>
    %c115 = arith.constant 115 : index
    %152 = memref.load %arg1[%c115] : memref<256xf32, #tpu.memory_space<smem>>
    %153 = vector.broadcast %152 : f32 to vector<1x256xf32>
    %154 = arith.mulf %153, %53 : vector<1x256xf32>
    %155 = arith.addf %139, %154 : vector<1x256xf32>
    %c0_31 = arith.constant 0 : index
    %c6 = arith.constant 6 : index
    %c0_32 = arith.constant 0 : index
    %156 = vector.load %arg2[%c0_31, %c6, %c0_32] : memref<1x36x256xf32, #tpu.memory_space<vmem>>, vector<1x1x256xf32>
    %157 = vector.shape_cast %156 : vector<1x1x256xf32> to vector<1x256xf32>
    %c128 = arith.constant 128 : index
    %158 = memref.load %arg1[%c128] : memref<256xf32, #tpu.memory_space<smem>>
    %159 = vector.broadcast %158 : f32 to vector<1x256xf32>
    %160 = arith.mulf %159, %157 : vector<1x256xf32>
    %161 = arith.addf %8, %160 : vector<1x256xf32>
    %c129 = arith.constant 129 : index
    %162 = memref.load %arg1[%c129] : memref<256xf32, #tpu.memory_space<smem>>
    %163 = vector.broadcast %162 : f32 to vector<1x256xf32>
    %164 = arith.mulf %163, %157 : vector<1x256xf32>
    %165 = arith.addf %9, %164 : vector<1x256xf32>
    %c130 = arith.constant 130 : index
    %166 = memref.load %arg1[%c130] : memref<256xf32, #tpu.memory_space<smem>>
    %167 = vector.broadcast %166 : f32 to vector<1x256xf32>
    %168 = arith.mulf %167, %157 : vector<1x256xf32>
    %169 = arith.addf %10, %168 : vector<1x256xf32>
    %c131 = arith.constant 131 : index
    %170 = memref.load %arg1[%c131] : memref<256xf32, #tpu.memory_space<smem>>
    %171 = vector.broadcast %170 : f32 to vector<1x256xf32>
    %172 = arith.mulf %171, %157 : vector<1x256xf32>
    %173 = arith.addf %11, %172 : vector<1x256xf32>
    %c0_33 = arith.constant 0 : index
    %c7 = arith.constant 7 : index
    %c0_34 = arith.constant 0 : index
    %174 = vector.load %arg2[%c0_33, %c7, %c0_34] : memref<1x36x256xf32, #tpu.memory_space<vmem>>, vector<1x1x256xf32>
    %175 = vector.shape_cast %174 : vector<1x1x256xf32> to vector<1x256xf32>
    %c144 = arith.constant 144 : index
    %176 = memref.load %arg1[%c144] : memref<256xf32, #tpu.memory_space<smem>>
    %177 = vector.broadcast %176 : f32 to vector<1x256xf32>
    %178 = arith.mulf %177, %175 : vector<1x256xf32>
    %179 = arith.addf %161, %178 : vector<1x256xf32>
    %c145 = arith.constant 145 : index
    %180 = memref.load %arg1[%c145] : memref<256xf32, #tpu.memory_space<smem>>
    %181 = vector.broadcast %180 : f32 to vector<1x256xf32>
    %182 = arith.mulf %181, %175 : vector<1x256xf32>
    %183 = arith.addf %165, %182 : vector<1x256xf32>
    %c146 = arith.constant 146 : index
    %184 = memref.load %arg1[%c146] : memref<256xf32, #tpu.memory_space<smem>>
    %185 = vector.broadcast %184 : f32 to vector<1x256xf32>
    %186 = arith.mulf %185, %175 : vector<1x256xf32>
    %187 = arith.addf %169, %186 : vector<1x256xf32>
    %c147 = arith.constant 147 : index
    %188 = memref.load %arg1[%c147] : memref<256xf32, #tpu.memory_space<smem>>
    %189 = vector.broadcast %188 : f32 to vector<1x256xf32>
    %190 = arith.mulf %189, %175 : vector<1x256xf32>
    %191 = arith.addf %173, %190 : vector<1x256xf32>
    %c160 = arith.constant 160 : index
    %192 = memref.load %arg1[%c160] : memref<256xf32, #tpu.memory_space<smem>>
    %193 = vector.broadcast %192 : f32 to vector<1x256xf32>
    %194 = arith.mulf %193, %17 : vector<1x256xf32>
    %195 = arith.addf %179, %194 : vector<1x256xf32>
    %c161 = arith.constant 161 : index
    %196 = memref.load %arg1[%c161] : memref<256xf32, #tpu.memory_space<smem>>
    %197 = vector.broadcast %196 : f32 to vector<1x256xf32>
    %198 = arith.mulf %197, %17 : vector<1x256xf32>
    %199 = arith.addf %183, %198 : vector<1x256xf32>
    %c162 = arith.constant 162 : index
    %200 = memref.load %arg1[%c162] : memref<256xf32, #tpu.memory_space<smem>>
    %201 = vector.broadcast %200 : f32 to vector<1x256xf32>
    %202 = arith.mulf %201, %17 : vector<1x256xf32>
    %203 = arith.addf %187, %202 : vector<1x256xf32>
    %c163 = arith.constant 163 : index
    %204 = memref.load %arg1[%c163] : memref<256xf32, #tpu.memory_space<smem>>
    %205 = vector.broadcast %204 : f32 to vector<1x256xf32>
    %206 = arith.mulf %205, %17 : vector<1x256xf32>
    %207 = arith.addf %191, %206 : vector<1x256xf32>
    %c176 = arith.constant 176 : index
    %208 = memref.load %arg1[%c176] : memref<256xf32, #tpu.memory_space<smem>>
    %209 = vector.broadcast %208 : f32 to vector<1x256xf32>
    %210 = arith.mulf %209, %35 : vector<1x256xf32>
    %211 = arith.addf %195, %210 : vector<1x256xf32>
    %c177 = arith.constant 177 : index
    %212 = memref.load %arg1[%c177] : memref<256xf32, #tpu.memory_space<smem>>
    %213 = vector.broadcast %212 : f32 to vector<1x256xf32>
    %214 = arith.mulf %213, %35 : vector<1x256xf32>
    %215 = arith.addf %199, %214 : vector<1x256xf32>
    %c178 = arith.constant 178 : index
    %216 = memref.load %arg1[%c178] : memref<256xf32, #tpu.memory_space<smem>>
    %217 = vector.broadcast %216 : f32 to vector<1x256xf32>
    %218 = arith.mulf %217, %35 : vector<1x256xf32>
    %219 = arith.addf %203, %218 : vector<1x256xf32>
    %c179 = arith.constant 179 : index
    %220 = memref.load %arg1[%c179] : memref<256xf32, #tpu.memory_space<smem>>
    %221 = vector.broadcast %220 : f32 to vector<1x256xf32>
    %222 = arith.mulf %221, %35 : vector<1x256xf32>
    %223 = arith.addf %207, %222 : vector<1x256xf32>
    %c0_35 = arith.constant 0 : index
    %c8 = arith.constant 8 : index
    %c0_36 = arith.constant 0 : index
    %224 = vector.load %arg2[%c0_35, %c8, %c0_36] : memref<1x36x256xf32, #tpu.memory_space<vmem>>, vector<1x1x256xf32>
    %225 = vector.shape_cast %224 : vector<1x1x256xf32> to vector<1x256xf32>
    %c192 = arith.constant 192 : index
    %226 = memref.load %arg1[%c192] : memref<256xf32, #tpu.memory_space<smem>>
    %227 = vector.broadcast %226 : f32 to vector<1x256xf32>
    %228 = arith.mulf %227, %225 : vector<1x256xf32>
    %229 = arith.addf %12, %228 : vector<1x256xf32>
    %c193 = arith.constant 193 : index
    %230 = memref.load %arg1[%c193] : memref<256xf32, #tpu.memory_space<smem>>
    %231 = vector.broadcast %230 : f32 to vector<1x256xf32>
    %232 = arith.mulf %231, %225 : vector<1x256xf32>
    %233 = arith.addf %13, %232 : vector<1x256xf32>
    %c194 = arith.constant 194 : index
    %234 = memref.load %arg1[%c194] : memref<256xf32, #tpu.memory_space<smem>>
    %235 = vector.broadcast %234 : f32 to vector<1x256xf32>
    %236 = arith.mulf %235, %225 : vector<1x256xf32>
    %237 = arith.addf %14, %236 : vector<1x256xf32>
    %c195 = arith.constant 195 : index
    %238 = memref.load %arg1[%c195] : memref<256xf32, #tpu.memory_space<smem>>
    %239 = vector.broadcast %238 : f32 to vector<1x256xf32>
    %240 = arith.mulf %239, %225 : vector<1x256xf32>
    %241 = arith.addf %15, %240 : vector<1x256xf32>
    %c208 = arith.constant 208 : index
    %242 = memref.load %arg1[%c208] : memref<256xf32, #tpu.memory_space<smem>>
    %243 = vector.broadcast %242 : f32 to vector<1x256xf32>
    %244 = arith.mulf %243, %157 : vector<1x256xf32>
    %245 = arith.addf %229, %244 : vector<1x256xf32>
    %c209 = arith.constant 209 : index
    %246 = memref.load %arg1[%c209] : memref<256xf32, #tpu.memory_space<smem>>
    %247 = vector.broadcast %246 : f32 to vector<1x256xf32>
    %248 = arith.mulf %247, %157 : vector<1x256xf32>
    %249 = arith.addf %233, %248 : vector<1x256xf32>
    %c210 = arith.constant 210 : index
    %250 = memref.load %arg1[%c210] : memref<256xf32, #tpu.memory_space<smem>>
    %251 = vector.broadcast %250 : f32 to vector<1x256xf32>
    %252 = arith.mulf %251, %157 : vector<1x256xf32>
    %253 = arith.addf %237, %252 : vector<1x256xf32>
    %c211 = arith.constant 211 : index
    %254 = memref.load %arg1[%c211] : memref<256xf32, #tpu.memory_space<smem>>
    %255 = vector.broadcast %254 : f32 to vector<1x256xf32>
    %256 = arith.mulf %255, %157 : vector<1x256xf32>
    %257 = arith.addf %241, %256 : vector<1x256xf32>
    %c224 = arith.constant 224 : index
    %258 = memref.load %arg1[%c224] : memref<256xf32, #tpu.memory_space<smem>>
    %259 = vector.broadcast %258 : f32 to vector<1x256xf32>
    %260 = arith.mulf %259, %89 : vector<1x256xf32>
    %261 = arith.addf %245, %260 : vector<1x256xf32>
    %c225 = arith.constant 225 : index
    %262 = memref.load %arg1[%c225] : memref<256xf32, #tpu.memory_space<smem>>
    %263 = vector.broadcast %262 : f32 to vector<1x256xf32>
    %264 = arith.mulf %263, %89 : vector<1x256xf32>
    %265 = arith.addf %249, %264 : vector<1x256xf32>
    %c226 = arith.constant 226 : index
    %266 = memref.load %arg1[%c226] : memref<256xf32, #tpu.memory_space<smem>>
    %267 = vector.broadcast %266 : f32 to vector<1x256xf32>
    %268 = arith.mulf %267, %89 : vector<1x256xf32>
    %269 = arith.addf %253, %268 : vector<1x256xf32>
    %c227 = arith.constant 227 : index
    %270 = memref.load %arg1[%c227] : memref<256xf32, #tpu.memory_space<smem>>
    %271 = vector.broadcast %270 : f32 to vector<1x256xf32>
    %272 = arith.mulf %271, %89 : vector<1x256xf32>
    %273 = arith.addf %257, %272 : vector<1x256xf32>
    %c240 = arith.constant 240 : index
    %274 = memref.load %arg1[%c240] : memref<256xf32, #tpu.memory_space<smem>>
    %275 = vector.broadcast %274 : f32 to vector<1x256xf32>
    %276 = arith.mulf %275, %17 : vector<1x256xf32>
    %277 = arith.addf %261, %276 : vector<1x256xf32>
    %c241 = arith.constant 241 : index
    %278 = memref.load %arg1[%c241] : memref<256xf32, #tpu.memory_space<smem>>
    %279 = vector.broadcast %278 : f32 to vector<1x256xf32>
    %280 = arith.mulf %279, %17 : vector<1x256xf32>
    %281 = arith.addf %265, %280 : vector<1x256xf32>
    %c242 = arith.constant 242 : index
    %282 = memref.load %arg1[%c242] : memref<256xf32, #tpu.memory_space<smem>>
    %283 = vector.broadcast %282 : f32 to vector<1x256xf32>
    %284 = arith.mulf %283, %17 : vector<1x256xf32>
    %285 = arith.addf %269, %284 : vector<1x256xf32>
    %c243 = arith.constant 243 : index
    %286 = memref.load %arg1[%c243] : memref<256xf32, #tpu.memory_space<smem>>
    %287 = vector.broadcast %286 : f32 to vector<1x256xf32>
    %288 = arith.mulf %287, %17 : vector<1x256xf32>
    %289 = arith.addf %273, %288 : vector<1x256xf32>
    %c0_37 = arith.constant 0 : index
    %c9 = arith.constant 9 : index
    %c0_38 = arith.constant 0 : index
    %290 = vector.load %arg2[%c0_37, %c9, %c0_38] : memref<1x36x256xf32, #tpu.memory_space<vmem>>, vector<1x1x256xf32>
    %291 = vector.shape_cast %290 : vector<1x1x256xf32> to vector<1x256xf32>
    %c4_39 = arith.constant 4 : index
    %292 = memref.load %arg1[%c4_39] : memref<256xf32, #tpu.memory_space<smem>>
    %293 = vector.broadcast %292 : f32 to vector<1x256xf32>
    %294 = arith.mulf %293, %291 : vector<1x256xf32>
    %295 = arith.addf %75, %294 : vector<1x256xf32>
    %c5_40 = arith.constant 5 : index
    %296 = memref.load %arg1[%c5_40] : memref<256xf32, #tpu.memory_space<smem>>
    %297 = vector.broadcast %296 : f32 to vector<1x256xf32>
    %298 = arith.mulf %297, %291 : vector<1x256xf32>
    %299 = arith.addf %79, %298 : vector<1x256xf32>
    %c6_41 = arith.constant 6 : index
    %300 = memref.load %arg1[%c6_41] : memref<256xf32, #tpu.memory_space<smem>>
    %301 = vector.broadcast %300 : f32 to vector<1x256xf32>
    %302 = arith.mulf %301, %291 : vector<1x256xf32>
    %303 = arith.addf %83, %302 : vector<1x256xf32>
    %c7_42 = arith.constant 7 : index
    %304 = memref.load %arg1[%c7_42] : memref<256xf32, #tpu.memory_space<smem>>
    %305 = vector.broadcast %304 : f32 to vector<1x256xf32>
    %306 = arith.mulf %305, %291 : vector<1x256xf32>
    %307 = arith.addf %87, %306 : vector<1x256xf32>
    %c0_43 = arith.constant 0 : index
    %c10 = arith.constant 10 : index
    %c0_44 = arith.constant 0 : index
    %308 = vector.load %arg2[%c0_43, %c10, %c0_44] : memref<1x36x256xf32, #tpu.memory_space<vmem>>, vector<1x1x256xf32>
    %309 = vector.shape_cast %308 : vector<1x1x256xf32> to vector<1x256xf32>
    %c20 = arith.constant 20 : index
    %310 = memref.load %arg1[%c20] : memref<256xf32, #tpu.memory_space<smem>>
    %311 = vector.broadcast %310 : f32 to vector<1x256xf32>
    %312 = arith.mulf %311, %309 : vector<1x256xf32>
    %313 = arith.addf %295, %312 : vector<1x256xf32>
    %c21 = arith.constant 21 : index
    %314 = memref.load %arg1[%c21] : memref<256xf32, #tpu.memory_space<smem>>
    %315 = vector.broadcast %314 : f32 to vector<1x256xf32>
    %316 = arith.mulf %315, %309 : vector<1x256xf32>
    %317 = arith.addf %299, %316 : vector<1x256xf32>
    %c22 = arith.constant 22 : index
    %318 = memref.load %arg1[%c22] : memref<256xf32, #tpu.memory_space<smem>>
    %319 = vector.broadcast %318 : f32 to vector<1x256xf32>
    %320 = arith.mulf %319, %309 : vector<1x256xf32>
    %321 = arith.addf %303, %320 : vector<1x256xf32>
    %c23 = arith.constant 23 : index
    %322 = memref.load %arg1[%c23] : memref<256xf32, #tpu.memory_space<smem>>
    %323 = vector.broadcast %322 : f32 to vector<1x256xf32>
    %324 = arith.mulf %323, %309 : vector<1x256xf32>
    %325 = arith.addf %307, %324 : vector<1x256xf32>
    %c0_45 = arith.constant 0 : index
    %c11 = arith.constant 11 : index
    %c0_46 = arith.constant 0 : index
    %326 = vector.load %arg2[%c0_45, %c11, %c0_46] : memref<1x36x256xf32, #tpu.memory_space<vmem>>, vector<1x1x256xf32>
    %327 = vector.shape_cast %326 : vector<1x1x256xf32> to vector<1x256xf32>
    %c36 = arith.constant 36 : index
    %328 = memref.load %arg1[%c36] : memref<256xf32, #tpu.memory_space<smem>>
    %329 = vector.broadcast %328 : f32 to vector<1x256xf32>
    %330 = arith.mulf %329, %327 : vector<1x256xf32>
    %331 = arith.addf %313, %330 : vector<1x256xf32>
    %c37 = arith.constant 37 : index
    %332 = memref.load %arg1[%c37] : memref<256xf32, #tpu.memory_space<smem>>
    %333 = vector.broadcast %332 : f32 to vector<1x256xf32>
    %334 = arith.mulf %333, %327 : vector<1x256xf32>
    %335 = arith.addf %317, %334 : vector<1x256xf32>
    %c38 = arith.constant 38 : index
    %336 = memref.load %arg1[%c38] : memref<256xf32, #tpu.memory_space<smem>>
    %337 = vector.broadcast %336 : f32 to vector<1x256xf32>
    %338 = arith.mulf %337, %327 : vector<1x256xf32>
    %339 = arith.addf %321, %338 : vector<1x256xf32>
    %c39 = arith.constant 39 : index
    %340 = memref.load %arg1[%c39] : memref<256xf32, #tpu.memory_space<smem>>
    %341 = vector.broadcast %340 : f32 to vector<1x256xf32>
    %342 = arith.mulf %341, %327 : vector<1x256xf32>
    %343 = arith.addf %325, %342 : vector<1x256xf32>
    %c0_47 = arith.constant 0 : index
    %c12 = arith.constant 12 : index
    %c0_48 = arith.constant 0 : index
    %344 = vector.load %arg2[%c0_47, %c12, %c0_48] : memref<1x36x256xf32, #tpu.memory_space<vmem>>, vector<1x1x256xf32>
    %345 = vector.shape_cast %344 : vector<1x1x256xf32> to vector<1x256xf32>
    %c52 = arith.constant 52 : index
    %346 = memref.load %arg1[%c52] : memref<256xf32, #tpu.memory_space<smem>>
    %347 = vector.broadcast %346 : f32 to vector<1x256xf32>
    %348 = arith.mulf %347, %345 : vector<1x256xf32>
    %349 = arith.addf %331, %348 : vector<1x256xf32>
    %c53 = arith.constant 53 : index
    %350 = memref.load %arg1[%c53] : memref<256xf32, #tpu.memory_space<smem>>
    %351 = vector.broadcast %350 : f32 to vector<1x256xf32>
    %352 = arith.mulf %351, %345 : vector<1x256xf32>
    %353 = arith.addf %335, %352 : vector<1x256xf32>
    %c54 = arith.constant 54 : index
    %354 = memref.load %arg1[%c54] : memref<256xf32, #tpu.memory_space<smem>>
    %355 = vector.broadcast %354 : f32 to vector<1x256xf32>
    %356 = arith.mulf %355, %345 : vector<1x256xf32>
    %357 = arith.addf %339, %356 : vector<1x256xf32>
    %c55 = arith.constant 55 : index
    %358 = memref.load %arg1[%c55] : memref<256xf32, #tpu.memory_space<smem>>
    %359 = vector.broadcast %358 : f32 to vector<1x256xf32>
    %360 = arith.mulf %359, %345 : vector<1x256xf32>
    %361 = arith.addf %343, %360 : vector<1x256xf32>
    %c0_49 = arith.constant 0 : index
    %c13 = arith.constant 13 : index
    %c0_50 = arith.constant 0 : index
    %362 = vector.load %arg2[%c0_49, %c13, %c0_50] : memref<1x36x256xf32, #tpu.memory_space<vmem>>, vector<1x1x256xf32>
    %363 = vector.shape_cast %362 : vector<1x1x256xf32> to vector<1x256xf32>
    %c68 = arith.constant 68 : index
    %364 = memref.load %arg1[%c68] : memref<256xf32, #tpu.memory_space<smem>>
    %365 = vector.broadcast %364 : f32 to vector<1x256xf32>
    %366 = arith.mulf %365, %363 : vector<1x256xf32>
    %367 = arith.addf %143, %366 : vector<1x256xf32>
    %c69 = arith.constant 69 : index
    %368 = memref.load %arg1[%c69] : memref<256xf32, #tpu.memory_space<smem>>
    %369 = vector.broadcast %368 : f32 to vector<1x256xf32>
    %370 = arith.mulf %369, %363 : vector<1x256xf32>
    %371 = arith.addf %147, %370 : vector<1x256xf32>
    %c70 = arith.constant 70 : index
    %372 = memref.load %arg1[%c70] : memref<256xf32, #tpu.memory_space<smem>>
    %373 = vector.broadcast %372 : f32 to vector<1x256xf32>
    %374 = arith.mulf %373, %363 : vector<1x256xf32>
    %375 = arith.addf %151, %374 : vector<1x256xf32>
    %c71 = arith.constant 71 : index
    %376 = memref.load %arg1[%c71] : memref<256xf32, #tpu.memory_space<smem>>
    %377 = vector.broadcast %376 : f32 to vector<1x256xf32>
    %378 = arith.mulf %377, %363 : vector<1x256xf32>
    %379 = arith.addf %155, %378 : vector<1x256xf32>
    %c84 = arith.constant 84 : index
    %380 = memref.load %arg1[%c84] : memref<256xf32, #tpu.memory_space<smem>>
    %381 = vector.broadcast %380 : f32 to vector<1x256xf32>
    %382 = arith.mulf %381, %291 : vector<1x256xf32>
    %383 = arith.addf %367, %382 : vector<1x256xf32>
    %c85 = arith.constant 85 : index
    %384 = memref.load %arg1[%c85] : memref<256xf32, #tpu.memory_space<smem>>
    %385 = vector.broadcast %384 : f32 to vector<1x256xf32>
    %386 = arith.mulf %385, %291 : vector<1x256xf32>
    %387 = arith.addf %371, %386 : vector<1x256xf32>
    %c86 = arith.constant 86 : index
    %388 = memref.load %arg1[%c86] : memref<256xf32, #tpu.memory_space<smem>>
    %389 = vector.broadcast %388 : f32 to vector<1x256xf32>
    %390 = arith.mulf %389, %291 : vector<1x256xf32>
    %391 = arith.addf %375, %390 : vector<1x256xf32>
    %c87 = arith.constant 87 : index
    %392 = memref.load %arg1[%c87] : memref<256xf32, #tpu.memory_space<smem>>
    %393 = vector.broadcast %392 : f32 to vector<1x256xf32>
    %394 = arith.mulf %393, %291 : vector<1x256xf32>
    %395 = arith.addf %379, %394 : vector<1x256xf32>
    %c0_51 = arith.constant 0 : index
    %c14 = arith.constant 14 : index
    %c0_52 = arith.constant 0 : index
    %396 = vector.load %arg2[%c0_51, %c14, %c0_52] : memref<1x36x256xf32, #tpu.memory_space<vmem>>, vector<1x1x256xf32>
    %397 = vector.shape_cast %396 : vector<1x1x256xf32> to vector<1x256xf32>
    %c100 = arith.constant 100 : index
    %398 = memref.load %arg1[%c100] : memref<256xf32, #tpu.memory_space<smem>>
    %399 = vector.broadcast %398 : f32 to vector<1x256xf32>
    %400 = arith.mulf %399, %397 : vector<1x256xf32>
    %401 = arith.addf %383, %400 : vector<1x256xf32>
    %c101 = arith.constant 101 : index
    %402 = memref.load %arg1[%c101] : memref<256xf32, #tpu.memory_space<smem>>
    %403 = vector.broadcast %402 : f32 to vector<1x256xf32>
    %404 = arith.mulf %403, %397 : vector<1x256xf32>
    %405 = arith.addf %387, %404 : vector<1x256xf32>
    %c102 = arith.constant 102 : index
    %406 = memref.load %arg1[%c102] : memref<256xf32, #tpu.memory_space<smem>>
    %407 = vector.broadcast %406 : f32 to vector<1x256xf32>
    %408 = arith.mulf %407, %397 : vector<1x256xf32>
    %409 = arith.addf %391, %408 : vector<1x256xf32>
    %c103 = arith.constant 103 : index
    %410 = memref.load %arg1[%c103] : memref<256xf32, #tpu.memory_space<smem>>
    %411 = vector.broadcast %410 : f32 to vector<1x256xf32>
    %412 = arith.mulf %411, %397 : vector<1x256xf32>
    %413 = arith.addf %395, %412 : vector<1x256xf32>
    %c116 = arith.constant 116 : index
    %414 = memref.load %arg1[%c116] : memref<256xf32, #tpu.memory_space<smem>>
    %415 = vector.broadcast %414 : f32 to vector<1x256xf32>
    %416 = arith.mulf %415, %327 : vector<1x256xf32>
    %417 = arith.addf %401, %416 : vector<1x256xf32>
    %c117 = arith.constant 117 : index
    %418 = memref.load %arg1[%c117] : memref<256xf32, #tpu.memory_space<smem>>
    %419 = vector.broadcast %418 : f32 to vector<1x256xf32>
    %420 = arith.mulf %419, %327 : vector<1x256xf32>
    %421 = arith.addf %405, %420 : vector<1x256xf32>
    %c118 = arith.constant 118 : index
    %422 = memref.load %arg1[%c118] : memref<256xf32, #tpu.memory_space<smem>>
    %423 = vector.broadcast %422 : f32 to vector<1x256xf32>
    %424 = arith.mulf %423, %327 : vector<1x256xf32>
    %425 = arith.addf %409, %424 : vector<1x256xf32>
    %c119 = arith.constant 119 : index
    %426 = memref.load %arg1[%c119] : memref<256xf32, #tpu.memory_space<smem>>
    %427 = vector.broadcast %426 : f32 to vector<1x256xf32>
    %428 = arith.mulf %427, %327 : vector<1x256xf32>
    %429 = arith.addf %413, %428 : vector<1x256xf32>
    %c0_53 = arith.constant 0 : index
    %c15 = arith.constant 15 : index
    %c0_54 = arith.constant 0 : index
    %430 = vector.load %arg2[%c0_53, %c15, %c0_54] : memref<1x36x256xf32, #tpu.memory_space<vmem>>, vector<1x1x256xf32>
    %431 = vector.shape_cast %430 : vector<1x1x256xf32> to vector<1x256xf32>
    %c132 = arith.constant 132 : index
    %432 = memref.load %arg1[%c132] : memref<256xf32, #tpu.memory_space<smem>>
    %433 = vector.broadcast %432 : f32 to vector<1x256xf32>
    %434 = arith.mulf %433, %431 : vector<1x256xf32>
    %435 = arith.addf %211, %434 : vector<1x256xf32>
    %c133 = arith.constant 133 : index
    %436 = memref.load %arg1[%c133] : memref<256xf32, #tpu.memory_space<smem>>
    %437 = vector.broadcast %436 : f32 to vector<1x256xf32>
    %438 = arith.mulf %437, %431 : vector<1x256xf32>
    %439 = arith.addf %215, %438 : vector<1x256xf32>
    %c134 = arith.constant 134 : index
    %440 = memref.load %arg1[%c134] : memref<256xf32, #tpu.memory_space<smem>>
    %441 = vector.broadcast %440 : f32 to vector<1x256xf32>
    %442 = arith.mulf %441, %431 : vector<1x256xf32>
    %443 = arith.addf %219, %442 : vector<1x256xf32>
    %c135 = arith.constant 135 : index
    %444 = memref.load %arg1[%c135] : memref<256xf32, #tpu.memory_space<smem>>
    %445 = vector.broadcast %444 : f32 to vector<1x256xf32>
    %446 = arith.mulf %445, %431 : vector<1x256xf32>
    %447 = arith.addf %223, %446 : vector<1x256xf32>
    %c0_55 = arith.constant 0 : index
    %c16_56 = arith.constant 16 : index
    %c0_57 = arith.constant 0 : index
    %448 = vector.load %arg2[%c0_55, %c16_56, %c0_57] : memref<1x36x256xf32, #tpu.memory_space<vmem>>, vector<1x1x256xf32>
    %449 = vector.shape_cast %448 : vector<1x1x256xf32> to vector<1x256xf32>
    %c148 = arith.constant 148 : index
    %450 = memref.load %arg1[%c148] : memref<256xf32, #tpu.memory_space<smem>>
    %451 = vector.broadcast %450 : f32 to vector<1x256xf32>
    %452 = arith.mulf %451, %449 : vector<1x256xf32>
    %453 = arith.addf %435, %452 : vector<1x256xf32>
    %c149 = arith.constant 149 : index
    %454 = memref.load %arg1[%c149] : memref<256xf32, #tpu.memory_space<smem>>
    %455 = vector.broadcast %454 : f32 to vector<1x256xf32>
    %456 = arith.mulf %455, %449 : vector<1x256xf32>
    %457 = arith.addf %439, %456 : vector<1x256xf32>
    %c150 = arith.constant 150 : index
    %458 = memref.load %arg1[%c150] : memref<256xf32, #tpu.memory_space<smem>>
    %459 = vector.broadcast %458 : f32 to vector<1x256xf32>
    %460 = arith.mulf %459, %449 : vector<1x256xf32>
    %461 = arith.addf %443, %460 : vector<1x256xf32>
    %c151 = arith.constant 151 : index
    %462 = memref.load %arg1[%c151] : memref<256xf32, #tpu.memory_space<smem>>
    %463 = vector.broadcast %462 : f32 to vector<1x256xf32>
    %464 = arith.mulf %463, %449 : vector<1x256xf32>
    %465 = arith.addf %447, %464 : vector<1x256xf32>
    %c164 = arith.constant 164 : index
    %466 = memref.load %arg1[%c164] : memref<256xf32, #tpu.memory_space<smem>>
    %467 = vector.broadcast %466 : f32 to vector<1x256xf32>
    %468 = arith.mulf %467, %291 : vector<1x256xf32>
    %469 = arith.addf %453, %468 : vector<1x256xf32>
    %c165 = arith.constant 165 : index
    %470 = memref.load %arg1[%c165] : memref<256xf32, #tpu.memory_space<smem>>
    %471 = vector.broadcast %470 : f32 to vector<1x256xf32>
    %472 = arith.mulf %471, %291 : vector<1x256xf32>
    %473 = arith.addf %457, %472 : vector<1x256xf32>
    %c166 = arith.constant 166 : index
    %474 = memref.load %arg1[%c166] : memref<256xf32, #tpu.memory_space<smem>>
    %475 = vector.broadcast %474 : f32 to vector<1x256xf32>
    %476 = arith.mulf %475, %291 : vector<1x256xf32>
    %477 = arith.addf %461, %476 : vector<1x256xf32>
    %c167 = arith.constant 167 : index
    %478 = memref.load %arg1[%c167] : memref<256xf32, #tpu.memory_space<smem>>
    %479 = vector.broadcast %478 : f32 to vector<1x256xf32>
    %480 = arith.mulf %479, %291 : vector<1x256xf32>
    %481 = arith.addf %465, %480 : vector<1x256xf32>
    %c180 = arith.constant 180 : index
    %482 = memref.load %arg1[%c180] : memref<256xf32, #tpu.memory_space<smem>>
    %483 = vector.broadcast %482 : f32 to vector<1x256xf32>
    %484 = arith.mulf %483, %309 : vector<1x256xf32>
    %485 = arith.addf %469, %484 : vector<1x256xf32>
    %c181 = arith.constant 181 : index
    %486 = memref.load %arg1[%c181] : memref<256xf32, #tpu.memory_space<smem>>
    %487 = vector.broadcast %486 : f32 to vector<1x256xf32>
    %488 = arith.mulf %487, %309 : vector<1x256xf32>
    %489 = arith.addf %473, %488 : vector<1x256xf32>
    %c182 = arith.constant 182 : index
    %490 = memref.load %arg1[%c182] : memref<256xf32, #tpu.memory_space<smem>>
    %491 = vector.broadcast %490 : f32 to vector<1x256xf32>
    %492 = arith.mulf %491, %309 : vector<1x256xf32>
    %493 = arith.addf %477, %492 : vector<1x256xf32>
    %c183 = arith.constant 183 : index
    %494 = memref.load %arg1[%c183] : memref<256xf32, #tpu.memory_space<smem>>
    %495 = vector.broadcast %494 : f32 to vector<1x256xf32>
    %496 = arith.mulf %495, %309 : vector<1x256xf32>
    %497 = arith.addf %481, %496 : vector<1x256xf32>
    %c0_58 = arith.constant 0 : index
    %c17_59 = arith.constant 17 : index
    %c0_60 = arith.constant 0 : index
    %498 = vector.load %arg2[%c0_58, %c17_59, %c0_60] : memref<1x36x256xf32, #tpu.memory_space<vmem>>, vector<1x1x256xf32>
    %499 = vector.shape_cast %498 : vector<1x1x256xf32> to vector<1x256xf32>
    %c196 = arith.constant 196 : index
    %500 = memref.load %arg1[%c196] : memref<256xf32, #tpu.memory_space<smem>>
    %501 = vector.broadcast %500 : f32 to vector<1x256xf32>
    %502 = arith.mulf %501, %499 : vector<1x256xf32>
    %503 = arith.addf %277, %502 : vector<1x256xf32>
    %c197 = arith.constant 197 : index
    %504 = memref.load %arg1[%c197] : memref<256xf32, #tpu.memory_space<smem>>
    %505 = vector.broadcast %504 : f32 to vector<1x256xf32>
    %506 = arith.mulf %505, %499 : vector<1x256xf32>
    %507 = arith.addf %281, %506 : vector<1x256xf32>
    %c198 = arith.constant 198 : index
    %508 = memref.load %arg1[%c198] : memref<256xf32, #tpu.memory_space<smem>>
    %509 = vector.broadcast %508 : f32 to vector<1x256xf32>
    %510 = arith.mulf %509, %499 : vector<1x256xf32>
    %511 = arith.addf %285, %510 : vector<1x256xf32>
    %c199 = arith.constant 199 : index
    %512 = memref.load %arg1[%c199] : memref<256xf32, #tpu.memory_space<smem>>
    %513 = vector.broadcast %512 : f32 to vector<1x256xf32>
    %514 = arith.mulf %513, %499 : vector<1x256xf32>
    %515 = arith.addf %289, %514 : vector<1x256xf32>
    %c212 = arith.constant 212 : index
    %516 = memref.load %arg1[%c212] : memref<256xf32, #tpu.memory_space<smem>>
    %517 = vector.broadcast %516 : f32 to vector<1x256xf32>
    %518 = arith.mulf %517, %431 : vector<1x256xf32>
    %519 = arith.addf %503, %518 : vector<1x256xf32>
    %c213 = arith.constant 213 : index
    %520 = memref.load %arg1[%c213] : memref<256xf32, #tpu.memory_space<smem>>
    %521 = vector.broadcast %520 : f32 to vector<1x256xf32>
    %522 = arith.mulf %521, %431 : vector<1x256xf32>
    %523 = arith.addf %507, %522 : vector<1x256xf32>
    %c214 = arith.constant 214 : index
    %524 = memref.load %arg1[%c214] : memref<256xf32, #tpu.memory_space<smem>>
    %525 = vector.broadcast %524 : f32 to vector<1x256xf32>
    %526 = arith.mulf %525, %431 : vector<1x256xf32>
    %527 = arith.addf %511, %526 : vector<1x256xf32>
    %c215 = arith.constant 215 : index
    %528 = memref.load %arg1[%c215] : memref<256xf32, #tpu.memory_space<smem>>
    %529 = vector.broadcast %528 : f32 to vector<1x256xf32>
    %530 = arith.mulf %529, %431 : vector<1x256xf32>
    %531 = arith.addf %515, %530 : vector<1x256xf32>
    %c228 = arith.constant 228 : index
    %532 = memref.load %arg1[%c228] : memref<256xf32, #tpu.memory_space<smem>>
    %533 = vector.broadcast %532 : f32 to vector<1x256xf32>
    %534 = arith.mulf %533, %363 : vector<1x256xf32>
    %535 = arith.addf %519, %534 : vector<1x256xf32>
    %c229 = arith.constant 229 : index
    %536 = memref.load %arg1[%c229] : memref<256xf32, #tpu.memory_space<smem>>
    %537 = vector.broadcast %536 : f32 to vector<1x256xf32>
    %538 = arith.mulf %537, %363 : vector<1x256xf32>
    %539 = arith.addf %523, %538 : vector<1x256xf32>
    %c230 = arith.constant 230 : index
    %540 = memref.load %arg1[%c230] : memref<256xf32, #tpu.memory_space<smem>>
    %541 = vector.broadcast %540 : f32 to vector<1x256xf32>
    %542 = arith.mulf %541, %363 : vector<1x256xf32>
    %543 = arith.addf %527, %542 : vector<1x256xf32>
    %c231 = arith.constant 231 : index
    %544 = memref.load %arg1[%c231] : memref<256xf32, #tpu.memory_space<smem>>
    %545 = vector.broadcast %544 : f32 to vector<1x256xf32>
    %546 = arith.mulf %545, %363 : vector<1x256xf32>
    %547 = arith.addf %531, %546 : vector<1x256xf32>
    %c244 = arith.constant 244 : index
    %548 = memref.load %arg1[%c244] : memref<256xf32, #tpu.memory_space<smem>>
    %549 = vector.broadcast %548 : f32 to vector<1x256xf32>
    %550 = arith.mulf %549, %291 : vector<1x256xf32>
    %551 = arith.addf %535, %550 : vector<1x256xf32>
    %c245 = arith.constant 245 : index
    %552 = memref.load %arg1[%c245] : memref<256xf32, #tpu.memory_space<smem>>
    %553 = vector.broadcast %552 : f32 to vector<1x256xf32>
    %554 = arith.mulf %553, %291 : vector<1x256xf32>
    %555 = arith.addf %539, %554 : vector<1x256xf32>
    %c246 = arith.constant 246 : index
    %556 = memref.load %arg1[%c246] : memref<256xf32, #tpu.memory_space<smem>>
    %557 = vector.broadcast %556 : f32 to vector<1x256xf32>
    %558 = arith.mulf %557, %291 : vector<1x256xf32>
    %559 = arith.addf %543, %558 : vector<1x256xf32>
    %c247 = arith.constant 247 : index
    %560 = memref.load %arg1[%c247] : memref<256xf32, #tpu.memory_space<smem>>
    %561 = vector.broadcast %560 : f32 to vector<1x256xf32>
    %562 = arith.mulf %561, %291 : vector<1x256xf32>
    %563 = arith.addf %547, %562 : vector<1x256xf32>
    %c0_61 = arith.constant 0 : index
    %c18_62 = arith.constant 18 : index
    %c0_63 = arith.constant 0 : index
    %564 = vector.load %arg2[%c0_61, %c18_62, %c0_63] : memref<1x36x256xf32, #tpu.memory_space<vmem>>, vector<1x1x256xf32>
    %565 = vector.shape_cast %564 : vector<1x1x256xf32> to vector<1x256xf32>
    %c8_64 = arith.constant 8 : index
    %566 = memref.load %arg1[%c8_64] : memref<256xf32, #tpu.memory_space<smem>>
    %567 = vector.broadcast %566 : f32 to vector<1x256xf32>
    %568 = arith.mulf %567, %565 : vector<1x256xf32>
    %569 = arith.addf %349, %568 : vector<1x256xf32>
    %c9_65 = arith.constant 9 : index
    %570 = memref.load %arg1[%c9_65] : memref<256xf32, #tpu.memory_space<smem>>
    %571 = vector.broadcast %570 : f32 to vector<1x256xf32>
    %572 = arith.mulf %571, %565 : vector<1x256xf32>
    %573 = arith.addf %353, %572 : vector<1x256xf32>
    %c10_66 = arith.constant 10 : index
    %574 = memref.load %arg1[%c10_66] : memref<256xf32, #tpu.memory_space<smem>>
    %575 = vector.broadcast %574 : f32 to vector<1x256xf32>
    %576 = arith.mulf %575, %565 : vector<1x256xf32>
    %577 = arith.addf %357, %576 : vector<1x256xf32>
    %c11_67 = arith.constant 11 : index
    %578 = memref.load %arg1[%c11_67] : memref<256xf32, #tpu.memory_space<smem>>
    %579 = vector.broadcast %578 : f32 to vector<1x256xf32>
    %580 = arith.mulf %579, %565 : vector<1x256xf32>
    %581 = arith.addf %361, %580 : vector<1x256xf32>
    %c0_68 = arith.constant 0 : index
    %c19_69 = arith.constant 19 : index
    %c0_70 = arith.constant 0 : index
    %582 = vector.load %arg2[%c0_68, %c19_69, %c0_70] : memref<1x36x256xf32, #tpu.memory_space<vmem>>, vector<1x1x256xf32>
    %583 = vector.shape_cast %582 : vector<1x1x256xf32> to vector<1x256xf32>
    %c24 = arith.constant 24 : index
    %584 = memref.load %arg1[%c24] : memref<256xf32, #tpu.memory_space<smem>>
    %585 = vector.broadcast %584 : f32 to vector<1x256xf32>
    %586 = arith.mulf %585, %583 : vector<1x256xf32>
    %587 = arith.addf %569, %586 : vector<1x256xf32>
    %c25 = arith.constant 25 : index
    %588 = memref.load %arg1[%c25] : memref<256xf32, #tpu.memory_space<smem>>
    %589 = vector.broadcast %588 : f32 to vector<1x256xf32>
    %590 = arith.mulf %589, %583 : vector<1x256xf32>
    %591 = arith.addf %573, %590 : vector<1x256xf32>
    %c26 = arith.constant 26 : index
    %592 = memref.load %arg1[%c26] : memref<256xf32, #tpu.memory_space<smem>>
    %593 = vector.broadcast %592 : f32 to vector<1x256xf32>
    %594 = arith.mulf %593, %583 : vector<1x256xf32>
    %595 = arith.addf %577, %594 : vector<1x256xf32>
    %c27 = arith.constant 27 : index
    %596 = memref.load %arg1[%c27] : memref<256xf32, #tpu.memory_space<smem>>
    %597 = vector.broadcast %596 : f32 to vector<1x256xf32>
    %598 = arith.mulf %597, %583 : vector<1x256xf32>
    %599 = arith.addf %581, %598 : vector<1x256xf32>
    %c0_71 = arith.constant 0 : index
    %c20_72 = arith.constant 20 : index
    %c0_73 = arith.constant 0 : index
    %600 = vector.load %arg2[%c0_71, %c20_72, %c0_73] : memref<1x36x256xf32, #tpu.memory_space<vmem>>, vector<1x1x256xf32>
    %601 = vector.shape_cast %600 : vector<1x1x256xf32> to vector<1x256xf32>
    %c40 = arith.constant 40 : index
    %602 = memref.load %arg1[%c40] : memref<256xf32, #tpu.memory_space<smem>>
    %603 = vector.broadcast %602 : f32 to vector<1x256xf32>
    %604 = arith.mulf %603, %601 : vector<1x256xf32>
    %605 = arith.addf %587, %604 : vector<1x256xf32>
    %c41 = arith.constant 41 : index
    %606 = memref.load %arg1[%c41] : memref<256xf32, #tpu.memory_space<smem>>
    %607 = vector.broadcast %606 : f32 to vector<1x256xf32>
    %608 = arith.mulf %607, %601 : vector<1x256xf32>
    %609 = arith.addf %591, %608 : vector<1x256xf32>
    %c42 = arith.constant 42 : index
    %610 = memref.load %arg1[%c42] : memref<256xf32, #tpu.memory_space<smem>>
    %611 = vector.broadcast %610 : f32 to vector<1x256xf32>
    %612 = arith.mulf %611, %601 : vector<1x256xf32>
    %613 = arith.addf %595, %612 : vector<1x256xf32>
    %c43 = arith.constant 43 : index
    %614 = memref.load %arg1[%c43] : memref<256xf32, #tpu.memory_space<smem>>
    %615 = vector.broadcast %614 : f32 to vector<1x256xf32>
    %616 = arith.mulf %615, %601 : vector<1x256xf32>
    %617 = arith.addf %599, %616 : vector<1x256xf32>
    %c0_74 = arith.constant 0 : index
    %c21_75 = arith.constant 21 : index
    %c0_76 = arith.constant 0 : index
    %618 = vector.load %arg2[%c0_74, %c21_75, %c0_76] : memref<1x36x256xf32, #tpu.memory_space<vmem>>, vector<1x1x256xf32>
    %619 = vector.shape_cast %618 : vector<1x1x256xf32> to vector<1x256xf32>
    %c56 = arith.constant 56 : index
    %620 = memref.load %arg1[%c56] : memref<256xf32, #tpu.memory_space<smem>>
    %621 = vector.broadcast %620 : f32 to vector<1x256xf32>
    %622 = arith.mulf %621, %619 : vector<1x256xf32>
    %623 = arith.addf %605, %622 : vector<1x256xf32>
    %c57 = arith.constant 57 : index
    %624 = memref.load %arg1[%c57] : memref<256xf32, #tpu.memory_space<smem>>
    %625 = vector.broadcast %624 : f32 to vector<1x256xf32>
    %626 = arith.mulf %625, %619 : vector<1x256xf32>
    %627 = arith.addf %609, %626 : vector<1x256xf32>
    %c58 = arith.constant 58 : index
    %628 = memref.load %arg1[%c58] : memref<256xf32, #tpu.memory_space<smem>>
    %629 = vector.broadcast %628 : f32 to vector<1x256xf32>
    %630 = arith.mulf %629, %619 : vector<1x256xf32>
    %631 = arith.addf %613, %630 : vector<1x256xf32>
    %c59 = arith.constant 59 : index
    %632 = memref.load %arg1[%c59] : memref<256xf32, #tpu.memory_space<smem>>
    %633 = vector.broadcast %632 : f32 to vector<1x256xf32>
    %634 = arith.mulf %633, %619 : vector<1x256xf32>
    %635 = arith.addf %617, %634 : vector<1x256xf32>
    %c0_77 = arith.constant 0 : index
    %c22_78 = arith.constant 22 : index
    %c0_79 = arith.constant 0 : index
    %636 = vector.load %arg2[%c0_77, %c22_78, %c0_79] : memref<1x36x256xf32, #tpu.memory_space<vmem>>, vector<1x1x256xf32>
    %637 = vector.shape_cast %636 : vector<1x1x256xf32> to vector<1x256xf32>
    %c72 = arith.constant 72 : index
    %638 = memref.load %arg1[%c72] : memref<256xf32, #tpu.memory_space<smem>>
    %639 = vector.broadcast %638 : f32 to vector<1x256xf32>
    %640 = arith.mulf %639, %637 : vector<1x256xf32>
    %641 = arith.addf %417, %640 : vector<1x256xf32>
    %c73 = arith.constant 73 : index
    %642 = memref.load %arg1[%c73] : memref<256xf32, #tpu.memory_space<smem>>
    %643 = vector.broadcast %642 : f32 to vector<1x256xf32>
    %644 = arith.mulf %643, %637 : vector<1x256xf32>
    %645 = arith.addf %421, %644 : vector<1x256xf32>
    %c74 = arith.constant 74 : index
    %646 = memref.load %arg1[%c74] : memref<256xf32, #tpu.memory_space<smem>>
    %647 = vector.broadcast %646 : f32 to vector<1x256xf32>
    %648 = arith.mulf %647, %637 : vector<1x256xf32>
    %649 = arith.addf %425, %648 : vector<1x256xf32>
    %c75 = arith.constant 75 : index
    %650 = memref.load %arg1[%c75] : memref<256xf32, #tpu.memory_space<smem>>
    %651 = vector.broadcast %650 : f32 to vector<1x256xf32>
    %652 = arith.mulf %651, %637 : vector<1x256xf32>
    %653 = arith.addf %429, %652 : vector<1x256xf32>
    %c88 = arith.constant 88 : index
    %654 = memref.load %arg1[%c88] : memref<256xf32, #tpu.memory_space<smem>>
    %655 = vector.broadcast %654 : f32 to vector<1x256xf32>
    %656 = arith.mulf %655, %565 : vector<1x256xf32>
    %657 = arith.addf %641, %656 : vector<1x256xf32>
    %c89 = arith.constant 89 : index
    %658 = memref.load %arg1[%c89] : memref<256xf32, #tpu.memory_space<smem>>
    %659 = vector.broadcast %658 : f32 to vector<1x256xf32>
    %660 = arith.mulf %659, %565 : vector<1x256xf32>
    %661 = arith.addf %645, %660 : vector<1x256xf32>
    %c90 = arith.constant 90 : index
    %662 = memref.load %arg1[%c90] : memref<256xf32, #tpu.memory_space<smem>>
    %663 = vector.broadcast %662 : f32 to vector<1x256xf32>
    %664 = arith.mulf %663, %565 : vector<1x256xf32>
    %665 = arith.addf %649, %664 : vector<1x256xf32>
    %c91 = arith.constant 91 : index
    %666 = memref.load %arg1[%c91] : memref<256xf32, #tpu.memory_space<smem>>
    %667 = vector.broadcast %666 : f32 to vector<1x256xf32>
    %668 = arith.mulf %667, %565 : vector<1x256xf32>
    %669 = arith.addf %653, %668 : vector<1x256xf32>
    %c0_80 = arith.constant 0 : index
    %c23_81 = arith.constant 23 : index
    %c0_82 = arith.constant 0 : index
    %670 = vector.load %arg2[%c0_80, %c23_81, %c0_82] : memref<1x36x256xf32, #tpu.memory_space<vmem>>, vector<1x1x256xf32>
    %671 = vector.shape_cast %670 : vector<1x1x256xf32> to vector<1x256xf32>
    %c104 = arith.constant 104 : index
    %672 = memref.load %arg1[%c104] : memref<256xf32, #tpu.memory_space<smem>>
    %673 = vector.broadcast %672 : f32 to vector<1x256xf32>
    %674 = arith.mulf %673, %671 : vector<1x256xf32>
    %675 = arith.addf %657, %674 : vector<1x256xf32>
    %c105 = arith.constant 105 : index
    %676 = memref.load %arg1[%c105] : memref<256xf32, #tpu.memory_space<smem>>
    %677 = vector.broadcast %676 : f32 to vector<1x256xf32>
    %678 = arith.mulf %677, %671 : vector<1x256xf32>
    %679 = arith.addf %661, %678 : vector<1x256xf32>
    %c106 = arith.constant 106 : index
    %680 = memref.load %arg1[%c106] : memref<256xf32, #tpu.memory_space<smem>>
    %681 = vector.broadcast %680 : f32 to vector<1x256xf32>
    %682 = arith.mulf %681, %671 : vector<1x256xf32>
    %683 = arith.addf %665, %682 : vector<1x256xf32>
    %c107 = arith.constant 107 : index
    %684 = memref.load %arg1[%c107] : memref<256xf32, #tpu.memory_space<smem>>
    %685 = vector.broadcast %684 : f32 to vector<1x256xf32>
    %686 = arith.mulf %685, %671 : vector<1x256xf32>
    %687 = arith.addf %669, %686 : vector<1x256xf32>
    %c120 = arith.constant 120 : index
    %688 = memref.load %arg1[%c120] : memref<256xf32, #tpu.memory_space<smem>>
    %689 = vector.broadcast %688 : f32 to vector<1x256xf32>
    %690 = arith.mulf %689, %601 : vector<1x256xf32>
    %691 = arith.addf %675, %690 : vector<1x256xf32>
    %c121 = arith.constant 121 : index
    %692 = memref.load %arg1[%c121] : memref<256xf32, #tpu.memory_space<smem>>
    %693 = vector.broadcast %692 : f32 to vector<1x256xf32>
    %694 = arith.mulf %693, %601 : vector<1x256xf32>
    %695 = arith.addf %679, %694 : vector<1x256xf32>
    %c122 = arith.constant 122 : index
    %696 = memref.load %arg1[%c122] : memref<256xf32, #tpu.memory_space<smem>>
    %697 = vector.broadcast %696 : f32 to vector<1x256xf32>
    %698 = arith.mulf %697, %601 : vector<1x256xf32>
    %699 = arith.addf %683, %698 : vector<1x256xf32>
    %c123 = arith.constant 123 : index
    %700 = memref.load %arg1[%c123] : memref<256xf32, #tpu.memory_space<smem>>
    %701 = vector.broadcast %700 : f32 to vector<1x256xf32>
    %702 = arith.mulf %701, %601 : vector<1x256xf32>
    %703 = arith.addf %687, %702 : vector<1x256xf32>
    %c0_83 = arith.constant 0 : index
    %c24_84 = arith.constant 24 : index
    %c0_85 = arith.constant 0 : index
    %704 = vector.load %arg2[%c0_83, %c24_84, %c0_85] : memref<1x36x256xf32, #tpu.memory_space<vmem>>, vector<1x1x256xf32>
    %705 = vector.shape_cast %704 : vector<1x1x256xf32> to vector<1x256xf32>
    %c136 = arith.constant 136 : index
    %706 = memref.load %arg1[%c136] : memref<256xf32, #tpu.memory_space<smem>>
    %707 = vector.broadcast %706 : f32 to vector<1x256xf32>
    %708 = arith.mulf %707, %705 : vector<1x256xf32>
    %709 = arith.addf %485, %708 : vector<1x256xf32>
    %c137 = arith.constant 137 : index
    %710 = memref.load %arg1[%c137] : memref<256xf32, #tpu.memory_space<smem>>
    %711 = vector.broadcast %710 : f32 to vector<1x256xf32>
    %712 = arith.mulf %711, %705 : vector<1x256xf32>
    %713 = arith.addf %489, %712 : vector<1x256xf32>
    %c138 = arith.constant 138 : index
    %714 = memref.load %arg1[%c138] : memref<256xf32, #tpu.memory_space<smem>>
    %715 = vector.broadcast %714 : f32 to vector<1x256xf32>
    %716 = arith.mulf %715, %705 : vector<1x256xf32>
    %717 = arith.addf %493, %716 : vector<1x256xf32>
    %c139 = arith.constant 139 : index
    %718 = memref.load %arg1[%c139] : memref<256xf32, #tpu.memory_space<smem>>
    %719 = vector.broadcast %718 : f32 to vector<1x256xf32>
    %720 = arith.mulf %719, %705 : vector<1x256xf32>
    %721 = arith.addf %497, %720 : vector<1x256xf32>
    %c0_86 = arith.constant 0 : index
    %c25_87 = arith.constant 25 : index
    %c0_88 = arith.constant 0 : index
    %722 = vector.load %arg2[%c0_86, %c25_87, %c0_88] : memref<1x36x256xf32, #tpu.memory_space<vmem>>, vector<1x1x256xf32>
    %723 = vector.shape_cast %722 : vector<1x1x256xf32> to vector<1x256xf32>
    %c152 = arith.constant 152 : index
    %724 = memref.load %arg1[%c152] : memref<256xf32, #tpu.memory_space<smem>>
    %725 = vector.broadcast %724 : f32 to vector<1x256xf32>
    %726 = arith.mulf %725, %723 : vector<1x256xf32>
    %727 = arith.addf %709, %726 : vector<1x256xf32>
    %c153 = arith.constant 153 : index
    %728 = memref.load %arg1[%c153] : memref<256xf32, #tpu.memory_space<smem>>
    %729 = vector.broadcast %728 : f32 to vector<1x256xf32>
    %730 = arith.mulf %729, %723 : vector<1x256xf32>
    %731 = arith.addf %713, %730 : vector<1x256xf32>
    %c154 = arith.constant 154 : index
    %732 = memref.load %arg1[%c154] : memref<256xf32, #tpu.memory_space<smem>>
    %733 = vector.broadcast %732 : f32 to vector<1x256xf32>
    %734 = arith.mulf %733, %723 : vector<1x256xf32>
    %735 = arith.addf %717, %734 : vector<1x256xf32>
    %c155 = arith.constant 155 : index
    %736 = memref.load %arg1[%c155] : memref<256xf32, #tpu.memory_space<smem>>
    %737 = vector.broadcast %736 : f32 to vector<1x256xf32>
    %738 = arith.mulf %737, %723 : vector<1x256xf32>
    %739 = arith.addf %721, %738 : vector<1x256xf32>
    %c168 = arith.constant 168 : index
    %740 = memref.load %arg1[%c168] : memref<256xf32, #tpu.memory_space<smem>>
    %741 = vector.broadcast %740 : f32 to vector<1x256xf32>
    %742 = arith.mulf %741, %565 : vector<1x256xf32>
    %743 = arith.addf %727, %742 : vector<1x256xf32>
    %c169 = arith.constant 169 : index
    %744 = memref.load %arg1[%c169] : memref<256xf32, #tpu.memory_space<smem>>
    %745 = vector.broadcast %744 : f32 to vector<1x256xf32>
    %746 = arith.mulf %745, %565 : vector<1x256xf32>
    %747 = arith.addf %731, %746 : vector<1x256xf32>
    %c170 = arith.constant 170 : index
    %748 = memref.load %arg1[%c170] : memref<256xf32, #tpu.memory_space<smem>>
    %749 = vector.broadcast %748 : f32 to vector<1x256xf32>
    %750 = arith.mulf %749, %565 : vector<1x256xf32>
    %751 = arith.addf %735, %750 : vector<1x256xf32>
    %c171 = arith.constant 171 : index
    %752 = memref.load %arg1[%c171] : memref<256xf32, #tpu.memory_space<smem>>
    %753 = vector.broadcast %752 : f32 to vector<1x256xf32>
    %754 = arith.mulf %753, %565 : vector<1x256xf32>
    %755 = arith.addf %739, %754 : vector<1x256xf32>
    %c184 = arith.constant 184 : index
    %756 = memref.load %arg1[%c184] : memref<256xf32, #tpu.memory_space<smem>>
    %757 = vector.broadcast %756 : f32 to vector<1x256xf32>
    %758 = arith.mulf %757, %583 : vector<1x256xf32>
    %759 = arith.addf %743, %758 : vector<1x256xf32>
    %c185 = arith.constant 185 : index
    %760 = memref.load %arg1[%c185] : memref<256xf32, #tpu.memory_space<smem>>
    %761 = vector.broadcast %760 : f32 to vector<1x256xf32>
    %762 = arith.mulf %761, %583 : vector<1x256xf32>
    %763 = arith.addf %747, %762 : vector<1x256xf32>
    %c186 = arith.constant 186 : index
    %764 = memref.load %arg1[%c186] : memref<256xf32, #tpu.memory_space<smem>>
    %765 = vector.broadcast %764 : f32 to vector<1x256xf32>
    %766 = arith.mulf %765, %583 : vector<1x256xf32>
    %767 = arith.addf %751, %766 : vector<1x256xf32>
    %c187 = arith.constant 187 : index
    %768 = memref.load %arg1[%c187] : memref<256xf32, #tpu.memory_space<smem>>
    %769 = vector.broadcast %768 : f32 to vector<1x256xf32>
    %770 = arith.mulf %769, %583 : vector<1x256xf32>
    %771 = arith.addf %755, %770 : vector<1x256xf32>
    %c0_89 = arith.constant 0 : index
    %c26_90 = arith.constant 26 : index
    %c0_91 = arith.constant 0 : index
    %772 = vector.load %arg2[%c0_89, %c26_90, %c0_91] : memref<1x36x256xf32, #tpu.memory_space<vmem>>, vector<1x1x256xf32>
    %773 = vector.shape_cast %772 : vector<1x1x256xf32> to vector<1x256xf32>
    %c200 = arith.constant 200 : index
    %774 = memref.load %arg1[%c200] : memref<256xf32, #tpu.memory_space<smem>>
    %775 = vector.broadcast %774 : f32 to vector<1x256xf32>
    %776 = arith.mulf %775, %773 : vector<1x256xf32>
    %777 = arith.addf %551, %776 : vector<1x256xf32>
    %c201 = arith.constant 201 : index
    %778 = memref.load %arg1[%c201] : memref<256xf32, #tpu.memory_space<smem>>
    %779 = vector.broadcast %778 : f32 to vector<1x256xf32>
    %780 = arith.mulf %779, %773 : vector<1x256xf32>
    %781 = arith.addf %555, %780 : vector<1x256xf32>
    %c202 = arith.constant 202 : index
    %782 = memref.load %arg1[%c202] : memref<256xf32, #tpu.memory_space<smem>>
    %783 = vector.broadcast %782 : f32 to vector<1x256xf32>
    %784 = arith.mulf %783, %773 : vector<1x256xf32>
    %785 = arith.addf %559, %784 : vector<1x256xf32>
    %c203 = arith.constant 203 : index
    %786 = memref.load %arg1[%c203] : memref<256xf32, #tpu.memory_space<smem>>
    %787 = vector.broadcast %786 : f32 to vector<1x256xf32>
    %788 = arith.mulf %787, %773 : vector<1x256xf32>
    %789 = arith.addf %563, %788 : vector<1x256xf32>
    %c216 = arith.constant 216 : index
    %790 = memref.load %arg1[%c216] : memref<256xf32, #tpu.memory_space<smem>>
    %791 = vector.broadcast %790 : f32 to vector<1x256xf32>
    %792 = arith.mulf %791, %705 : vector<1x256xf32>
    %793 = arith.addf %777, %792 : vector<1x256xf32>
    %c217 = arith.constant 217 : index
    %794 = memref.load %arg1[%c217] : memref<256xf32, #tpu.memory_space<smem>>
    %795 = vector.broadcast %794 : f32 to vector<1x256xf32>
    %796 = arith.mulf %795, %705 : vector<1x256xf32>
    %797 = arith.addf %781, %796 : vector<1x256xf32>
    %c218 = arith.constant 218 : index
    %798 = memref.load %arg1[%c218] : memref<256xf32, #tpu.memory_space<smem>>
    %799 = vector.broadcast %798 : f32 to vector<1x256xf32>
    %800 = arith.mulf %799, %705 : vector<1x256xf32>
    %801 = arith.addf %785, %800 : vector<1x256xf32>
    %c219 = arith.constant 219 : index
    %802 = memref.load %arg1[%c219] : memref<256xf32, #tpu.memory_space<smem>>
    %803 = vector.broadcast %802 : f32 to vector<1x256xf32>
    %804 = arith.mulf %803, %705 : vector<1x256xf32>
    %805 = arith.addf %789, %804 : vector<1x256xf32>
    %c232 = arith.constant 232 : index
    %806 = memref.load %arg1[%c232] : memref<256xf32, #tpu.memory_space<smem>>
    %807 = vector.broadcast %806 : f32 to vector<1x256xf32>
    %808 = arith.mulf %807, %637 : vector<1x256xf32>
    %809 = arith.addf %793, %808 : vector<1x256xf32>
    %c233 = arith.constant 233 : index
    %810 = memref.load %arg1[%c233] : memref<256xf32, #tpu.memory_space<smem>>
    %811 = vector.broadcast %810 : f32 to vector<1x256xf32>
    %812 = arith.mulf %811, %637 : vector<1x256xf32>
    %813 = arith.addf %797, %812 : vector<1x256xf32>
    %c234 = arith.constant 234 : index
    %814 = memref.load %arg1[%c234] : memref<256xf32, #tpu.memory_space<smem>>
    %815 = vector.broadcast %814 : f32 to vector<1x256xf32>
    %816 = arith.mulf %815, %637 : vector<1x256xf32>
    %817 = arith.addf %801, %816 : vector<1x256xf32>
    %c235 = arith.constant 235 : index
    %818 = memref.load %arg1[%c235] : memref<256xf32, #tpu.memory_space<smem>>
    %819 = vector.broadcast %818 : f32 to vector<1x256xf32>
    %820 = arith.mulf %819, %637 : vector<1x256xf32>
    %821 = arith.addf %805, %820 : vector<1x256xf32>
    %c248 = arith.constant 248 : index
    %822 = memref.load %arg1[%c248] : memref<256xf32, #tpu.memory_space<smem>>
    %823 = vector.broadcast %822 : f32 to vector<1x256xf32>
    %824 = arith.mulf %823, %565 : vector<1x256xf32>
    %825 = arith.addf %809, %824 : vector<1x256xf32>
    %c249 = arith.constant 249 : index
    %826 = memref.load %arg1[%c249] : memref<256xf32, #tpu.memory_space<smem>>
    %827 = vector.broadcast %826 : f32 to vector<1x256xf32>
    %828 = arith.mulf %827, %565 : vector<1x256xf32>
    %829 = arith.addf %813, %828 : vector<1x256xf32>
    %c250 = arith.constant 250 : index
    %830 = memref.load %arg1[%c250] : memref<256xf32, #tpu.memory_space<smem>>
    %831 = vector.broadcast %830 : f32 to vector<1x256xf32>
    %832 = arith.mulf %831, %565 : vector<1x256xf32>
    %833 = arith.addf %817, %832 : vector<1x256xf32>
    %c251 = arith.constant 251 : index
    %834 = memref.load %arg1[%c251] : memref<256xf32, #tpu.memory_space<smem>>
    %835 = vector.broadcast %834 : f32 to vector<1x256xf32>
    %836 = arith.mulf %835, %565 : vector<1x256xf32>
    %837 = arith.addf %821, %836 : vector<1x256xf32>
    %c0_92 = arith.constant 0 : index
    %c27_93 = arith.constant 27 : index
    %c0_94 = arith.constant 0 : index
    %838 = vector.load %arg2[%c0_92, %c27_93, %c0_94] : memref<1x36x256xf32, #tpu.memory_space<vmem>>, vector<1x1x256xf32>
    %839 = vector.shape_cast %838 : vector<1x1x256xf32> to vector<1x256xf32>
    %c12_95 = arith.constant 12 : index
    %840 = memref.load %arg1[%c12_95] : memref<256xf32, #tpu.memory_space<smem>>
    %841 = vector.broadcast %840 : f32 to vector<1x256xf32>
    %842 = arith.mulf %841, %839 : vector<1x256xf32>
    %843 = arith.addf %623, %842 : vector<1x256xf32>
    %c13_96 = arith.constant 13 : index
    %844 = memref.load %arg1[%c13_96] : memref<256xf32, #tpu.memory_space<smem>>
    %845 = vector.broadcast %844 : f32 to vector<1x256xf32>
    %846 = arith.mulf %845, %839 : vector<1x256xf32>
    %847 = arith.addf %627, %846 : vector<1x256xf32>
    %c14_97 = arith.constant 14 : index
    %848 = memref.load %arg1[%c14_97] : memref<256xf32, #tpu.memory_space<smem>>
    %849 = vector.broadcast %848 : f32 to vector<1x256xf32>
    %850 = arith.mulf %849, %839 : vector<1x256xf32>
    %851 = arith.addf %631, %850 : vector<1x256xf32>
    %c15_98 = arith.constant 15 : index
    %852 = memref.load %arg1[%c15_98] : memref<256xf32, #tpu.memory_space<smem>>
    %853 = vector.broadcast %852 : f32 to vector<1x256xf32>
    %854 = arith.mulf %853, %839 : vector<1x256xf32>
    %855 = arith.addf %635, %854 : vector<1x256xf32>
    %c0_99 = arith.constant 0 : index
    %c28 = arith.constant 28 : index
    %c0_100 = arith.constant 0 : index
    %856 = vector.load %arg2[%c0_99, %c28, %c0_100] : memref<1x36x256xf32, #tpu.memory_space<vmem>>, vector<1x1x256xf32>
    %857 = vector.shape_cast %856 : vector<1x1x256xf32> to vector<1x256xf32>
    %c28_101 = arith.constant 28 : index
    %858 = memref.load %arg1[%c28_101] : memref<256xf32, #tpu.memory_space<smem>>
    %859 = vector.broadcast %858 : f32 to vector<1x256xf32>
    %860 = arith.mulf %859, %857 : vector<1x256xf32>
    %861 = arith.addf %843, %860 : vector<1x256xf32>
    %c29 = arith.constant 29 : index
    %862 = memref.load %arg1[%c29] : memref<256xf32, #tpu.memory_space<smem>>
    %863 = vector.broadcast %862 : f32 to vector<1x256xf32>
    %864 = arith.mulf %863, %857 : vector<1x256xf32>
    %865 = arith.addf %847, %864 : vector<1x256xf32>
    %c30 = arith.constant 30 : index
    %866 = memref.load %arg1[%c30] : memref<256xf32, #tpu.memory_space<smem>>
    %867 = vector.broadcast %866 : f32 to vector<1x256xf32>
    %868 = arith.mulf %867, %857 : vector<1x256xf32>
    %869 = arith.addf %851, %868 : vector<1x256xf32>
    %c31 = arith.constant 31 : index
    %870 = memref.load %arg1[%c31] : memref<256xf32, #tpu.memory_space<smem>>
    %871 = vector.broadcast %870 : f32 to vector<1x256xf32>
    %872 = arith.mulf %871, %857 : vector<1x256xf32>
    %873 = arith.addf %855, %872 : vector<1x256xf32>
    %c0_102 = arith.constant 0 : index
    %c29_103 = arith.constant 29 : index
    %c0_104 = arith.constant 0 : index
    %874 = vector.load %arg2[%c0_102, %c29_103, %c0_104] : memref<1x36x256xf32, #tpu.memory_space<vmem>>, vector<1x1x256xf32>
    %875 = vector.shape_cast %874 : vector<1x1x256xf32> to vector<1x256xf32>
    %c44 = arith.constant 44 : index
    %876 = memref.load %arg1[%c44] : memref<256xf32, #tpu.memory_space<smem>>
    %877 = vector.broadcast %876 : f32 to vector<1x256xf32>
    %878 = arith.mulf %877, %875 : vector<1x256xf32>
    %879 = arith.addf %861, %878 : vector<1x256xf32>
    %c45 = arith.constant 45 : index
    %880 = memref.load %arg1[%c45] : memref<256xf32, #tpu.memory_space<smem>>
    %881 = vector.broadcast %880 : f32 to vector<1x256xf32>
    %882 = arith.mulf %881, %875 : vector<1x256xf32>
    %883 = arith.addf %865, %882 : vector<1x256xf32>
    %c46 = arith.constant 46 : index
    %884 = memref.load %arg1[%c46] : memref<256xf32, #tpu.memory_space<smem>>
    %885 = vector.broadcast %884 : f32 to vector<1x256xf32>
    %886 = arith.mulf %885, %875 : vector<1x256xf32>
    %887 = arith.addf %869, %886 : vector<1x256xf32>
    %c47 = arith.constant 47 : index
    %888 = memref.load %arg1[%c47] : memref<256xf32, #tpu.memory_space<smem>>
    %889 = vector.broadcast %888 : f32 to vector<1x256xf32>
    %890 = arith.mulf %889, %875 : vector<1x256xf32>
    %891 = arith.addf %873, %890 : vector<1x256xf32>
    %c0_105 = arith.constant 0 : index
    %c30_106 = arith.constant 30 : index
    %c0_107 = arith.constant 0 : index
    %892 = vector.load %arg2[%c0_105, %c30_106, %c0_107] : memref<1x36x256xf32, #tpu.memory_space<vmem>>, vector<1x1x256xf32>
    %893 = vector.shape_cast %892 : vector<1x1x256xf32> to vector<1x256xf32>
    %c60 = arith.constant 60 : index
    %894 = memref.load %arg1[%c60] : memref<256xf32, #tpu.memory_space<smem>>
    %895 = vector.broadcast %894 : f32 to vector<1x256xf32>
    %896 = arith.mulf %895, %893 : vector<1x256xf32>
    %897 = arith.addf %879, %896 : vector<1x256xf32>
    %c61 = arith.constant 61 : index
    %898 = memref.load %arg1[%c61] : memref<256xf32, #tpu.memory_space<smem>>
    %899 = vector.broadcast %898 : f32 to vector<1x256xf32>
    %900 = arith.mulf %899, %893 : vector<1x256xf32>
    %901 = arith.addf %883, %900 : vector<1x256xf32>
    %c62 = arith.constant 62 : index
    %902 = memref.load %arg1[%c62] : memref<256xf32, #tpu.memory_space<smem>>
    %903 = vector.broadcast %902 : f32 to vector<1x256xf32>
    %904 = arith.mulf %903, %893 : vector<1x256xf32>
    %905 = arith.addf %887, %904 : vector<1x256xf32>
    %c63 = arith.constant 63 : index
    %906 = memref.load %arg1[%c63] : memref<256xf32, #tpu.memory_space<smem>>
    %907 = vector.broadcast %906 : f32 to vector<1x256xf32>
    %908 = arith.mulf %907, %893 : vector<1x256xf32>
    %909 = arith.addf %891, %908 : vector<1x256xf32>
    %c0_108 = arith.constant 0 : index
    %c31_109 = arith.constant 31 : index
    %c0_110 = arith.constant 0 : index
    %910 = vector.load %arg2[%c0_108, %c31_109, %c0_110] : memref<1x36x256xf32, #tpu.memory_space<vmem>>, vector<1x1x256xf32>
    %911 = vector.shape_cast %910 : vector<1x1x256xf32> to vector<1x256xf32>
    %c76 = arith.constant 76 : index
    %912 = memref.load %arg1[%c76] : memref<256xf32, #tpu.memory_space<smem>>
    %913 = vector.broadcast %912 : f32 to vector<1x256xf32>
    %914 = arith.mulf %913, %911 : vector<1x256xf32>
    %915 = arith.addf %691, %914 : vector<1x256xf32>
    %c77 = arith.constant 77 : index
    %916 = memref.load %arg1[%c77] : memref<256xf32, #tpu.memory_space<smem>>
    %917 = vector.broadcast %916 : f32 to vector<1x256xf32>
    %918 = arith.mulf %917, %911 : vector<1x256xf32>
    %919 = arith.addf %695, %918 : vector<1x256xf32>
    %c78 = arith.constant 78 : index
    %920 = memref.load %arg1[%c78] : memref<256xf32, #tpu.memory_space<smem>>
    %921 = vector.broadcast %920 : f32 to vector<1x256xf32>
    %922 = arith.mulf %921, %911 : vector<1x256xf32>
    %923 = arith.addf %699, %922 : vector<1x256xf32>
    %c79 = arith.constant 79 : index
    %924 = memref.load %arg1[%c79] : memref<256xf32, #tpu.memory_space<smem>>
    %925 = vector.broadcast %924 : f32 to vector<1x256xf32>
    %926 = arith.mulf %925, %911 : vector<1x256xf32>
    %927 = arith.addf %703, %926 : vector<1x256xf32>
    %c92 = arith.constant 92 : index
    %928 = memref.load %arg1[%c92] : memref<256xf32, #tpu.memory_space<smem>>
    %929 = vector.broadcast %928 : f32 to vector<1x256xf32>
    %930 = arith.mulf %929, %839 : vector<1x256xf32>
    %931 = arith.addf %915, %930 : vector<1x256xf32>
    %c93 = arith.constant 93 : index
    %932 = memref.load %arg1[%c93] : memref<256xf32, #tpu.memory_space<smem>>
    %933 = vector.broadcast %932 : f32 to vector<1x256xf32>
    %934 = arith.mulf %933, %839 : vector<1x256xf32>
    %935 = arith.addf %919, %934 : vector<1x256xf32>
    %c94 = arith.constant 94 : index
    %936 = memref.load %arg1[%c94] : memref<256xf32, #tpu.memory_space<smem>>
    %937 = vector.broadcast %936 : f32 to vector<1x256xf32>
    %938 = arith.mulf %937, %839 : vector<1x256xf32>
    %939 = arith.addf %923, %938 : vector<1x256xf32>
    %c95 = arith.constant 95 : index
    %940 = memref.load %arg1[%c95] : memref<256xf32, #tpu.memory_space<smem>>
    %941 = vector.broadcast %940 : f32 to vector<1x256xf32>
    %942 = arith.mulf %941, %839 : vector<1x256xf32>
    %943 = arith.addf %927, %942 : vector<1x256xf32>
    %c0_111 = arith.constant 0 : index
    %c32_112 = arith.constant 32 : index
    %c0_113 = arith.constant 0 : index
    %944 = vector.load %arg2[%c0_111, %c32_112, %c0_113] : memref<1x36x256xf32, #tpu.memory_space<vmem>>, vector<1x1x256xf32>
    %945 = vector.shape_cast %944 : vector<1x1x256xf32> to vector<1x256xf32>
    %c108 = arith.constant 108 : index
    %946 = memref.load %arg1[%c108] : memref<256xf32, #tpu.memory_space<smem>>
    %947 = vector.broadcast %946 : f32 to vector<1x256xf32>
    %948 = arith.mulf %947, %945 : vector<1x256xf32>
    %949 = arith.addf %931, %948 : vector<1x256xf32>
    %c109 = arith.constant 109 : index
    %950 = memref.load %arg1[%c109] : memref<256xf32, #tpu.memory_space<smem>>
    %951 = vector.broadcast %950 : f32 to vector<1x256xf32>
    %952 = arith.mulf %951, %945 : vector<1x256xf32>
    %953 = arith.addf %935, %952 : vector<1x256xf32>
    %c110 = arith.constant 110 : index
    %954 = memref.load %arg1[%c110] : memref<256xf32, #tpu.memory_space<smem>>
    %955 = vector.broadcast %954 : f32 to vector<1x256xf32>
    %956 = arith.mulf %955, %945 : vector<1x256xf32>
    %957 = arith.addf %939, %956 : vector<1x256xf32>
    %c111 = arith.constant 111 : index
    %958 = memref.load %arg1[%c111] : memref<256xf32, #tpu.memory_space<smem>>
    %959 = vector.broadcast %958 : f32 to vector<1x256xf32>
    %960 = arith.mulf %959, %945 : vector<1x256xf32>
    %961 = arith.addf %943, %960 : vector<1x256xf32>
    %c124 = arith.constant 124 : index
    %962 = memref.load %arg1[%c124] : memref<256xf32, #tpu.memory_space<smem>>
    %963 = vector.broadcast %962 : f32 to vector<1x256xf32>
    %964 = arith.mulf %963, %875 : vector<1x256xf32>
    %965 = arith.addf %949, %964 : vector<1x256xf32>
    %c125 = arith.constant 125 : index
    %966 = memref.load %arg1[%c125] : memref<256xf32, #tpu.memory_space<smem>>
    %967 = vector.broadcast %966 : f32 to vector<1x256xf32>
    %968 = arith.mulf %967, %875 : vector<1x256xf32>
    %969 = arith.addf %953, %968 : vector<1x256xf32>
    %c126 = arith.constant 126 : index
    %970 = memref.load %arg1[%c126] : memref<256xf32, #tpu.memory_space<smem>>
    %971 = vector.broadcast %970 : f32 to vector<1x256xf32>
    %972 = arith.mulf %971, %875 : vector<1x256xf32>
    %973 = arith.addf %957, %972 : vector<1x256xf32>
    %c127 = arith.constant 127 : index
    %974 = memref.load %arg1[%c127] : memref<256xf32, #tpu.memory_space<smem>>
    %975 = vector.broadcast %974 : f32 to vector<1x256xf32>
    %976 = arith.mulf %975, %875 : vector<1x256xf32>
    %977 = arith.addf %961, %976 : vector<1x256xf32>
    %c0_114 = arith.constant 0 : index
    %c33_115 = arith.constant 33 : index
    %c0_116 = arith.constant 0 : index
    %978 = vector.load %arg2[%c0_114, %c33_115, %c0_116] : memref<1x36x256xf32, #tpu.memory_space<vmem>>, vector<1x1x256xf32>
    %979 = vector.shape_cast %978 : vector<1x1x256xf32> to vector<1x256xf32>
    %c140 = arith.constant 140 : index
    %980 = memref.load %arg1[%c140] : memref<256xf32, #tpu.memory_space<smem>>
    %981 = vector.broadcast %980 : f32 to vector<1x256xf32>
    %982 = arith.mulf %981, %979 : vector<1x256xf32>
    %983 = arith.addf %759, %982 : vector<1x256xf32>
    %c141 = arith.constant 141 : index
    %984 = memref.load %arg1[%c141] : memref<256xf32, #tpu.memory_space<smem>>
    %985 = vector.broadcast %984 : f32 to vector<1x256xf32>
    %986 = arith.mulf %985, %979 : vector<1x256xf32>
    %987 = arith.addf %763, %986 : vector<1x256xf32>
    %c142 = arith.constant 142 : index
    %988 = memref.load %arg1[%c142] : memref<256xf32, #tpu.memory_space<smem>>
    %989 = vector.broadcast %988 : f32 to vector<1x256xf32>
    %990 = arith.mulf %989, %979 : vector<1x256xf32>
    %991 = arith.addf %767, %990 : vector<1x256xf32>
    %c143 = arith.constant 143 : index
    %992 = memref.load %arg1[%c143] : memref<256xf32, #tpu.memory_space<smem>>
    %993 = vector.broadcast %992 : f32 to vector<1x256xf32>
    %994 = arith.mulf %993, %979 : vector<1x256xf32>
    %995 = arith.addf %771, %994 : vector<1x256xf32>
    %c0_117 = arith.constant 0 : index
    %c34_118 = arith.constant 34 : index
    %c0_119 = arith.constant 0 : index
    %996 = vector.load %arg2[%c0_117, %c34_118, %c0_119] : memref<1x36x256xf32, #tpu.memory_space<vmem>>, vector<1x1x256xf32>
    %997 = vector.shape_cast %996 : vector<1x1x256xf32> to vector<1x256xf32>
    %c156 = arith.constant 156 : index
    %998 = memref.load %arg1[%c156] : memref<256xf32, #tpu.memory_space<smem>>
    %999 = vector.broadcast %998 : f32 to vector<1x256xf32>
    %1000 = arith.mulf %999, %997 : vector<1x256xf32>
    %1001 = arith.addf %983, %1000 : vector<1x256xf32>
    %c157 = arith.constant 157 : index
    %1002 = memref.load %arg1[%c157] : memref<256xf32, #tpu.memory_space<smem>>
    %1003 = vector.broadcast %1002 : f32 to vector<1x256xf32>
    %1004 = arith.mulf %1003, %997 : vector<1x256xf32>
    %1005 = arith.addf %987, %1004 : vector<1x256xf32>
    %c158 = arith.constant 158 : index
    %1006 = memref.load %arg1[%c158] : memref<256xf32, #tpu.memory_space<smem>>
    %1007 = vector.broadcast %1006 : f32 to vector<1x256xf32>
    %1008 = arith.mulf %1007, %997 : vector<1x256xf32>
    %1009 = arith.addf %991, %1008 : vector<1x256xf32>
    %c159 = arith.constant 159 : index
    %1010 = memref.load %arg1[%c159] : memref<256xf32, #tpu.memory_space<smem>>
    %1011 = vector.broadcast %1010 : f32 to vector<1x256xf32>
    %1012 = arith.mulf %1011, %997 : vector<1x256xf32>
    %1013 = arith.addf %995, %1012 : vector<1x256xf32>
    %c172 = arith.constant 172 : index
    %1014 = memref.load %arg1[%c172] : memref<256xf32, #tpu.memory_space<smem>>
    %1015 = vector.broadcast %1014 : f32 to vector<1x256xf32>
    %1016 = arith.mulf %1015, %839 : vector<1x256xf32>
    %1017 = arith.addf %1001, %1016 : vector<1x256xf32>
    %c173 = arith.constant 173 : index
    %1018 = memref.load %arg1[%c173] : memref<256xf32, #tpu.memory_space<smem>>
    %1019 = vector.broadcast %1018 : f32 to vector<1x256xf32>
    %1020 = arith.mulf %1019, %839 : vector<1x256xf32>
    %1021 = arith.addf %1005, %1020 : vector<1x256xf32>
    %c174 = arith.constant 174 : index
    %1022 = memref.load %arg1[%c174] : memref<256xf32, #tpu.memory_space<smem>>
    %1023 = vector.broadcast %1022 : f32 to vector<1x256xf32>
    %1024 = arith.mulf %1023, %839 : vector<1x256xf32>
    %1025 = arith.addf %1009, %1024 : vector<1x256xf32>
    %c175 = arith.constant 175 : index
    %1026 = memref.load %arg1[%c175] : memref<256xf32, #tpu.memory_space<smem>>
    %1027 = vector.broadcast %1026 : f32 to vector<1x256xf32>
    %1028 = arith.mulf %1027, %839 : vector<1x256xf32>
    %1029 = arith.addf %1013, %1028 : vector<1x256xf32>
    %c188 = arith.constant 188 : index
    %1030 = memref.load %arg1[%c188] : memref<256xf32, #tpu.memory_space<smem>>
    %1031 = vector.broadcast %1030 : f32 to vector<1x256xf32>
    %1032 = arith.mulf %1031, %857 : vector<1x256xf32>
    %1033 = arith.addf %1017, %1032 : vector<1x256xf32>
    %c189 = arith.constant 189 : index
    %1034 = memref.load %arg1[%c189] : memref<256xf32, #tpu.memory_space<smem>>
    %1035 = vector.broadcast %1034 : f32 to vector<1x256xf32>
    %1036 = arith.mulf %1035, %857 : vector<1x256xf32>
    %1037 = arith.addf %1021, %1036 : vector<1x256xf32>
    %c190 = arith.constant 190 : index
    %1038 = memref.load %arg1[%c190] : memref<256xf32, #tpu.memory_space<smem>>
    %1039 = vector.broadcast %1038 : f32 to vector<1x256xf32>
    %1040 = arith.mulf %1039, %857 : vector<1x256xf32>
    %1041 = arith.addf %1025, %1040 : vector<1x256xf32>
    %c191 = arith.constant 191 : index
    %1042 = memref.load %arg1[%c191] : memref<256xf32, #tpu.memory_space<smem>>
    %1043 = vector.broadcast %1042 : f32 to vector<1x256xf32>
    %1044 = arith.mulf %1043, %857 : vector<1x256xf32>
    %1045 = arith.addf %1029, %1044 : vector<1x256xf32>
    %c0_120 = arith.constant 0 : index
    %c35_121 = arith.constant 35 : index
    %c0_122 = arith.constant 0 : index
    %1046 = vector.load %arg2[%c0_120, %c35_121, %c0_122] : memref<1x36x256xf32, #tpu.memory_space<vmem>>, vector<1x1x256xf32>
    %1047 = vector.shape_cast %1046 : vector<1x1x256xf32> to vector<1x256xf32>
    %c204 = arith.constant 204 : index
    %1048 = memref.load %arg1[%c204] : memref<256xf32, #tpu.memory_space<smem>>
    %1049 = vector.broadcast %1048 : f32 to vector<1x256xf32>
    %1050 = arith.mulf %1049, %1047 : vector<1x256xf32>
    %1051 = arith.addf %825, %1050 : vector<1x256xf32>
    %c205 = arith.constant 205 : index
    %1052 = memref.load %arg1[%c205] : memref<256xf32, #tpu.memory_space<smem>>
    %1053 = vector.broadcast %1052 : f32 to vector<1x256xf32>
    %1054 = arith.mulf %1053, %1047 : vector<1x256xf32>
    %1055 = arith.addf %829, %1054 : vector<1x256xf32>
    %c206 = arith.constant 206 : index
    %1056 = memref.load %arg1[%c206] : memref<256xf32, #tpu.memory_space<smem>>
    %1057 = vector.broadcast %1056 : f32 to vector<1x256xf32>
    %1058 = arith.mulf %1057, %1047 : vector<1x256xf32>
    %1059 = arith.addf %833, %1058 : vector<1x256xf32>
    %c207 = arith.constant 207 : index
    %1060 = memref.load %arg1[%c207] : memref<256xf32, #tpu.memory_space<smem>>
    %1061 = vector.broadcast %1060 : f32 to vector<1x256xf32>
    %1062 = arith.mulf %1061, %1047 : vector<1x256xf32>
    %1063 = arith.addf %837, %1062 : vector<1x256xf32>
    %c220 = arith.constant 220 : index
    %1064 = memref.load %arg1[%c220] : memref<256xf32, #tpu.memory_space<smem>>
    %1065 = vector.broadcast %1064 : f32 to vector<1x256xf32>
    %1066 = arith.mulf %1065, %979 : vector<1x256xf32>
    %1067 = arith.addf %1051, %1066 : vector<1x256xf32>
    %c221 = arith.constant 221 : index
    %1068 = memref.load %arg1[%c221] : memref<256xf32, #tpu.memory_space<smem>>
    %1069 = vector.broadcast %1068 : f32 to vector<1x256xf32>
    %1070 = arith.mulf %1069, %979 : vector<1x256xf32>
    %1071 = arith.addf %1055, %1070 : vector<1x256xf32>
    %c222 = arith.constant 222 : index
    %1072 = memref.load %arg1[%c222] : memref<256xf32, #tpu.memory_space<smem>>
    %1073 = vector.broadcast %1072 : f32 to vector<1x256xf32>
    %1074 = arith.mulf %1073, %979 : vector<1x256xf32>
    %1075 = arith.addf %1059, %1074 : vector<1x256xf32>
    %c223 = arith.constant 223 : index
    %1076 = memref.load %arg1[%c223] : memref<256xf32, #tpu.memory_space<smem>>
    %1077 = vector.broadcast %1076 : f32 to vector<1x256xf32>
    %1078 = arith.mulf %1077, %979 : vector<1x256xf32>
    %1079 = arith.addf %1063, %1078 : vector<1x256xf32>
    %c236 = arith.constant 236 : index
    %1080 = memref.load %arg1[%c236] : memref<256xf32, #tpu.memory_space<smem>>
    %1081 = vector.broadcast %1080 : f32 to vector<1x256xf32>
    %1082 = arith.mulf %1081, %911 : vector<1x256xf32>
    %1083 = arith.addf %1067, %1082 : vector<1x256xf32>
    %c237 = arith.constant 237 : index
    %1084 = memref.load %arg1[%c237] : memref<256xf32, #tpu.memory_space<smem>>
    %1085 = vector.broadcast %1084 : f32 to vector<1x256xf32>
    %1086 = arith.mulf %1085, %911 : vector<1x256xf32>
    %1087 = arith.addf %1071, %1086 : vector<1x256xf32>
    %c238 = arith.constant 238 : index
    %1088 = memref.load %arg1[%c238] : memref<256xf32, #tpu.memory_space<smem>>
    %1089 = vector.broadcast %1088 : f32 to vector<1x256xf32>
    %1090 = arith.mulf %1089, %911 : vector<1x256xf32>
    %1091 = arith.addf %1075, %1090 : vector<1x256xf32>
    %c239 = arith.constant 239 : index
    %1092 = memref.load %arg1[%c239] : memref<256xf32, #tpu.memory_space<smem>>
    %1093 = vector.broadcast %1092 : f32 to vector<1x256xf32>
    %1094 = arith.mulf %1093, %911 : vector<1x256xf32>
    %1095 = arith.addf %1079, %1094 : vector<1x256xf32>
    %c252 = arith.constant 252 : index
    %1096 = memref.load %arg1[%c252] : memref<256xf32, #tpu.memory_space<smem>>
    %1097 = vector.broadcast %1096 : f32 to vector<1x256xf32>
    %1098 = arith.mulf %1097, %839 : vector<1x256xf32>
    %1099 = arith.addf %1083, %1098 : vector<1x256xf32>
    %c253 = arith.constant 253 : index
    %1100 = memref.load %arg1[%c253] : memref<256xf32, #tpu.memory_space<smem>>
    %1101 = vector.broadcast %1100 : f32 to vector<1x256xf32>
    %1102 = arith.mulf %1101, %839 : vector<1x256xf32>
    %1103 = arith.addf %1087, %1102 : vector<1x256xf32>
    %c254 = arith.constant 254 : index
    %1104 = memref.load %arg1[%c254] : memref<256xf32, #tpu.memory_space<smem>>
    %1105 = vector.broadcast %1104 : f32 to vector<1x256xf32>
    %1106 = arith.mulf %1105, %839 : vector<1x256xf32>
    %1107 = arith.addf %1091, %1106 : vector<1x256xf32>
    %c255 = arith.constant 255 : index
    %1108 = memref.load %arg1[%c255] : memref<256xf32, #tpu.memory_space<smem>>
    %1109 = vector.broadcast %1108 : f32 to vector<1x256xf32>
    %1110 = arith.mulf %1109, %839 : vector<1x256xf32>
    %1111 = arith.addf %1095, %1110 : vector<1x256xf32>
    %1112 = tpu.concatenate %897, %901, %905, %909, %965, %969, %973, %977, %1033, %1037, %1041, %1045, %1099, %1103, %1107, %1111 in 0 : vector<1x256xf32>, vector<1x256xf32>, vector<1x256xf32>, vector<1x256xf32>, vector<1x256xf32>, vector<1x256xf32>, vector<1x256xf32>, vector<1x256xf32>, vector<1x256xf32>, vector<1x256xf32>, vector<1x256xf32>, vector<1x256xf32>, vector<1x256xf32>, vector<1x256xf32>, vector<1x256xf32>, vector<1x256xf32> -> vector<16x256xf32>
    %c0_123 = arith.constant 0 : index
    %c0_124 = arith.constant 0 : index
    %c0_125 = arith.constant 0 : index
    %1113 = vector.load %arg3[%c0_123, %c0_124, %c0_125] : memref<1x16x256xf32, #tpu.memory_space<vmem>>, vector<1x16x256xf32>
    %1114 = vector.shape_cast %1113 : vector<1x16x256xf32> to vector<16x256xf32>
    %1115 = vector.shape_cast %1112 : vector<16x256xf32> to vector<1x16x256xf32>
    tpu.vector_store %arg3[%c0_123, %c0_124, %c0_125], %1115 {strides = array<i32>} : memref<1x16x256xf32, #tpu.memory_space<vmem>>, vector<1x16x256xf32>,
    return
  }
  func.func @transform_0(%arg0: i32) -> i32 {
    %c0_i32 = arith.constant 0 : i32
    %c0_i32_0 = arith.constant 0 : i32
    return %c0_i32 : i32
  }
  func.func @transform_1(%arg0: i32) -> (i32, i32, i32) {
    %c0_i32 = arith.constant 0 : i32
    %c0_i32_0 = arith.constant 0 : i32
    %c0_i32_1 = arith.constant 0 : i32
    return %arg0, %c0_i32, %c0_i32_0 : i32, i32, i32
  }
  func.func @transform_2(%arg0: i32) -> (i32, i32, i32) {
    %c0_i32 = arith.constant 0 : i32
    %c0_i32_0 = arith.constant 0 : i32
    %c0_i32_1 = arith.constant 0 : i32
    return %arg0, %c0_i32, %c0_i32_0 : i32, i32, i32
  }
}

</mosaic_0001>

<bundles_post_ra>
// kernel: tpu_custom_call.1
= control target key start
LH: loop header
LB: loop body
LE: loop exit
PB: predicated region body
PF: predicated region fallthrough
CT: control target
= control target key end

     0   :  { %s3327_s0 = inlined_call_operand.vmem [shape: f32[256], index: 0, kind: input, shape index: {}]   ;;  %s3328_s1 = inlined_call_operand.vmem [shape: f32[2,36,256], index: 1, kind: input, shape index: {}]   ;;  %s3329_s2 = inlined_call_operand.hbm [shape: f32[2,16,256], index: 2, kind: output, shape index: {}]  }
   0x1   :  { %3342 = sst [smem:[#allocation59_spill]] %s3327_s0 }
   0x2   :  { %3343 = sst [smem:[#allocation60_spill]] %s3328_s1 }
   0x3   :  { %3344 = sst [smem:[#allocation61_spill]] %s3329_s2 }
   0x4   :  { %7 = vsyncpa [#allocation4], 0 }
   0x5   :  { %8 = vsyncpa [#allocation3], 0 }
   0x6   :  { %10 = vsyncpa [#allocation3 + $0x1], 0  ;;  %s1918_s9 = smov 0   ;;  %s1920_s10 = smov 0  }
   0x7   :  { %s1922_s11 = smov 0   ;;  %s1924_s12 = smov 0  }
   0x8 LB: > { %3345 = sst [smem:[#allocation8_spill]] %s1886_s9  ;;  %s1939_s13 = sadd.s32 4294967295, %s1898_s12   ;;  %s1898_s12 = sphi %s1924_s12, %s3511_s12   ;;  %s1894_s11 = sphi %s1922_s11, %s3514_s11   ;;  %s1890_s10 = sphi %s1920_s10, %s3513_s10   ;;  %s1886_s9 = sphi %s1918_s9, %s3512_s9  }
   0x9   : > { %3346 = sst [smem:[#allocation9_spill]] %s1890_s10  ;;  %s1460_s14 = sadd.s32 4294967294, %s1898_s12  }
   0xa   : > { %3347 = sst [smem:[#allocation10_spill]] %s1894_s11  ;;  %s1943_s15 = sadd.s32 1, %s1898_s12  }
   0xb   : > { %3348 = sst [smem:[#allocation11_spill]] %s1898_s12  ;;  %s70_s16 = sadd.s32 1, %s1894_s11 }
   0xc   : > { %3349 = sst [smem:[#allocation12_spill]] %s1939_s13  ;;  %s67_s17 = ssub.s32 %s1898_s12, %s1943_s15 }
   0xd   : > { %3350 = sst [smem:[#allocation13_spill]] %s1943_s15  ;;  %p80_p0 = scmp.ne.s32.totalorder %s1894_s11, %s1890_s10 }
   0xe   : > { %p68_p1 = scmp.eq.s32.totalorder %s67_s17, 0  ;;  %p81_p2 = scmp.eq.s32.totalorder %s1939_s13, 1 }
   0xf   : > { %p86_p3 = scmp.ne.s32.totalorder %s1890_s10, %s1886_s9  ;;  %p87_p4 = scmp.eq.s32.totalorder %s1460_s14, 1 }
  0x10   : > { %s1954_s18 = scalar_select %p68_p1, %s1894_s11, %s70_s16  }
  0x11   : > { %p1956_p5 = por %p81_p2, %p80_p0  ;;  %p1960_p6 = por %p87_p4, %p86_p3 }
  0x12   : > { %3351 = sst [smem:[#allocation14_spill]] %s1954_s18  ;;  %p1461_p7 = scmp.ge.s32.totalorder %s1898_s12, 1 }
  0x13   : > { %s3352_s19 = scalar_select %p1956_p5, 1, 0 }
  0x14   : > { %s3354_s20 = scalar_select %p1960_p6, 1, 0 }
  0x15   : > { %3353 = sst [smem:[#allocation15_spill]] %s3352_s19  ;;  %p94_p8 = scmp.lt.s32.totalorder %s1898_s12, 3 }
  0x16   : > { %3355 = sst [smem:[#allocation16_spill]] %s3354_s20  ;;  %p1779_p9 = scmp.eq.s32.totalorder %s1939_s13, 0 }
  0x17   : > { %p95_p10 = pnand %p1461_p7, %p94_p8  ;;  %s3356_s0 = sld [smem:[#allocation59_spill]] }
  0x18   : > { %s1900_s24 = smov [#allocation2]  }
  0x19   : > { %p1771_p11 = pneg %p95_p10 }
  0x1a   : > { %127 = sbr.rel (%p95_p10) target bundleno = 462 (0x1ce), region = 28 }
  0x1b   : > { %p1772_p12 = pnand %p1779_p9, %p1771_p11 }
  0x1d   : > { %s106_s23 = sshll.u32 %s3356_s0, 4  ;;  %s107_s23 = int_to_ptr.vmem [resolvable:$true] %s106_s23 }
  0x1e   : > { %1774 = dma.vmem_to_smem (!%p1772_p12), %s107_s23, 32, %s1900_s24, [#allocation4]  }
  0x1f   : > { %1877 = dma.done.wait (%p1779_p9), [#allocation4], 32  }
  0x20   : > { %1879 = vsyncadd (%p1779_p9), [#allocation4], 4294967264 }
  0x21   : > { %134 = sfence }
  0x22   : > { %p151_p13 = scmp.lt.s32.totalorder %s1939_s13, 1  ;;  %s1971_s25 = sld [smem:[#allocation2]]  ;;  %vm1331_vm0 = vcmask 1040384   ;;  %vm1334_vm1 = vcmask 1041408   ;;  %vm1337_vm2 = vcmask 1042432   ;;  %vm1340_vm3 = vcmask 1043456  }
  0x23   : > { %s1973_s26 = sld [smem:[#allocation2 + $0x1]]  ;;  %vm1343_vm4 = vcmask 1044480   ;;  %vm1346_vm5 = vcmask 1045504   ;;  %vm1349_vm6 = vcmask 1046528  }
  0x24   : > { %s1976_s27 = scalar_select %p151_p13, %s1939_s13, 1 }
  0x25   : > { %s1978_s28 = sld [smem:[#allocation2 + $0x2]] }
  0x26   : > { %s1980_s29 = sld [smem:[#allocation2 + $0x3]] }
  0x27   : > { %s1982_s30 = sld [smem:[#allocation2 + $0x10]] }
  0x28   : > { %s1984_s3 = sld [smem:[#allocation2 + $0x11]]  ;;  %v158_v1 = vstv %s1971_s25 }
  0x29   : > { %s1986_s4 = sld [smem:[#allocation2 + $0x12]]  ;;  %v162_v2 = vstv %s1973_s26 }
  0x2a   : > { %s1988_s5 = sld [smem:[#allocation2 + $0x13]] }
  0x2b   : > { %s1990_s6 = sld [smem:[#allocation2 + $0x20]]  ;;  %v166_v8 = vstv %s1978_s28 }
  0x2c   : > { %s1992_s7 = sld [smem:[#allocation2 + $0x21]]  ;;  %v170_v10 = vstv %s1980_s29 }
  0x2d   : > { %s1994_s8 = sld [smem:[#allocation2 + $0x22]]  ;;  %v176_v4 = vstv %s1982_s30 }
  0x2e   : > { %s1996_s14 = sld [smem:[#allocation2 + $0x23]]  ;;  %v180_v5 = vstv %s1984_s3 }
  0x2f   : > { %s1998_s16 = sld [smem:[#allocation2 + $0x30]]  ;;  %v184_v9 = vstv %s1986_s4 }
  0x30   : > { %s2000_s17 = sld [smem:[#allocation2 + $0x31]]  ;;  %v188_v13 = vstv %s1988_s5 }
  0x31   : > { %s2002_s21 = sld [smem:[#allocation2 + $0x32]]  ;;  %v194_v19 = vstv %s1990_s6 }
  0x32   : > { %s2004_s22 = sld [smem:[#allocation2 + $0x33]]  ;;  %v198_v22 = vstv %s1992_s7 }
  0x33   : > { %s2006_s23 = sld [smem:[#allocation2 + $0x40]]  ;;  %v202_v23 = vstv %s1994_s8 }
  0x34   : > { %s2008_s24 = sld [smem:[#allocation2 + $0x41]]  ;;  %v206_v36 = vstv %s1996_s14 }
  0x35   : > { %3357 = sst [smem:[#allocation17_spill]] %s1998_s16 }
  0x36   : > { %3358 = sst [smem:[#allocation18_spill]] %s2000_s17 }
  0x37   : > { %3359 = sst [smem:[#allocation19_spill]] %s2002_s21 }
  0x38   : > { %3360 = sst [smem:[#allocation20_spill]] %s2004_s22 }
  0x39   : > { %s2010_s0 = sld [smem:[#allocation2 + $0x42]]  ;;  %v230_v25 = vstv %s2006_s23 }
  0x3a   : > { %s2012_s18 = sld [smem:[#allocation2 + $0x43]]  ;;  %v234_v26 = vstv %s2008_s24 }
  0x3b   : > { %s2014_s11 = sld [smem:[#allocation2 + $0x50]] }
  0x3c   : > { %s2016_s15 = sld [smem:[#allocation2 + $0x51]] }
  0x3d   : > { %s2018_s20 = sld [smem:[#allocation2 + $0x52]] }
  0x3e   : > { %s2020_s9 = sld [smem:[#allocation2 + $0x53]] }
  0x3f   : > { %s2022_s12 = sld [smem:[#allocation2 + $0x60]]  ;;  %v238_v31 = vstv %s2010_s0 }
  0x40   : > { %3361 = sst [smem:[#allocation21_spill]] %s2012_s18 }
  0x41   : > { %s2024_s19 = sld [smem:[#allocation2 + $0x61]]  ;;  %v246_v27 = vstv %s2014_s11 }
  0x42   : > { %s2026_s2 = sld [smem:[#allocation2 + $0x62]]  ;;  %v250_v28 = vstv %s2016_s15 }
  0x43   : > { %s2028_s13 = sld [smem:[#allocation2 + $0x63]]  ;;  %v254_v32 = vstv %s2018_s20 }
  0x44   : > { %3362 = sst [smem:[#allocation22_spill]] %s2020_s9 }
  0x45   : > { %3363 = sst [smem:[#allocation23_spill]] %s2022_s12 }
  0x46   : > { %s2030_s10 = sld [smem:[#allocation2 + $0x70]] }
  0x47   : > { %3364 = sst [smem:[#allocation24_spill]] %s2024_s19 }
  0x48   : > { %3365 = sst [smem:[#allocation25_spill]] %s2026_s2 }
  0x49   : > { %3366 = sst [smem:[#allocation26_spill]] %s2028_s13 }
  0x4a   : > { %s2032_s22 = sld [smem:[#allocation2 + $0x71]] }
  0x4b   : > { %s2034_s21 = sld [smem:[#allocation2 + $0x72]] }
  0x4c   : > { %3367 = sst [smem:[#allocation27_spill]] %s2030_s10 }
  0x4d   : > { %s2036_s17 = sld [smem:[#allocation2 + $0x73]] }
  0x4e   : > { %s2038_s16 = sld [smem:[#allocation2 + $0x80]] }
  0x4f   : > { %s2040_s18 = sld [smem:[#allocation2 + $0x81]] }
  0x50   : > { %3368 = sst [smem:[#allocation28_spill]] %s2032_s22 }
  0x51   : > { %3369 = sst [smem:[#allocation29_spill]] %s2034_s21 }
  0x52   : > { %s2042_s9 = sld [smem:[#allocation2 + $0x82]] }
  0x53   : > { %3370 = sst [smem:[#allocation30_spill]] %s2036_s17 }
  0x54   : > { %3371 = sst [smem:[#allocation31_spill]] %s2038_s16 }
  0x55   : > { %3372 = sst [smem:[#allocation32_spill]] %s2040_s18 }
  0x56   : > { %s2044_s12 = sld [smem:[#allocation2 + $0x83]] }
  0x57   : > { %s2046_s19 = sld [smem:[#allocation2 + $0x90]] }
  0x58   : > { %3373 = sst [smem:[#allocation33_spill]] %s2042_s9 }
  0x59   : > { %s2048_s2 = sld [smem:[#allocation2 + $0x91]] }
  0x5a   : > { %s2050_s13 = sld [smem:[#allocation2 + $0x92]] }
  0x5b   : > { %s2052_s10 = sld [smem:[#allocation2 + $0x93]] }
  0x5c   : > { %3374 = sst [smem:[#allocation34_spill]] %s2044_s12 }
  0x5d   : > { %3375 = sst [smem:[#allocation35_spill]] %s2046_s19 }
  0x5e   : > { %s2054_s22 = sld [smem:[#allocation2 + $0xa0]] }
  0x5f   : > { %3376 = sst [smem:[#allocation36_spill]] %s2048_s2 }
  0x60   : > { %3377 = sst [smem:[#allocation37_spill]] %s2050_s13 }
  0x61   : > { %3378 = sst [smem:[#allocation38_spill]] %s2052_s10 }
  0x62   : > { %s2056_s17 = sld [smem:[#allocation2 + $0xa1]] }
  0x63   : > { %s2058_s21 = sld [smem:[#allocation2 + $0xa2]] }
  0x64   : > { %3379 = sst [smem:[#allocation39_spill]] %s2054_s22 }
  0x65   : > { %s2060_s18 = sld [smem:[#allocation2 + $0xa3]] }
  0x66   : > { %s2062_s9 = sld [smem:[#allocation2 + $0xb0]] }
  0x67   : > { %s2064_s12 = sld [smem:[#allocation2 + $0xb1]] }
  0x68   : > { %3380 = sst [smem:[#allocation40_spill]] %s2056_s17 }
  0x69   : > { %3381 = sst [smem:[#allocation41_spill]] %s2058_s21 }
  0x6a   : > { %s2066_s19 = sld [smem:[#allocation2 + $0xb2]] }
  0x6b   : > { %3382 = sst [smem:[#allocation42_spill]] %s2060_s18 }
  0x6c   : > { %3383 = sst [smem:[#allocation43_spill]] %s2062_s9 }
  0x6d   : > { %3384 = sst [smem:[#allocation44_spill]] %s2064_s12 }
  0x6e   : > { %s2068_s2 = sld [smem:[#allocation2 + $0xb3]] }
  0x6f   : > { %s2070_s13 = sld [smem:[#allocation2 + $0xc0]] }
  0x70   : > { %3385 = sst [smem:[#allocation45_spill]] %s2066_s19 }
  0x71   : > { %s2072_s10 = sld [smem:[#allocation2 + $0xc1]] }
  0x72   : > { %s2074_s22 = sld [smem:[#allocation2 + $0xc2]] }
  0x73   : > { %s2076_s17 = sld [smem:[#allocation2 + $0xc3]] }
  0x74   : > { %3386 = sst [smem:[#allocation46_spill]] %s2068_s2  ;;  %s1764_s2 = smul.u32 80, %s1976_s27 }
  0x75   : > { %3387 = sst [smem:[#allocation47_spill]] %s2070_s13 }
  0x76   : > { %s2078_s21 = sld [smem:[#allocation2 + $0xd0]] }
  0x77   : > { %3388 = sst [smem:[#allocation48_spill]] %s2072_s10 }
  0x78   : > { %3389 = sst [smem:[#allocation49_spill]] %s2074_s22 }
  0x79   : > { %3390 = sst [smem:[#allocation50_spill]] %s2076_s17 }
  0x7a   : > { %s2080_s18 = sld [smem:[#allocation2 + $0xd1]] }
  0x7b   : > { %s2082_s9 = sld [smem:[#allocation2 + $0xd2]] }
  0x7c   : > { %s2084_s19 = sld [smem:[#allocation2 + $0xd3]] }
  0x7d   : > { %s2087_s12 = sld [smem:[#allocation2 + $0xe0]] }
  0x7e   : > { %s2089_s10 = sld [smem:[#allocation2 + $0xe1]] }
  0x7f   : > { %s2091_s22 = sld [smem:[#allocation2 + $0xe2]] }
  0x80   : > { %3391 = sst [smem:[#allocation51_spill]] %s2080_s18 }
  0x81   : > { %s2093_s13 = sld [smem:[#allocation2 + $0xe3]] }
  0x82   : > { %3392 = sst [smem:[#allocation52_spill]] %s2084_s19 }
  0x83   : > { %3393 = sst [smem:[#allocation53_spill]] %s2087_s12 }
  0x84   : > { %s3395_s1 = sld [smem:[#allocation60_spill]] }
  0x85   : > { %s2100_s19 = sld [smem:[#allocation2 + $0xf0]] }
  0x86   : > { %s2102_s27 = sld [smem:[#allocation2 + $0xf1]] }
  0x87   : > { %3394 = sst [smem:[#allocation54_spill]] %s2093_s13 }
  0x88   : > { %s2104_s12 = sld [smem:[#allocation2 + $0xf2]] }
  0x89   : > { %s2111_s13 = sld [smem:[#allocation2 + $0xf3]] }
  0x8a   : > { %s2098_s18 = scalar_lea.vmem %s3395_s1, %s1764_s2  ;;  %s2118_s2 = sld [smem:[#allocation2 + $0x4]] }
  0x8b   : > { %v2107_v0 = vld [vmem:[%s2098_s18] ss:$8 sm:$0x3]  ;;  %v2114_v3 = vld [vmem:[%s2098_s18 + $0x1] ss:$8 sm:$0x3] }
  0x8c   : > { %s2120_s16 = sld [smem:[#allocation2 + $0x5]]  ;;  %v159_v6 = vmul.f32 %v158_v1, %v2107_v0  ;;  %v163_v7 = vmul.f32 %v162_v2, %v2107_v0  ;;  %v177_v11 = vmul.f32 %v2114_v3, %v176_v4  ;;  %v181_v12 = vmul.f32 %v2114_v3, %v180_v5  ;;  %v2143_v18 = vld [vmem:[%s2098_s18 + $0x2] ss:$8 sm:$0x3] }
  0x8d   : > { %s2126_s25 = sld [smem:[#allocation2 + $0x6]]  ;;  %v167_v14 = vmul.f32 %v166_v8, %v2107_v0  ;;  %v185_v15 = vmul.f32 %v2114_v3, %v184_v9  ;;  %v171_v16 = vmul.f32 %v170_v10, %v2107_v0  ;;  %v189_v17 = vmul.f32 %v2114_v3, %v188_v13  ;;  %v2151_v24 = vld [vmem:[%s2098_s18 + $0x4] ss:$8 sm:$0x3] }
  0x8e   : > { %s2132_s26 = sld [smem:[#allocation2 + $0x7]]  ;;  %v178_v20 = vadd.f32 %v177_v11, %v159_v6  ;;  %v182_v21 = vadd.f32 %v181_v12, %v163_v7  ;;  %v195_v30 = vmul.f32 %v2143_v18, %v194_v19  ;;  %v199_v34 = vmul.f32 %v2143_v18, %v198_v22  ;;  %v1495_v46 = vld [vmem:[%s2098_s18 + $0x5] ss:$8 sm:$0x3] }
  0x8f   : > { %3396 = sst [smem:[#allocation55_spill]] %s2111_s13  ;;  %v186_v29 = vadd.f32 %v185_v15, %v167_v14  ;;  %v190_v33 = vadd.f32 %v189_v17, %v171_v16  ;;  %v203_v35 = vmul.f32 %v2143_v18, %v202_v23  ;;  %v231_v37 = vmul.f32 %v2151_v24, %v230_v25  ;;  %v1481_v54 = vld [vmem:[%s2098_s18 + $0x3] ss:$8 sm:$0x3] }
  0x90   : > { %s2134_s30 = sld [smem:[#allocation2 + $0x14]]  ;;  %v235_v38 = vmul.f32 %v2151_v24, %v234_v26  ;;  %v247_v39 = vmul.f32 %v246_v27, %v2107_v0  ;;  %v251_v40 = vmul.f32 %v250_v28, %v2107_v0  ;;  %v239_v41 = vmul.f32 %v2151_v24, %v238_v31  ;;  %v2216_v12 = vld [vmem:[%s2098_s18 + $0x6] ss:$8 sm:$0x3] }
  0x91   : > { %s2138_s28 = sld [smem:[#allocation2 + $0x15]]  ;;  %v255_v43 = vmul.f32 %v254_v32, %v2107_v0  ;;  %v207_v45 = vmul.f32 %v2143_v18, %v206_v36  ;;  %v196_v63 = vadd.f32 %v195_v30, %v178_v20  ;;  %v2203_v1 = vadd.f32 %v199_v34, %v182_v21  ;;  %v1509_v17 = vld [vmem:[%s2098_s18 + $0x7] ss:$8 sm:$0x3] }
  0x92   : > { %s2146_s29 = sld [smem:[#allocation2 + $0x16]]  ;;  %v248_v56 = vadd.f32 %v247_v39, %v231_v37  ;;  %v252_v57 = vadd.f32 %v251_v40, %v235_v38  ;;  %v2208_v4 = vadd.f32 %v203_v35, %v186_v29 }
  0x93   : > { %s2153_s3 = sld [smem:[#allocation2 + $0x17]]  ;;  %v256_v59 = vadd.f32 %v255_v43, %v239_v41  ;;  %v2210_v5 = vadd.f32 %v207_v45, %v190_v33 }
  0x94   : > { %s2159_s4 = sld [smem:[#allocation2 + $0x24]] }
  0x95   : > { %s3400_s5 = sld [smem:[#allocation21_spill]] }
  0x96   : > { %s3401_s6 = sld [smem:[#allocation22_spill]] }
  0x97   : > { %s2164_s7 = sld [smem:[#allocation2 + $0x25]] }
  0x98   : > { %3397 = sst [smem:[#allocation56_spill]] %s2146_s29 }
  0x99   : > { %3398 = sst [smem:[#allocation57_spill]] %s2153_s3 }
  0x9a   : > { %3399 = sst [smem:[#allocation58_spill]] %s2159_s4 }
  0x9b   : > { %s3403_s8 = sld [smem:[#allocation23_spill]]  ;;  %v242_v42 = vstv %s3400_s5 }
  0x9c   : > { %s3404_s11 = sld [smem:[#allocation24_spill]]  ;;  %v258_v44 = vstv %s3401_s6  ;;  %v243_v55 = vmul.f32 %v2151_v24, %v242_v42 }
  0x9d   : > { %3402 = sst [smem:[#allocation21_spill]] %s2164_s7  ;;  %v259_v58 = vmul.f32 %v258_v44, %v2107_v0 }
  0x9e   : > { %s3405_s15 = sld [smem:[#allocation25_spill]] }
  0x9f   : > { %s2169_s17 = sld [smem:[#allocation2 + $0x26]]  ;;  %v260_v10 = vadd.f32 %v259_v58, %v243_v55 }
  0xa0   : > { %s3407_s0 = sld [smem:[#allocation17_spill]] }
  0xa1   : > { %s3408_s20 = sld [smem:[#allocation18_spill]]  ;;  %v264_v47 = vstv %s3403_s8 }
  0xa2   : > { %s3409_s23 = sld [smem:[#allocation19_spill]]  ;;  %v268_v48 = vstv %s3404_s11  ;;  %v265_v60 = vmul.f32 %v1495_v46, %v264_v47 }
  0xa3   : > { %s3410_s24 = sld [smem:[#allocation20_spill]]  ;;  %v269_v61 = vmul.f32 %v1495_v46, %v268_v48 }
  0xa4   : > { %s2175_s1 = sld [smem:[#allocation2 + $0x27]]  ;;  %v272_v49 = vstv %s3405_s15  ;;  %v266_v13 = vadd.f32 %v265_v60, %v248_v56 }
  0xa5   : > { %3406 = sst [smem:[#allocation22_spill]] %s2169_s17  ;;  %v273_v62 = vmul.f32 %v1495_v46, %v272_v49  ;;  %v270_v14 = vadd.f32 %v269_v61, %v252_v57 }
  0xa6   : > { %s2181_s14 = sld [smem:[#allocation2 + $0x34]]  ;;  %v212_v50 = vstv %s3407_s0 }
  0xa7   : > { %s2188_s17 = sld [smem:[#allocation2 + $0x35]]  ;;  %v216_v51 = vstv %s3408_s20  ;;  %v213_v6 = vmul.f32 %v1481_v54, %v212_v50  ;;  %v274_v15 = vadd.f32 %v273_v62, %v256_v59 }
  0xa8   : > { %v220_v52 = vstv %s3409_s23  ;;  %s2194_s13 = sld [smem:[#allocation2 + $0x36]]  ;;  %v217_v7 = vmul.f32 %v1481_v54, %v216_v51 }
  0xa9   : > { %v224_v53 = vstv %s3410_s24  ;;  %s2199_s5 = sld [smem:[#allocation2 + $0x37]]  ;;  %v221_v8 = vmul.f32 %v1481_v54, %v220_v52  ;;  %v2264_v52 = vadd.f32 %v213_v6, %v196_v63  ;;  %v1522_v6 = vld [vmem:[%s2098_s18 + $0x10] ss:$8 sm:$0x3] }
  0xaa   : > { %3411 = sst [smem:[#allocation23_spill]] %s2175_s1  ;;  %v225_v9 = vmul.f32 %v1481_v54, %v224_v53 }
  0xab   : > { %s3414_s1 = sld [smem:[#allocation26_spill]]  ;;  %v2277_v58 = vadd.f32 %v221_v8, %v2208_v4  ;;  %v382_v8 = vstv %s2078_s21 }
  0xac   : > { %3412 = sst [smem:[#allocation24_spill]] %s2181_s14  ;;  %v2280_v59 = vadd.f32 %v225_v9, %v2210_v5 }
  0xad   : > { %3413 = sst [smem:[#allocation25_spill]] %s2188_s17 }
  0xae   : > { %3415 = sst [smem:[#allocation17_spill]] %s2194_s13 }
  0xaf   : > { %3416 = sst [smem:[#allocation18_spill]] %s2199_s5 }
  0xb0   : > { %s3417_s6 = sld [smem:[#allocation27_spill]] }
  0xb1   : > { %s2201_s8 = sld [smem:[#allocation2 + $0x44]]  ;;  %v276_v2 = vstv %s3414_s1 }
  0xb2   : > { %s2206_s11 = sld [smem:[#allocation2 + $0x45]]  ;;  %v277_v16 = vmul.f32 %v1495_v46, %v276_v2 }
  0xb3   : > { %s3420_s15 = sld [smem:[#allocation31_spill]] }
  0xb4   : > { %s3421_s0 = sld [smem:[#allocation32_spill]]  ;;  %v278_v40 = vadd.f32 %v277_v16, %v260_v10 }
  0xb5   : > { %s3422_s20 = sld [smem:[#allocation35_spill]] }
  0xb6   : > { %s2212_s23 = sld [smem:[#allocation2 + $0x46]]  ;;  %v280_v11 = vstv %s3417_s6 }
  0xb7   : > { %3418 = sst [smem:[#allocation19_spill]] %s2201_s8  ;;  %v281_v23 = vmul.f32 %v2143_v18, %v280_v11 }
  0xb8   : > { %3419 = sst [smem:[#allocation20_spill]] %s2206_s11 }
  0xb9   : > { %s3424_s24 = sld [smem:[#allocation36_spill]]  ;;  %v298_v19 = vstv %s3420_s15  ;;  %v2282_v60 = vadd.f32 %v281_v23, %v266_v13 }
  0xba   : > { %s3425_s5 = sld [smem:[#allocation28_spill]]  ;;  %v302_v20 = vstv %s3421_s0  ;;  %v299_v32 = vmul.f32 %v2216_v12, %v298_v19 }
  0xbb   : > { %s3426_s1 = sld [smem:[#allocation33_spill]]  ;;  %v316_v21 = vstv %s3422_s20  ;;  %v303_v33 = vmul.f32 %v2216_v12, %v302_v20 }
  0xbc   : > { %3423 = sst [smem:[#allocation26_spill]] %s2212_s23  ;;  %v317_v34 = vmul.f32 %v1509_v17, %v316_v21  ;;  %v383_v21 = vmul.f32 %v2216_v12, %v382_v8 }
  0xbd   : > { %s3427_s13 = sld [smem:[#allocation37_spill]] }
  0xbe   : > { %s2218_s17 = sld [smem:[#allocation2 + $0x47]]  ;;  %v318_v48 = vadd.f32 %v317_v34, %v299_v32 }
  0xbf   : > { %s3429_s14 = sld [smem:[#allocation29_spill]]  ;;  %v320_v22 = vstv %s3424_s24 }
  0xc0   : > { %s3430_s11 = sld [smem:[#allocation30_spill]]  ;;  %v284_v25 = vstv %s3425_s5  ;;  %v321_v35 = vmul.f32 %v1509_v17, %v320_v22 }
  0xc1   : > { %s3431_s8 = sld [smem:[#allocation34_spill]]  ;;  %v306_v26 = vstv %s3426_s1  ;;  %v285_v44 = vmul.f32 %v2143_v18, %v284_v25 }
  0xc2   : > { %s3432_s23 = sld [smem:[#allocation38_spill]]  ;;  %v307_v36 = vmul.f32 %v2216_v12, %v306_v26  ;;  %v322_v49 = vadd.f32 %v321_v35, %v303_v33  ;;  %v406_v35 = vstv %s2091_s22 }
  0xc3   : > { %s2221_s7 = sld [smem:[#allocation2 + $0x54]]  ;;  %v324_v27 = vstv %s3427_s13  ;;  %v2284_v61 = vadd.f32 %v285_v44, %v270_v14 }
  0xc4   : > { %3428 = sst [smem:[#allocation27_spill]] %s2218_s17  ;;  %v325_v37 = vmul.f32 %v1509_v17, %v324_v27 }
  0xc5   : > { %s2227_s6 = sld [smem:[#allocation2 + $0x55]]  ;;  %v288_v28 = vstv %s3429_s14 }
  0xc6   : > { %s3433_s17 = sld [smem:[#allocation39_spill]]  ;;  %v292_v29 = vstv %s3430_s11  ;;  %v289_v45 = vmul.f32 %v2143_v18, %v288_v28  ;;  %v326_v53 = vadd.f32 %v325_v37, %v307_v36 }
  0xc7   : > { %s3434_s4 = sld [smem:[#allocation40_spill]]  ;;  %v310_v30 = vstv %s3431_s8  ;;  %v293_v46 = vmul.f32 %v2143_v18, %v292_v29  ;;  %v2270_v18 = vadd.f32 %v217_v7, %v2203_v1 }
  0xc8   : > { %s2233_s3 = sld [smem:[#allocation2 + $0x56]]  ;;  %v328_v31 = vstv %s3432_s23  ;;  %v311_v41 = vmul.f32 %v2216_v12, %v310_v30  ;;  %v2288_v62 = vadd.f32 %v289_v45, %v274_v15  ;;  %v407_v45 = vmul.f32 %v2151_v24, %v406_v35 }
  0xc9   : > { %s3435_s29 = sld [smem:[#allocation41_spill]]  ;;  %v329_v42 = vmul.f32 %v1509_v17, %v328_v31  ;;  %v2290_v63 = vadd.f32 %v293_v46, %v278_v40  ;;  %v390_v17 = vstv %s2082_s9  ;;  %v402_v31 = vstv %s2089_s10 }
  0xca   : > { %s2239_s15 = sld [smem:[#allocation2 + $0x57]]  ;;  %v391_v30 = vmul.f32 %v2216_v12, %v390_v17  ;;  %v432_v40 = vstv %s2118_s2 }
  0xcb   : > { %s3436_s0 = sld [smem:[#allocation42_spill]]  ;;  %v330_v55 = vadd.f32 %v329_v42, %v311_v41  ;;  %v436_v42 = vstv %s2120_s16 }
  0xcc   : > { %s2243_s5 = sld [smem:[#allocation2 + $0x64]]  ;;  %v332_v38 = vstv %s3433_s17 }
  0xcd   : > { %v336_v39 = vstv %s3434_s4  ;;  %s2248_s13 = sld [smem:[#allocation2 + $0x65]]  ;;  %v333_v50 = vmul.f32 %v332_v38, %v2107_v0 }
  0xce   : > { %s2252_s14 = sld [smem:[#allocation2 + $0x66]]  ;;  %v337_v51 = vmul.f32 %v336_v39, %v2107_v0  ;;  %v2335_v39 = vld [vmem:[%s2098_s18 + $0x11] ss:$8 sm:$0x3] }
  0xcf   : > { %v340_v43 = vstv %s3435_s29  ;;  %s3440_s8 = sld [smem:[#allocation43_spill]]  ;;  %v334_v1 = vadd.f32 %v333_v50, %v318_v48  ;;  %v440_v50 = vstv %s2126_s25 }
  0xd0   : > { %s2258_s11 = sld [smem:[#allocation2 + $0x67]]  ;;  %v341_v54 = vmul.f32 %v340_v43, %v2107_v0  ;;  %v338_v2 = vadd.f32 %v337_v51, %v322_v49  ;;  %v433_v49 = vmul.f32 %v2335_v39, %v432_v40  ;;  %v441_v8 = vmul.f32 %v2335_v39, %v440_v50 }
  0xd1   : > { %v344_v47 = vstv %s3436_s0  ;;  %s2262_s4 = sld [smem:[#allocation2 + $0x74]]  ;;  %v520_v50 = vstv %s2221_s7 }
  0xd2   : > { %3437 = sst [smem:[#allocation31_spill]] %s2243_s5  ;;  %v345_v56 = vmul.f32 %v344_v47, %v2107_v0  ;;  %v342_v4 = vadd.f32 %v341_v54, %v326_v53  ;;  %v437_v53 = vmul.f32 %v2335_v39, %v436_v42  ;;  %v444_v54 = vstv %s2132_s26 }
  0xd3   : > { %3438 = sst [smem:[#allocation32_spill]] %s2248_s13 }
  0xd4   : > { %3439 = sst [smem:[#allocation35_spill]] %s2252_s14  ;;  %v346_v9 = vadd.f32 %v345_v56, %v330_v55  ;;  %v2361_v55 = vld [vmem:[%s2098_s18 + $0x12] ss:$8 sm:$0x3]  ;;  %v450_v56 = vstv %s2134_s30 }
  0xd5   : > { %s2267_s29 = sld [smem:[#allocation2 + $0x75]]  ;;  %v348_v57 = vstv %s3440_s8 }
  0xd6   : > { %3441 = sst [smem:[#allocation36_spill]] %s2258_s11  ;;  %v349_v5 = vmul.f32 %v2114_v3, %v348_v57 }
  0xd7   : > { %3442 = sst [smem:[#allocation28_spill]] %s2262_s4 }
  0xd8   : > { %s3444_s17 = sld [smem:[#allocation47_spill]]  ;;  %v2331_v36 = vadd.f32 %v349_v5, %v334_v1 }
  0xd9   : > { %s2274_s20 = sld [smem:[#allocation2 + $0x76]] }
  0xda   : > { %s3446_s23 = sld [smem:[#allocation44_spill]] }
  0xdb   : > { %3443 = sst [smem:[#allocation33_spill]] %s2267_s29 }
  0xdc   : > { %s3447_s24 = sld [smem:[#allocation48_spill]] }
  0xdd   : > { %s3448_s1 = sld [smem:[#allocation51_spill]] }
  0xde   : > { %s2286_s0 = sld [smem:[#allocation2 + $0x77]]  ;;  %v366_v7 = vstv %s3444_s17 }
  0xdf   : > { %3445 = sst [smem:[#allocation37_spill]] %s2274_s20  ;;  %v367_v19 = vmul.f32 %v1522_v6, %v366_v7  ;;  %v422_v7 = vstv %s2104_s12 }
  0xe0   : > { %s3450_s8 = sld [smem:[#allocation45_spill]]  ;;  %v352_v10 = vstv %s3446_s23  ;;  %v423_v17 = vmul.f32 %v422_v7, %v2107_v0  ;;  %v521_v7 = vmul.f32 %v2335_v39, %v520_v50 }
  0xe1   : > { %s3451_s20 = sld [smem:[#allocation46_spill]]  ;;  %v353_v23 = vmul.f32 %v2114_v3, %v352_v10  ;;  %v384_v37 = vadd.f32 %v383_v21, %v367_v19  ;;  %v445_v10 = vmul.f32 %v2335_v39, %v444_v54  ;;  %v2391_v19 = vld [vmem:[%s2098_s18 + $0x13] ss:$8 sm:$0x3] }
  0xe2   : > { %s3452_s29 = sld [smem:[#allocation49_spill]]  ;;  %v370_v11 = vstv %s3447_s24 }
  0xe3   : > { %s2292_s4 = sld [smem:[#allocation2 + $0x84]]  ;;  %v386_v13 = vstv %s3448_s1  ;;  %v371_v25 = vmul.f32 %v1522_v6, %v370_v11  ;;  %v2340_v41 = vadd.f32 %v353_v23, %v338_v2  ;;  %v414_v2 = vstv %s2100_s19 }
  0xe4   : > { %3449 = sst [smem:[#allocation29_spill]] %s2286_s0  ;;  %v387_v26 = vmul.f32 %v2216_v12, %v386_v13  ;;  %v415_v13 = vmul.f32 %v414_v2, %v2107_v0  ;;  %v442_v23 = vadd.f32 %v441_v8, %v2277_v58  ;;  %v528_v8 = vstv %s2233_s3 }
  0xe5   : > { %s3454_s11 = sld [smem:[#allocation50_spill]] }
  0xe6   : > { %s3455_s14 = sld [smem:[#allocation52_spill]]  ;;  %v356_v14 = vstv %s3450_s8 }
  0xe7   : > { %s2298_s0 = sld [smem:[#allocation2 + $0x85]]  ;;  %v360_v15 = vstv %s3451_s20  ;;  %v357_v28 = vmul.f32 %v2114_v3, %v356_v14  ;;  %v438_v14 = vadd.f32 %v437_v53, %v2270_v18 }
  0xe8   : > { %s3456_s13 = sld [smem:[#allocation53_spill]]  ;;  %v374_v16 = vstv %s3452_s29  ;;  %v361_v32 = vmul.f32 %v2114_v3, %v360_v15  ;;  %v388_v3 = vadd.f32 %v387_v26, %v371_v25  ;;  %v446_v26 = vadd.f32 %v445_v10, %v2280_v59 }
  0xe9   : > { %3453 = sst [smem:[#allocation30_spill]] %s2292_s4  ;;  %v375_v29 = vmul.f32 %v1522_v6, %v374_v16  ;;  %v2346_v43 = vadd.f32 %v357_v28, %v342_v4  ;;  %v454_v4 = vstv %s2138_s28 }
  0xea   : > { %s2303_s5 = sld [smem:[#allocation2 + $0x86]]  ;;  %v2352_v47 = vadd.f32 %v361_v32, %v346_v9  ;;  %v434_v9 = vadd.f32 %v433_v49, %v2264_v52  ;;  %v455_v15 = vmul.f32 %v2361_v55, %v454_v4  ;;  %v2412_v32 = vld [vmem:[%s2098_s18 + $0x15] ss:$8 sm:$0x3] }
  0xeb   : > { %s2309_s4 = sld [smem:[#allocation2 + $0x87]]  ;;  %v378_v20 = vstv %s3454_s11  ;;  %v392_v44 = vadd.f32 %v391_v30, %v375_v29 }
  0xec   : > { %v394_v22 = vstv %s3455_s14  ;;  %s2314_s21 = sld [smem:[#allocation2 + $0x94]]  ;;  %v379_v33 = vmul.f32 %v1522_v6, %v378_v20  ;;  %v418_v6 = vstv %s2102_s27  ;;  %v456_v30 = vadd.f32 %v455_v15, %v438_v14 }
  0xed   : > { %s2319_s29 = sld [smem:[#allocation2 + $0x95]]  ;;  %v395_v34 = vmul.f32 %v2216_v12, %v394_v22  ;;  %v403_v12 = vmul.f32 %v2151_v24, %v402_v31  ;;  %v408_v5 = vadd.f32 %v407_v45, %v392_v44  ;;  %v419_v52 = vmul.f32 %v418_v6, %v2107_v0 }
  0xee   : > { %v398_v27 = vstv %s3456_s13  ;;  %s2324_s9 = sld [smem:[#allocation2 + $0x96]] }
  0xef   : > { %s3457_s14 = sld [smem:[#allocation54_spill]]  ;;  %v399_v38 = vmul.f32 %v2151_v24, %v398_v27  ;;  %v396_v48 = vadd.f32 %v395_v34, %v379_v33  ;;  %v404_v57 = vadd.f32 %v403_v12, %v388_v3  ;;  %v2421_v35 = vadd.f32 %v423_v17, %v408_v5 }
  0xf0   : > { %s2329_s13 = sld [smem:[#allocation2 + $0x97]]  ;;  %v524_v5 = vstv %s2227_s6 }
  0xf1   : > { %s2338_s10 = sld [smem:[#allocation2 + $0xa4]]  ;;  %v400_v51 = vadd.f32 %v399_v38, %v384_v37  ;;  %v2419_v34 = vadd.f32 %v419_v52, %v404_v57 }
  0xf2   : > { %s2344_s22 = sld [smem:[#allocation2 + $0xa5]] }
  0xf3   : > { %s2350_s2 = sld [smem:[#allocation2 + $0xa6]]  ;;  %v2417_v59 = vadd.f32 %v415_v13, %v400_v51  ;;  %v1554_v51 = vld [vmem:[%s2098_s18 + $0x14] ss:$8 sm:$0x3] }
  0xf4   : > { %s2356_s16 = sld [smem:[#allocation2 + $0xa7]]  ;;  %v1568_v13 = vld [vmem:[%s2098_s18 + $0x16] ss:$8 sm:$0x3] }
  0xf5   : > { %v410_v46 = vstv %s3457_s14  ;;  %s3458_s11 = sld [smem:[#allocation56_spill]] }
  0xf6   : > { %s2364_s17 = sld [smem:[#allocation2 + $0xb4]]  ;;  %v411_v1 = vmul.f32 %v2151_v24, %v410_v46  ;;  %v451_v24 = vmul.f32 %v2361_v55, %v450_v56 }
  0xf7   : > { %s3460_s20 = sld [smem:[#allocation57_spill]] }
  0xf8   : > { %s2369_s23 = sld [smem:[#allocation2 + $0xb5]]  ;;  %v2397_v22 = vadd.f32 %v411_v1, %v396_v48  ;;  %v452_v27 = vadd.f32 %v451_v24, %v434_v9  ;;  %v532_v9 = vstv %s2239_s15 }
  0xf9   : > { %s3462_s25 = sld [smem:[#allocation58_spill]] }
  0xfa   : > { %s3463_s26 = sld [smem:[#allocation21_spill]] }
  0xfb   : > { %s2374_s24 = sld [smem:[#allocation2 + $0xb6]]  ;;  %v458_v11 = vstv %s3458_s11 }
  0xfc   : > { %3459 = sst [smem:[#allocation34_spill]] %s2364_s17  ;;  %v459_v25 = vmul.f32 %v2361_v55, %v458_v11 }
  0xfd   : > { %s3465_s19 = sld [smem:[#allocation55_spill]]  ;;  %v462_v16 = vstv %s3460_s20 }
  0xfe   : > { %3461 = sst [smem:[#allocation38_spill]] %s2369_s23  ;;  %v463_v28 = vmul.f32 %v2361_v55, %v462_v16  ;;  %v460_v38 = vadd.f32 %v459_v25, %v442_v23 }
  0xff   : > { %s2380_s30 = sld [smem:[#allocation2 + $0xb7]]  ;;  %v468_v20 = vstv %s3462_s25 }
 0x100   : > { %s3467_s12 = sld [smem:[#allocation22_spill]]  ;;  %v472_v21 = vstv %s3463_s26  ;;  %v469_v31 = vmul.f32 %v2391_v19, %v468_v20  ;;  %v464_v42 = vadd.f32 %v463_v28, %v446_v26  ;;  %v529_v20 = vmul.f32 %v2335_v39, %v528_v8  ;;  %v2484_v28 = vld [vmem:[%s2098_s18 + $0x17] ss:$8 sm:$0x3] }
 0x101   : > { %3464 = sst [smem:[#allocation39_spill]] %s2374_s24  ;;  %v473_v58 = vmul.f32 %v2391_v19, %v472_v21  ;;  %v533_v21 = vmul.f32 %v2335_v39, %v532_v9 }
 0x102   : > { %s2386_s27 = sld [smem:[#allocation2 + $0xc4]] }
 0x103   : > { %s3468_s28 = sld [smem:[#allocation19_spill]]  ;;  %v426_v18 = vstv %s3465_s19  ;;  %v474_v48 = vadd.f32 %v473_v58, %v456_v30 }
 0x104   : > { %s2395_s1 = sld [smem:[#allocation2 + $0xc5]]  ;;  %v427_v37 = vmul.f32 %v426_v18, %v2107_v0  ;;  %v470_v0 = vadd.f32 %v469_v31, %v452_v27 }
 0x105   : > { %3466 = sst [smem:[#allocation40_spill]] %s2380_s30 }
 0x106   : > { %s2402_s8 = sld [smem:[#allocation2 + $0xc6]]  ;;  %v476_v29 = vstv %s3467_s12 }
 0x107   : > { %s3469_s14 = sld [smem:[#allocation20_spill]]  ;;  %v477_v40 = vmul.f32 %v2391_v19, %v476_v29 }
 0x108   : > { %s3470_s11 = sld [smem:[#allocation26_spill]] }
 0x109   : > { %s2407_s20 = sld [smem:[#allocation2 + $0xc7]]  ;;  %v504_v33 = vstv %s3468_s28  ;;  %v478_v1 = vadd.f32 %v477_v40, %v460_v38  ;;  %v576_v40 = vstv %s2298_s0 }
 0x10a   : > { %s3471_s25 = sld [smem:[#allocation23_spill]]  ;;  %v505_v45 = vmul.f32 %v2412_v32, %v504_v33 }
 0x10b   : > { %s3472_s26 = sld [smem:[#allocation27_spill]] }
 0x10c   : > { %s2415_s19 = sld [smem:[#allocation2 + $0xd4]]  ;;  %v506_v6 = vadd.f32 %v505_v45, %v2282_v60  ;;  %v525_v60 = vmul.f32 %v2335_v39, %v524_v5 }
 0x10d   : > { %s3473_s12 = sld [smem:[#allocation24_spill]]  ;;  %v508_v3 = vstv %s3469_s14 }
 0x10e   : > { %s2424_s30 = sld [smem:[#allocation2 + $0xd5]]  ;;  %v512_v12 = vstv %s3470_s11  ;;  %v509_v56 = vmul.f32 %v2412_v32, %v508_v3  ;;  %v522_v23 = vadd.f32 %v521_v7, %v506_v6  ;;  %v598_v7 = vstv %s2324_s9 }
 0x10f   : > { %s3475_s24 = sld [smem:[#allocation25_spill]]  ;;  %v513_v57 = vmul.f32 %v2412_v32, %v512_v12 }
 0x110   : > { %s3476_s28 = sld [smem:[#allocation17_spill]]  ;;  %v480_v44 = vstv %s3471_s25  ;;  %v510_v16 = vadd.f32 %v509_v56, %v2284_v61  ;;  %v2475_v61 = vadd.f32 %v427_v37, %v2397_v22 }
 0x111   : > { %s2429_s23 = sld [smem:[#allocation2 + $0xd6]]  ;;  %v516_v46 = vstv %s3472_s26  ;;  %v481_v2 = vmul.f32 %v2391_v19, %v480_v44  ;;  %v514_v52 = vadd.f32 %v513_v57, %v2288_v62  ;;  %v580_v44 = vstv %s2303_s5 }
 0x112   : > { %s2434_s17 = sld [smem:[#allocation2 + $0xd7]]  ;;  %v517_v4 = vmul.f32 %v2412_v32, %v516_v46  ;;  %v526_v22 = vadd.f32 %v525_v60, %v510_v16  ;;  %v610_v60 = vstv %s2344_s22 }
 0x113   : > { %v486_v49 = vstv %s3473_s12  ;;  %s3477_s14 = sld [smem:[#allocation31_spill]]  ;;  %v482_v62 = vadd.f32 %v481_v2, %v464_v42  ;;  %v530_v37 = vadd.f32 %v529_v20, %v514_v52  ;;  %v594_v2 = vstv %s2319_s29 }
 0x114   : > { %3474 = sst [smem:[#allocation41_spill]] %s2424_s30  ;;  %v487_v10 = vmul.f32 %v1554_v51, %v486_v49  ;;  %v518_v17 = vadd.f32 %v517_v4, %v2290_v63  ;;  %v590_v49 = vstv %s2314_s21 }
 0x115   : > { %s2438_s30 = sld [smem:[#allocation2 + $0xe4]]  ;;  %v490_v53 = vstv %s3475_s24 }
 0x116   : > { %v494_v54 = vstv %s3476_s28  ;;  %s2445_s11 = sld [smem:[#allocation2 + $0xe5]]  ;;  %v491_v24 = vmul.f32 %v1554_v51, %v490_v53  ;;  %v2479_v26 = vadd.f32 %v487_v10, %v470_v0  ;;  %v534_v38 = vadd.f32 %v533_v21, %v518_v17 }
 0x117   : > { %s3478_s25 = sld [smem:[#allocation18_spill]]  ;;  %v495_v11 = vmul.f32 %v1554_v51, %v494_v54  ;;  %v584_v0 = vstv %s2309_s4  ;;  %v577_v54 = vmul.f32 %v2484_v28, %v576_v40 }
 0x118   : > { %s2450_s7 = sld [smem:[#allocation2 + $0xe6]]  ;;  %v2481_v63 = vadd.f32 %v491_v24, %v474_v48  ;;  %v1582_v48 = vld [vmem:[%s2098_s18 + $0x20] ss:$8 sm:$0x3]  ;;  %v585_v5 = vmul.f32 %v2484_v28, %v584_v0 }
 0x119   : > { %s3479_s24 = sld [smem:[#allocation32_spill]]  ;;  %v538_v14 = vstv %s3477_s14  ;;  %v2493_v33 = vadd.f32 %v495_v11, %v478_v1  ;;  %v581_v1 = vmul.f32 %v2484_v28, %v580_v44  ;;  %v591_v6 = vmul.f32 %v1582_v48, %v590_v49 }
 0x11a   : > { %s2456_s26 = sld [smem:[#allocation2 + $0xe7]]  ;;  %v539_v25 = vmul.f32 %v1568_v13, %v538_v14  ;;  %v578_v11 = vadd.f32 %v577_v54, %v2340_v41  ;;  %v606_v14 = vstv %s2338_s10  ;;  %v599_v52 = vmul.f32 %v1582_v48, %v598_v7 }
 0x11b   : > { %s2460_s12 = sld [smem:[#allocation2 + $0xf4]]  ;;  %v582_v16 = vadd.f32 %v581_v1, %v2346_v43  ;;  %v586_v20 = vadd.f32 %v585_v5, %v2352_v47  ;;  %v614_v43 = vstv %s2350_s2  ;;  %v644_v47 = vstv %s2395_s1 }
 0x11c   : > { %s3482_s3 = sld [smem:[#allocation30_spill]]  ;;  %v540_v3 = vadd.f32 %v539_v25, %v522_v23  ;;  %v1595_v23 = vld [vmem:[%s2098_s18 + $0x21] ss:$8 sm:$0x3]  ;;  %v640_v25 = vstv %s2386_s27  ;;  %v664_v54 = vstv %s2429_s23  ;;  %v672_v7 = vstv %s2438_s30 }
 0x11d   : > { %v498_v15 = vstv %s3478_s25  ;;  %s2466_s6 = sld [smem:[#allocation2 + $0xf5]]  ;;  %v641_v40 = vmul.f32 %v1595_v23, %v640_v25  ;;  %v645_v44 = vmul.f32 %v1595_v23, %v644_v47 }
 0x11e   : > { %s3484_s15 = sld [smem:[#allocation35_spill]]  ;;  %v499_v27 = vmul.f32 %v1554_v51, %v498_v15 }
 0x11f   : > { %v542_v18 = vstv %s3479_s24  ;;  %s3485_s28 = sld [smem:[#allocation36_spill]]  ;;  %v646_v5 = vadd.f32 %v645_v44, %v2419_v34 }
 0x120   : > { %3480 = sst [smem:[#allocation42_spill]] %s2456_s26  ;;  %v543_v30 = vmul.f32 %v1568_v13, %v542_v18  ;;  %v2538_v17 = vadd.f32 %v499_v27, %v482_v62 }
 0x121   : > { %3481 = sst [smem:[#allocation43_spill]] %s2460_s12 }
 0x122   : > { %s2472_s14 = sld [smem:[#allocation2 + $0xf6]]  ;;  %v572_v29 = vstv %s3482_s3  ;;  %v544_v50 = vadd.f32 %v543_v30, %v526_v22 }
 0x123   : > { %3483 = sst [smem:[#allocation47_spill]] %s2466_s6  ;;  %v573_v42 = vmul.f32 %v2484_v28, %v572_v29  ;;  %v611_v29 = vmul.f32 %v2335_v39, %v610_v60 }
 0x124   : > { %s2477_s25 = sld [smem:[#allocation2 + $0xf7]]  ;;  %v546_v31 = vstv %s3484_s15 }
 0x125   : > { %s3488_s6 = sld [smem:[#allocation28_spill]]  ;;  %v550_v58 = vstv %s3485_s28  ;;  %v547_v45 = vmul.f32 %v1568_v13, %v546_v31  ;;  %v574_v4 = vadd.f32 %v573_v42, %v2331_v36  ;;  %v602_v36 = vstv %s2329_s13 }
 0x126   : > { %s2487_s24 = sld [smem:[#allocation2 + $0x8]]  ;;  %v551_v46 = vmul.f32 %v1568_v13, %v550_v58  ;;  %v595_v13 = vmul.f32 %v1582_v48, %v594_v2  ;;  %v603_v18 = vmul.f32 %v1582_v48, %v602_v36  ;;  %v600_v31 = vadd.f32 %v599_v52, %v582_v16 }
 0x127   : > { %s3490_s12 = sld [smem:[#allocation37_spill]]  ;;  %v548_v8 = vadd.f32 %v547_v45, %v530_v37  ;;  %v592_v21 = vadd.f32 %v591_v6, %v574_v4  ;;  %v648_v58 = vstv %s2402_s8  ;;  %v615_v37 = vmul.f32 %v2335_v39, %v614_v43 }
 0x128   : > { %3486 = sst [smem:[#allocation44_spill]] %s2472_s14  ;;  %v552_v9 = vadd.f32 %v551_v46, %v534_v38  ;;  %v596_v27 = vadd.f32 %v595_v13, %v578_v11  ;;  %v618_v38 = vstv %s2356_s16  ;;  %v656_v45 = vstv %s2415_s19 }
 0x129   : > { %s3489_s14 = sld [smem:[#allocation33_spill]]  ;;  %v649_v48 = vmul.f32 %v1595_v23, %v648_v58  ;;  %v657_v1 = vmul.f32 %v2484_v28, %v656_v45  ;;  %v668_v2 = vstv %s2434_s17  ;;  %v680_v13 = vstv %s2450_s7 }
 0x12a   : > { %3487 = sst [smem:[#allocation48_spill]] %s2477_s25  ;;  %v612_v46 = vadd.f32 %v611_v29, %v596_v27  ;;  %v669_v34 = vmul.f32 %v2484_v28, %v668_v2  ;;  %v2666_v2 = vld [vmem:[%s2098_s18 + $0x24] ss:$8 sm:$0x3] }
 0x12b   : > { %s2491_s25 = sld [smem:[#allocation2 + $0x9]]  ;;  %v554_v12 = vstv %s3488_s6 }
 0x12c   : > { %s2496_s26 = sld [smem:[#allocation2 + $0xa]]  ;;  %v555_v56 = vmul.f32 %v2391_v19, %v554_v12  ;;  %v604_v12 = vadd.f32 %v603_v18, %v586_v20  ;;  %v706_v60 = vstv %s2487_s24  ;;  %v681_v18 = vmul.f32 %v2412_v32, %v680_v13 }
 0x12d   : > { %s3491_s3 = sld [smem:[#allocation29_spill]]  ;;  %v562_v53 = vstv %s3490_s12 }
 0x12e   : > { %s2501_s15 = sld [smem:[#allocation2 + $0xb]]  ;;  %v563_v24 = vmul.f32 %v2391_v19, %v562_v53  ;;  %v2540_v41 = vadd.f32 %v555_v56, %v540_v3  ;;  %v652_v3 = vstv %s2407_s20  ;;  %v2581_v56 = vadd.f32 %v615_v37, %v600_v31 }
 0x12f   : > { %s2506_s28 = sld [smem:[#allocation2 + $0x18]]  ;;  %v558_v51 = vstv %s3489_s14  ;;  %v653_v53 = vmul.f32 %v1595_v23, %v652_v3 }
 0x130   : > { %s2511_s0 = sld [smem:[#allocation2 + $0x19]]  ;;  %v559_v10 = vmul.f32 %v2391_v19, %v558_v51  ;;  %v2557_v22 = vadd.f32 %v563_v24, %v548_v8 }
 0x131   : > { %s2517_s5 = sld [smem:[#allocation2 + $0x1a]]  ;;  %v654_v11 = vadd.f32 %v653_v53, %v2475_v61  ;;  %v710_v27 = vstv %s2491_s25 }
 0x132   : > { %s2522_s4 = sld [smem:[#allocation2 + $0x1b]]  ;;  %v2551_v62 = vadd.f32 %v559_v10, %v544_v50  ;;  %v619_v50 = vmul.f32 %v2335_v39, %v618_v38  ;;  %v676_v10 = vstv %s2445_s11  ;;  %v714_v58 = vstv %s2496_s26 }
 0x133   : > { %v566_v57 = vstv %s3491_s3  ;;  %s2526_s21 = sld [smem:[#allocation2 + $0x28]]  ;;  %v677_v61 = vmul.f32 %v2412_v32, %v676_v10  ;;  %v670_v25 = vadd.f32 %v669_v34, %v654_v11 }
 0x134   : > { %s2531_s29 = sld [smem:[#allocation2 + $0x29]]  ;;  %v567_v15 = vmul.f32 %v2391_v19, %v566_v57  ;;  %v607_v19 = vmul.f32 %v2335_v39, %v606_v14  ;;  %v642_v57 = vadd.f32 %v641_v40, %v2417_v59  ;;  %v650_v59 = vadd.f32 %v649_v48, %v2421_v35 }
 0x135   : > { %s2536_s9 = sld [smem:[#allocation2 + $0x2a]]  ;;  %v2606_v36 = vadd.f32 %v619_v50, %v604_v12  ;;  %v718_v40 = vstv %s2501_s15  ;;  %v724_v3 = vstv %s2506_s28 }
 0x136   : > { %s2543_s13 = sld [smem:[#allocation2 + $0x2b]]  ;;  %v2559_v30 = vadd.f32 %v567_v15, %v552_v9  ;;  %v608_v42 = vadd.f32 %v607_v19, %v592_v21  ;;  %v665_v9 = vmul.f32 %v2484_v28, %v664_v54  ;;  %v658_v35 = vadd.f32 %v657_v1, %v642_v57 }
 0x137   : > { %s2549_s10 = sld [smem:[#allocation2 + $0x38]]  ;;  %v673_v15 = vmul.f32 %v2412_v32, %v672_v7  ;;  %v728_v48 = vstv %s2511_s0  ;;  %v732_v53 = vstv %s2517_s5 }
 0x138   : > { %s2555_s22 = sld [smem:[#allocation2 + $0x39]]  ;;  %v666_v21 = vadd.f32 %v665_v9, %v650_v59  ;;  %v736_v1 = vstv %s2522_s4 }
 0x139   : > { %s3492_s12 = sld [smem:[#allocation34_spill]]  ;;  %v674_v29 = vadd.f32 %v673_v15, %v658_v35  ;;  %v2702_v35 = vld [vmem:[%s2098_s18 + $0x26] ss:$8 sm:$0x3] }
 0x13a   : > { %s3493_s2 = sld [smem:[#allocation41_spill]]  ;;  %v682_v12 = vadd.f32 %v681_v18, %v666_v21  ;;  %v746_v10 = vstv %s2531_s29 }
 0x13b   : > { %s2562_s27 = sld [smem:[#allocation2 + $0x3a]] }
 0x13c   : > { %s3494_s6 = sld [smem:[#allocation38_spill]] }
 0x13d   : > { %s2567_s1 = sld [smem:[#allocation2 + $0x3b]] }
 0x13e   : > { %s2570_s14 = sld [smem:[#allocation2 + $0x48]] }
 0x13f   : > { %v622_v0 = vstv %s3492_s12  ;;  %s2574_s8 = sld [smem:[#allocation2 + $0x49]] }
 0x140   : > { %v660_v49 = vstv %s3493_s2  ;;  %s2579_s16 = sld [smem:[#allocation2 + $0x4a]]  ;;  %v623_v4 = vmul.f32 %v2361_v55, %v622_v0 }
 0x141   : > { %s3495_s20 = sld [smem:[#allocation39_spill]]  ;;  %v661_v6 = vmul.f32 %v2484_v28, %v660_v49  ;;  %v2616_v28 = vld [vmem:[%s2098_s18 + $0x22] ss:$8 sm:$0x3] }
 0x142   : > { %v626_v51 = vstv %s3494_s6  ;;  %s2586_s19 = sld [smem:[#allocation2 + $0x4b]]  ;;  %v2612_v16 = vadd.f32 %v623_v4, %v608_v42  ;;  %v707_v31 = vmul.f32 %v2616_v28, %v706_v60  ;;  %v711_v45 = vmul.f32 %v2616_v28, %v710_v27 }
 0x143   : > { %s3496_s3 = sld [smem:[#allocation40_spill]]  ;;  %v627_v8 = vmul.f32 %v2361_v55, %v626_v51  ;;  %v662_v52 = vadd.f32 %v661_v6, %v646_v5  ;;  %v715_v0 = vmul.f32 %v2616_v28, %v714_v58  ;;  %v719_v50 = vmul.f32 %v2616_v28, %v718_v40 }
 0x144   : > { %s2592_s23 = sld [smem:[#allocation2 + $0x58]]  ;;  %v708_v49 = vadd.f32 %v707_v31, %v2479_v26  ;;  %v742_v4 = vstv %s2526_s21  ;;  %v712_v6 = vadd.f32 %v711_v45, %v2481_v63  ;;  %v778_v15 = vstv %s2570_s14 }
 0x145   : > { %s2598_s17 = sld [smem:[#allocation2 + $0x59]]  ;;  %v2626_v43 = vadd.f32 %v627_v8, %v612_v46  ;;  %v678_v37 = vadd.f32 %v677_v61, %v662_v52  ;;  %v716_v59 = vadd.f32 %v715_v0, %v2493_v33  ;;  %v743_v11 = vmul.f32 %v2666_v2, %v742_v4 }
 0x146   : > { %s3497_s30 = sld [smem:[#allocation42_spill]]  ;;  %v750_v60 = vstv %s2536_s9  ;;  %v764_v27 = vstv %s2555_s22 }
 0x147   : > { %v630_v24 = vstv %s3495_s20  ;;  %s2604_s12 = sld [smem:[#allocation2 + $0x5a]] }
 0x148   : > { %s2610_s11 = sld [smem:[#allocation2 + $0x5b]]  ;;  %v631_v20 = vmul.f32 %v2361_v55, %v630_v24  ;;  %v790_v31 = vstv %s2586_s19 }
 0x149   : > { %v634_v14 = vstv %s3496_s3  ;;  %s3498_s2 = sld [smem:[#allocation43_spill]]  ;;  %v791_v0 = vmul.f32 %v2702_v35, %v790_v31 }
 0x14a   : > { %s2619_s7 = sld [smem:[#allocation2 + $0x68]]  ;;  %v635_v23 = vmul.f32 %v2361_v55, %v634_v14  ;;  %v2640_v55 = vld [vmem:[%s2098_s18 + $0x23] ss:$8 sm:$0x3]  ;;  %v2672_v26 = vadd.f32 %v631_v20, %v2581_v56  ;;  %v720_v56 = vadd.f32 %v719_v50, %v2538_v17  ;;  %v747_v14 = vmul.f32 %v2666_v2, %v746_v10 }
 0x14b   : > { %s2624_s6 = sld [smem:[#allocation2 + $0x69]]  ;;  %v725_v51 = vmul.f32 %v2640_v55, %v724_v3  ;;  %v729_v7 = vmul.f32 %v2640_v55, %v728_v48  ;;  %v733_v9 = vmul.f32 %v2640_v55, %v732_v53  ;;  %v737_v63 = vmul.f32 %v2640_v55, %v736_v1  ;;  %v1641_v1 = vld [vmem:[%s2098_s18 + $0x27] ss:$8 sm:$0x3] }
 0x14c   : > { %v684_v19 = vstv %s3497_s30  ;;  %s3500_s20 = sld [smem:[#allocation47_spill]]  ;;  %v786_v20 = vstv %s2579_s16  ;;  %v794_v40 = vstv %s2592_s23 }
 0x14d   : > { %s3501_s24 = sld [smem:[#allocation44_spill]]  ;;  %v685_v38 = vmul.f32 %v2412_v32, %v684_v19  ;;  %v726_v24 = vadd.f32 %v725_v51, %v708_v49  ;;  %v730_v17 = vadd.f32 %v729_v7, %v712_v6  ;;  %v734_v61 = vadd.f32 %v733_v9, %v716_v59 }
 0x14e   : > { %s2630_s3 = sld [smem:[#allocation2 + $0x6a]]  ;;  %v738_v21 = vadd.f32 %v737_v63, %v720_v56  ;;  %v754_v19 = vstv %s2543_s13  ;;  %v795_v50 = vmul.f32 %v2616_v28, %v794_v40  ;;  %v806_v51 = vstv %s2610_s11 }
 0x14f   : > { %v688_v47 = vstv %s3498_s2  ;;  %s2635_s30 = sld [smem:[#allocation2 + $0x6b]]  ;;  %v686_v5 = vadd.f32 %v685_v38, %v670_v25  ;;  %v744_v18 = vadd.f32 %v743_v11, %v726_v24  ;;  %v760_v25 = vstv %s2549_s10 }
 0x150   : > { %3499 = sst [smem:[#allocation51_spill]] %s2619_s7  ;;  %v689_v46 = vmul.f32 %v2335_v39, %v688_v47  ;;  %v748_v58 = vadd.f32 %v747_v14, %v730_v17  ;;  %v787_v38 = vmul.f32 %v2702_v35, %v786_v20  ;;  %v755_v3 = vmul.f32 %v2666_v2, %v754_v19 }
 0x151   : > { %s3502_s7 = sld [smem:[#allocation48_spill]]  ;;  %v807_v7 = vmul.f32 %v2616_v28, %v806_v51 }
 0x152   : > { %s2643_s25 = sld [smem:[#allocation2 + $0x78]]  ;;  %v692_v42 = vstv %s3500_s20  ;;  %v2692_v33 = vadd.f32 %v689_v46, %v674_v29  ;;  %v779_v29 = vmul.f32 %v2702_v35, %v778_v15  ;;  %v768_v46 = vstv %s2562_s27 }
 0x153   : > { %v696_v44 = vstv %s3501_s24  ;;  %s2648_s26 = sld [smem:[#allocation2 + $0x79]]  ;;  %v693_v54 = vmul.f32 %v2335_v39, %v692_v42  ;;  %v798_v42 = vstv %s2598_s17  ;;  %v788_v53 = vadd.f32 %v787_v38, %v2557_v22 }
 0x154   : > { %s2654_s15 = sld [smem:[#allocation2 + $0x7a]]  ;;  %v697_v57 = vmul.f32 %v2335_v39, %v696_v44  ;;  %v802_v44 = vstv %s2604_s12  ;;  %v780_v48 = vadd.f32 %v779_v29, %v2540_v41  ;;  %v792_v22 = vadd.f32 %v791_v0, %v2559_v30  ;;  %v2769_v30 = vld [vmem:[%s2098_s18 + $0x30] ss:$8 sm:$0x3] }
 0x155   : > { %s2660_s28 = sld [smem:[#allocation2 + $0x7b]]  ;;  %v2694_v34 = vadd.f32 %v693_v54, %v678_v37  ;;  %v751_v37 = vmul.f32 %v2666_v2, %v750_v60  ;;  %v799_v54 = vmul.f32 %v2616_v28, %v798_v42  ;;  %v820_v59 = vstv %s2630_s3 }
 0x156   : > { %s2669_s0 = sld [smem:[#allocation2 + $0x88]]  ;;  %v2696_v13 = vadd.f32 %v697_v57, %v682_v12  ;;  %v803_v57 = vmul.f32 %v2616_v28, %v802_v44  ;;  %v796_v10 = vadd.f32 %v795_v50, %v780_v48  ;;  %v824_v24 = vstv %s2635_s30 }
 0x157   : > { %v700_v32 = vstv %s3502_s7  ;;  %s2676_s5 = sld [smem:[#allocation2 + $0x89]]  ;;  %v752_v41 = vadd.f32 %v751_v37, %v734_v61  ;;  %v1655_v37 = vld [vmem:[%s2098_s18 + $0x31] ss:$8 sm:$0x3] }
 0x158   : > { %v701_v8 = vmul.f32 %v2335_v39, %v700_v32  ;;  %s2682_s4 = sld [smem:[#allocation2 + $0x8a]]  ;;  %v2690_v39 = vadd.f32 %v635_v23, %v2606_v36  ;;  %v782_v36 = vstv %s2574_s8  ;;  %v1627_v23 = vld [vmem:[%s2098_s18 + $0x25] ss:$8 sm:$0x3]  ;;  %v772_v32 = vstv %s2567_s1 }
 0x159   : > { %s2687_s21 = sld [smem:[#allocation2 + $0x8b]]  ;;  %v783_v47 = vmul.f32 %v2702_v35, %v782_v36  ;;  %v761_v12 = vmul.f32 %v1627_v23, %v760_v25  ;;  %v765_v45 = vmul.f32 %v1627_v23, %v764_v27  ;;  %v769_v6 = vmul.f32 %v1627_v23, %v768_v46 }
 0x15a   : > { %s2698_s29 = sld [smem:[#allocation2 + $0x98]]  ;;  %v2708_v52 = vadd.f32 %v701_v8, %v686_v5  ;;  %v816_v8 = vstv %s2624_s6  ;;  %v773_v9 = vmul.f32 %v1627_v23, %v772_v32  ;;  %v804_v17 = vadd.f32 %v803_v57, %v788_v53 }
 0x15b   : > { %s2706_s2 = sld [smem:[#allocation2 + $0x99]]  ;;  %v784_v49 = vadd.f32 %v783_v47, %v2551_v62  ;;  %v756_v62 = vadd.f32 %v755_v3, %v738_v21  ;;  %v2753_v5 = vadd.f32 %v761_v12, %v744_v18  ;;  %v2766_v63 = vadd.f32 %v765_v45, %v748_v58 }
 0x15c   : > { %s2712_s7 = sld [smem:[#allocation2 + $0x9a]]  ;;  %v846_v14 = vstv %s2669_s0  ;;  %v817_v15 = vmul.f32 %v1641_v1, %v816_v8  ;;  %v821_v36 = vmul.f32 %v1641_v1, %v820_v59  ;;  %v828_v61 = vstv %s2643_s25 }
 0x15d   : > { %s2717_s14 = sld [smem:[#allocation2 + $0x9b]]  ;;  %v800_v11 = vadd.f32 %v799_v54, %v784_v49  ;;  %v850_v60 = vstv %s2676_s5  ;;  %v2778_v20 = vadd.f32 %v769_v6, %v752_v41  ;;  %v808_v21 = vadd.f32 %v807_v7, %v792_v22 }
 0x15e   : > { %s2723_s9 = sld [smem:[#allocation2 + $0xa8]]  ;;  %v825_v18 = vmul.f32 %v1641_v1, %v824_v24  ;;  %v854_v19 = vstv %s2682_s4  ;;  %v2783_v23 = vadd.f32 %v773_v9, %v756_v62  ;;  %v832_v27 = vstv %s2648_s26 }
 0x15f   : > { %s2728_s13 = sld [smem:[#allocation2 + $0xa9]]  ;;  %v847_v29 = vmul.f32 %v2769_v30, %v846_v14  ;;  %v829_v47 = vmul.f32 %v2666_v2, %v828_v61  ;;  %v851_v31 = vmul.f32 %v2769_v30, %v850_v60  ;;  %v858_v58 = vstv %s2687_s21 }
 0x160   : > { %s3503_s10 = sld [smem:[#allocation51_spill]]  ;;  %v864_v38 = vstv %s2698_s29  ;;  %v818_v40 = vadd.f32 %v817_v15, %v800_v11  ;;  %v822_v3 = vadd.f32 %v821_v36, %v804_v17  ;;  %v855_v12 = vmul.f32 %v2769_v30, %v854_v19 }
 0x161   : > { %s2733_s22 = sld [smem:[#allocation2 + $0xaa]]  ;;  %v868_v42 = vstv %s2706_s2  ;;  %v826_v44 = vadd.f32 %v825_v18, %v808_v21  ;;  %v833_v45 = vmul.f32 %v2666_v2, %v832_v27  ;;  %v836_v46 = vstv %s2654_s15 }
 0x162   : > { %s2738_s8 = sld [smem:[#allocation2 + $0xab]]  ;;  %v872_v32 = vstv %s2712_s7  ;;  %v840_v0 = vstv %s2660_s28  ;;  %v848_v48 = vadd.f32 %v847_v29, %v2612_v16  ;;  %v859_v49 = vmul.f32 %v2769_v30, %v858_v58 }
 0x163   : > { %s2744_s16 = sld [smem:[#allocation2 + $0xb8]]  ;;  %v865_v50 = vmul.f32 %v1655_v37, %v864_v38  ;;  %v852_v53 = vadd.f32 %v851_v31, %v2626_v43  ;;  %v869_v54 = vmul.f32 %v1655_v37, %v868_v42  ;;  %v876_v57 = vstv %s2717_s14 }
 0x164   : > { %s2751_s27 = sld [smem:[#allocation2 + $0xb9]]  ;;  %v856_v16 = vadd.f32 %v855_v12, %v2672_v26  ;;  %v880_v41 = vstv %s2723_s9  ;;  %v2821_v62 = vadd.f32 %v833_v45, %v818_v40  ;;  %v841_v43 = vmul.f32 %v2666_v2, %v840_v0  ;;  %v1668_v26 = vld [vmem:[%s2098_s18 + $0x32] ss:$8 sm:$0x3] }
 0x165   : > { %s2755_s1 = sld [smem:[#allocation2 + $0xba]]  ;;  %v884_v6 = vstv %s2728_s13  ;;  %v860_v7 = vadd.f32 %v859_v49, %v2690_v39  ;;  %v866_v8 = vadd.f32 %v865_v50, %v848_v48  ;;  %v877_v59 = vmul.f32 %v1655_v37, %v876_v57 }
 0x166   : > { %v812_v4 = vstv %s3503_s10  ;;  %s2761_s19 = sld [smem:[#allocation2 + $0xbb]]  ;;  %v885_v17 = vmul.f32 %v2616_v28, %v884_v6  ;;  %v2845_v36 = vadd.f32 %v841_v43, %v826_v44 }
 0x167   : > { %v813_v56 = vmul.f32 %v1641_v1, %v812_v4  ;;  %s2764_s23 = sld [smem:[#allocation2 + $0xc8]]  ;;  %v837_v1 = vmul.f32 %v2666_v2, %v836_v46  ;;  %v873_v4 = vmul.f32 %v1655_v37, %v872_v32  ;;  %v888_v22 = vstv %s2733_s22 }
 0x168   : > { %s2772_s17 = sld [smem:[#allocation2 + $0xc9]]  ;;  %v892_v24 = vstv %s2738_s8  ;;  %v889_v39 = vmul.f32 %v2616_v28, %v888_v22  ;;  %v878_v21 = vadd.f32 %v877_v59, %v860_v7 }
 0x169   : > { %s2776_s12 = sld [smem:[#allocation2 + $0xca]]  ;;  %v814_v25 = vadd.f32 %v813_v56, %v796_v10  ;;  %v870_v10 = vadd.f32 %v869_v54, %v852_v53  ;;  %v881_v56 = vmul.f32 %v2616_v28, %v880_v41  ;;  %v874_v11 = vadd.f32 %v873_v4, %v856_v16 }
 0x16a   : > { %s2781_s11 = sld [smem:[#allocation2 + $0xcb]]  ;;  %v2843_v15 = vadd.f32 %v837_v1, %v822_v3  ;;  %v893_v18 = vmul.f32 %v2616_v28, %v892_v24  ;;  %v896_v29 = vstv %s2744_s16  ;;  %v900_v3 = vstv %s2751_s27 }
 0x16b   : > { %s2787_s6 = sld [smem:[#allocation2 + $0xd8]]  ;;  %v2810_v51 = vadd.f32 %v829_v47, %v814_v25  ;;  %v882_v27 = vadd.f32 %v881_v56, %v866_v8  ;;  %v886_v58 = vadd.f32 %v885_v17, %v870_v10  ;;  %v2858_v37 = vadd.f32 %v889_v39, %v874_v11 }
 0x16c   : > { %s2794_s20 = sld [smem:[#allocation2 + $0xd9]]  ;;  %v2869_v45 = vadd.f32 %v893_v18, %v878_v21  ;;  %v897_v46 = vmul.f32 %v2640_v55, %v896_v29  ;;  %v901_v53 = vmul.f32 %v2640_v55, %v900_v3  ;;  %v904_v1 = vstv %s2755_s1 }
 0x16d   : > { %s2798_s24 = sld [smem:[#allocation2 + $0xda]]  ;;  %v914_v9 = vstv %s2764_s23 }
 0x16e   : > { %s2803_s3 = sld [smem:[#allocation2 + $0xdb]]  ;;  %v918_v2 = vstv %s2772_s17  ;;  %v915_v61 = vmul.f32 %v1668_v26, %v914_v9  ;;  %v2901_v22 = vadd.f32 %v897_v46, %v882_v27  ;;  %v2912_v24 = vadd.f32 %v901_v53, %v886_v58 }
 0x16f   : > { %s2808_s30 = sld [smem:[#allocation2 + $0xe8]]  ;;  %v922_v14 = vstv %s2776_s12  ;;  %v919_v19 = vmul.f32 %v1668_v26, %v918_v2 }
 0x170   : > { %s2814_s25 = sld [smem:[#allocation2 + $0xe9]]  ;;  %v926_v60 = vstv %s2781_s11  ;;  %v923_v47 = vmul.f32 %v1668_v26, %v922_v14  ;;  %v916_v12 = vadd.f32 %v915_v61, %v2692_v33 }
 0x171   : > { %s2819_s26 = sld [smem:[#allocation2 + $0xea]]  ;;  %v930_v25 = vstv %s2787_s6  ;;  %v927_v38 = vmul.f32 %v1668_v26, %v926_v60  ;;  %v920_v32 = vadd.f32 %v919_v19, %v2694_v34  ;;  %v905_v26 = vmul.f32 %v2640_v55, %v904_v1 }
 0x172   : > { %s2826_s15 = sld [smem:[#allocation2 + $0xeb]]  ;;  %v934_v31 = vstv %s2794_s20  ;;  %v931_v42 = vmul.f32 %v2769_v30, %v930_v25  ;;  %v924_v33 = vadd.f32 %v923_v47, %v2696_v13  ;;  %v908_v13 = vstv %s2761_s19 }
 0x173   : > { %s2831_s28 = sld [smem:[#allocation2 + $0xf8]]  ;;  %v938_v40 = vstv %s2798_s24  ;;  %v935_v0 = vmul.f32 %v2769_v30, %v934_v31  ;;  %v928_v54 = vadd.f32 %v927_v38, %v2708_v52  ;;  %v2896_v52 = vld [vmem:[%s2098_s18 + $0x33] ss:$8 sm:$0x3]  ;;  %v909_v2 = vmul.f32 %v2640_v55, %v908_v13 }
 0x174   : > { %s2836_s0 = sld [smem:[#allocation2 + $0xf9]]  ;;  %v942_v44 = vstv %s2803_s3  ;;  %v939_v48 = vmul.f32 %v2769_v30, %v938_v40  ;;  %v932_v16 = vadd.f32 %v931_v42, %v916_v12  ;;  %v2925_v55 = vld [vmem:[%s2098_s18 + $0x34] ss:$8 sm:$0x3]  ;;  %v2964_v53 = vadd.f32 %v905_v26, %v2858_v37 }
 0x175   : > { %s2841_s5 = sld [smem:[#allocation2 + $0xfa]]  ;;  %v946_v49 = vstv %s2808_s30  ;;  %v943_v34 = vmul.f32 %v2769_v30, %v942_v44  ;;  %v936_v41 = vadd.f32 %v935_v0, %v920_v32  ;;  %v2952_v0 = vld [vmem:[%s2098_s18 + $0x35] ss:$8 sm:$0x3] }
 0x176   : > { %s2848_s4 = sld [smem:[#allocation2 + $0xfb]]  ;;  %v950_v50 = vstv %s2814_s25  ;;  %v947_v43 = vmul.f32 %v2702_v35, %v946_v49  ;;  %v940_v7 = vadd.f32 %v939_v48, %v924_v33  ;;  %v2977_v37 = vld [vmem:[%s2098_s18 + $0x37] ss:$8 sm:$0x3] }
 0x177   : > { %s2852_s21 = sld [smem:[#allocation2 + $0xc]]  ;;  %v954_v57 = vstv %s2819_s26  ;;  %v951_v6 = vmul.f32 %v2702_v35, %v950_v50  ;;  %v944_v9 = vadd.f32 %v943_v34, %v928_v54 }
 0x178   : > { %s2856_s29 = sld [smem:[#allocation2 + $0xd]]  ;;  %v958_v4 = vstv %s2826_s15  ;;  %v955_v8 = vmul.f32 %v2702_v35, %v954_v57  ;;  %v948_v39 = vadd.f32 %v947_v43, %v932_v16 }
 0x179   : > { %s2861_s2 = sld [smem:[#allocation2 + $0xe]]  ;;  %v959_v10 = vmul.f32 %v2702_v35, %v958_v4  ;;  %v962_v11 = vstv %s2831_s28  ;;  %v952_v14 = vadd.f32 %v951_v6, %v936_v41 }
 0x17a   : > { %s2867_s7 = sld [smem:[#allocation2 + $0xf]]  ;;  %v956_v60 = vadd.f32 %v955_v8, %v940_v7  ;;  %v963_v27 = vmul.f32 %v2616_v28, %v962_v11  ;;  %v966_v29 = vstv %s2836_s0  ;;  %v1700_v8 = vld [vmem:[%s2098_s18 + $0x36] ss:$8 sm:$0x3] }
 0x17b   : > { %s2874_s14 = sld [smem:[#allocation2 + $0x1c]]  ;;  %v960_v25 = vadd.f32 %v959_v10, %v944_v9  ;;  %v970_v31 = vstv %s2841_s5  ;;  %v967_v46 = vmul.f32 %v2616_v28, %v966_v29 }
 0x17c   : > { %s2880_s9 = sld [smem:[#allocation2 + $0x1d]]  ;;  %v974_v58 = vstv %s2848_s4  ;;  %v2973_v57 = vadd.f32 %v963_v27, %v948_v39 }
 0x17d   : > { %s2886_s13 = sld [smem:[#allocation2 + $0x1e]]  ;;  %v980_v30 = vstv %s2852_s21  ;;  %v975_v48 = vmul.f32 %v2616_v28, %v974_v58  ;;  %v2986_v41 = vadd.f32 %v967_v46, %v952_v14 }
 0x17e   : > { %s2891_s10 = sld [smem:[#allocation2 + $0x1f]]  ;;  %v984_v59 = vstv %s2856_s29  ;;  %v981_v17 = vmul.f32 %v2896_v52, %v980_v30 }
 0x17f   : > { %s2899_s22 = sld [smem:[#allocation2 + $0x2c]]  ;;  %v988_v56 = vstv %s2861_s2  ;;  %v985_v35 = vmul.f32 %v2896_v52, %v984_v59  ;;  %v2990_v6 = vadd.f32 %v975_v48, %v960_v25 }
 0x180   : > { %s2905_s8 = sld [smem:[#allocation2 + $0x2d]]  ;;  %v992_v61 = vstv %s2867_s7  ;;  %v989_v21 = vmul.f32 %v2896_v52, %v988_v56  ;;  %v982_v38 = vadd.f32 %v981_v17, %v2753_v5 }
 0x181   : > { %s2910_s16 = sld [smem:[#allocation2 + $0x2e]]  ;;  %v998_v18 = vstv %s2874_s14  ;;  %v993_v40 = vmul.f32 %v2896_v52, %v992_v61  ;;  %v986_v3 = vadd.f32 %v985_v35, %v2766_v63  ;;  %v971_v63 = vmul.f32 %v2616_v28, %v970_v31 }
 0x182   : > { %s2917_s27 = sld [smem:[#allocation2 + $0x2f]]  ;;  %v1002_v19 = vstv %s2880_s9  ;;  %v999_v12 = vmul.f32 %v2925_v55, %v998_v18  ;;  %v990_v32 = vadd.f32 %v989_v21, %v2778_v20  ;;  %v2967_v20 = vadd.f32 %v909_v2, %v2869_v45 }
 0x183   : > { %s2921_s1 = sld [smem:[#allocation2 + $0x3c]]  ;;  %v1006_v47 = vstv %s2886_s13  ;;  %v1003_v42 = vmul.f32 %v2925_v55, %v1002_v19  ;;  %v994_v54 = vadd.f32 %v993_v40, %v2783_v23  ;;  %v2988_v43 = vadd.f32 %v971_v63, %v956_v60 }
 0x184   : > { %s2929_s19 = sld [smem:[#allocation2 + $0x3d]]  ;;  %v1010_v44 = vstv %s2891_s10  ;;  %v1007_v5 = vmul.f32 %v2925_v55, %v1006_v47  ;;  %v1000_v28 = vadd.f32 %v999_v12, %v982_v38  ;;  %v1714_v38 = vld [vmem:[%s2098_s18 + $0x40] ss:$8 sm:$0x3] }
 0x185   : > { %s2934_s23 = sld [smem:[#allocation2 + $0x3e]]  ;;  %v1016_v33 = vstv %s2899_s22  ;;  %v1011_v34 = vmul.f32 %v2925_v55, %v1010_v44  ;;  %v1004_v1 = vadd.f32 %v1003_v42, %v986_v3 }
 0x186   : > { %s2940_s17 = sld [smem:[#allocation2 + $0x3f]]  ;;  %v1020_v49 = vstv %s2905_s8  ;;  %v1017_v13 = vmul.f32 %v2952_v0, %v1016_v33  ;;  %v1008_v45 = vadd.f32 %v1007_v5, %v990_v32 }
 0x187   : > { %s2946_s12 = sld [smem:[#allocation2 + $0x4c]]  ;;  %v1024_v50 = vstv %s2910_s16  ;;  %v1021_v23 = vmul.f32 %v2952_v0, %v1020_v49  ;;  %v1012_v7 = vadd.f32 %v1011_v34, %v994_v54 }
 0x188   : > { %s2955_s11 = sld [smem:[#allocation2 + $0x4d]]  ;;  %v1025_v16 = vmul.f32 %v2952_v0, %v1024_v50  ;;  %v1028_v4 = vstv %s2917_s27  ;;  %v1018_v10 = vadd.f32 %v1017_v13, %v1000_v28 }
 0x189   : > { %s2961_s6 = sld [smem:[#allocation2 + $0x4e]]  ;;  %v1034_v59 = vstv %s2921_s1  ;;  %v1029_v56 = vmul.f32 %v2952_v0, %v1028_v4  ;;  %v1022_v17 = vadd.f32 %v1021_v23, %v1004_v1 }
 0x18a   : > { %s2971_s20 = sld [smem:[#allocation2 + $0x4f]]  ;;  %v1026_v39 = vadd.f32 %v1025_v16, %v1008_v45  ;;  %v1035_v61 = vmul.f32 %v1700_v8, %v1034_v59  ;;  %v1038_v19 = vstv %s2929_s19 }
 0x18b   : > { %s2979_s24 = sld [smem:[#allocation2 + $0x5c]]  ;;  %v1030_v47 = vadd.f32 %v1029_v56, %v1012_v7  ;;  %v1042_v40 = vstv %s2934_s23  ;;  %v1039_v32 = vmul.f32 %v1700_v8, %v1038_v19  ;;  %v3063_v56 = vld [vmem:[%s2098_s18 + $0x41] ss:$8 sm:$0x3] }
 0x18c   : > { %s2984_s3 = sld [smem:[#allocation2 + $0x5d]]  ;;  %v1046_v42 = vstv %s2940_s17  ;;  %v3047_v13 = vadd.f32 %v1035_v61, %v1018_v10 }
 0x18d   : > { %v1052_v30 = vstv %s2946_s12  ;;  %s2993_s30 = sld [smem:[#allocation2 + $0x5e]]  ;;  %v1047_v54 = vmul.f32 %v1700_v8, %v1046_v42  ;;  %v3052_v4 = vadd.f32 %v1039_v32, %v1022_v17 }
 0x18e   : > { %v1053_v26 = vmul.f32 %v2977_v37, %v1052_v30  ;;  %v1056_v9 = vstv %s2955_s11  ;;  %s2999_s25 = sld [smem:[#allocation2 + $0x5f]] }
 0x18f   : > { %v1057_v2 = vmul.f32 %v2977_v37, %v1056_v9  ;;  %v1060_v11 = vstv %s2961_s6  ;;  %s3004_s26 = sld [smem:[#allocation2 + $0x6c]] }
 0x190   : > { %v1061_v14 = vmul.f32 %v2977_v37, %v1060_v11  ;;  %v1064_v35 = vstv %s2971_s20  ;;  %s3008_s15 = sld [smem:[#allocation2 + $0x6d]]  ;;  %v1054_v60 = vadd.f32 %v1053_v26, %v2810_v51 }
 0x191   : > { %v1065_v21 = vmul.f32 %v2977_v37, %v1064_v35  ;;  %v1068_v18 = vstv %s2979_s24  ;;  %s3013_s28 = sld [smem:[#allocation2 + $0x6e]]  ;;  %v1058_v25 = vadd.f32 %v1057_v2, %v2821_v62  ;;  %v3067_v2 = vadd.f32 %v1047_v54, %v1030_v47  ;;  %v1728_v47 = vld [vmem:[%s2098_s18 + $0x42] ss:$8 sm:$0x3] }
 0x192   : > { %v1069_v27 = vmul.f32 %v2896_v52, %v1068_v18  ;;  %v1072_v29 = vstv %s2984_s3  ;;  %s3019_s0 = sld [smem:[#allocation2 + $0x6f]]  ;;  %v1062_v31 = vadd.f32 %v1061_v14, %v2843_v15 }
 0x193   : > { %v1073_v51 = vmul.f32 %v2896_v52, %v1072_v29  ;;  %v1076_v58 = vstv %s2993_s30  ;;  %s3025_s5 = sld [smem:[#allocation2 + $0x7c]]  ;;  %v1066_v3 = vadd.f32 %v1065_v21, %v2845_v36  ;;  %v1043_v36 = vmul.f32 %v1700_v8, %v1042_v40 }
 0x194   : > { %v1077_v62 = vmul.f32 %v2896_v52, %v1076_v58  ;;  %v1080_v12 = vstv %s2999_s25  ;;  %s3031_s4 = sld [smem:[#allocation2 + $0x7d]]  ;;  %v1070_v44 = vadd.f32 %v1069_v27, %v1054_v60  ;;  %v1252_v60 = vperm.slane %v3047_v13, 0 }
 0x195   : > { %v1081_v15 = vmul.f32 %v2896_v52, %v1080_v12  ;;  %v1086_v46 = vstv %s3004_s26  ;;  %s3036_s21 = sld [smem:[#allocation2 + $0x7e]]  ;;  %v1074_v5 = vadd.f32 %v1073_v51, %v1058_v25  ;;  %v3058_v59 = vadd.f32 %v1043_v36, %v1026_v39 }
 0x196   : > { %v1087_v33 = vmul.f32 %v1714_v38, %v1086_v46  ;;  %v1090_v63 = vstv %s3008_s15  ;;  %s3039_s29 = sld [smem:[#allocation2 + $0x7f]]  ;;  %v1078_v48 = vadd.f32 %v1077_v62, %v1062_v31  ;;  %v1253_v25 = vperm.slane %v3047_v13, 1 }
 0x197   : > { %v1091_v49 = vmul.f32 %v1714_v38, %v1090_v63  ;;  %v1094_v50 = vstv %s3013_s28  ;;  %s3042_s2 = sld [smem:[#allocation2 + $0x8c]]  ;;  %v1082_v34 = vadd.f32 %v1081_v15, %v1066_v3  ;;  %v1257_v31 = vperm.slane %v3052_v4, 0 }
 0x198   : > { %v1095_v28 = vmul.f32 %v1714_v38, %v1094_v50  ;;  %v1098_v1 = vstv %s3019_s0  ;;  %s3045_s7 = sld [smem:[#allocation2 + $0x8d]]  ;;  %v1088_v45 = vadd.f32 %v1087_v33, %v1070_v44  ;;  %v1258_v40 = vperm.slane %v3052_v4, 1 }
 0x199   : > { %v1099_v23 = vmul.f32 %v1714_v38, %v1098_v1  ;;  %v1102_v16 = vstv %s3025_s5  ;;  %s3050_s14 = sld [smem:[#allocation2 + $0x8e]]  ;;  %v1092_v30 = vadd.f32 %v1091_v49, %v1074_v5  ;;  %v1262_v42 = vperm.slane %v3058_v59, 0 }
 0x19a   : > { %v1103_v7 = vmul.f32 %v2952_v0, %v1102_v16  ;;  %v1106_v8 = vstv %s3031_s4  ;;  %s3056_s9 = sld [smem:[#allocation2 + $0x8f]]  ;;  %v1096_v26 = vadd.f32 %v1095_v28, %v1078_v48  ;;  %v1263_v46 = vperm.slane %v3058_v59, 1 }
 0x19b   : > { %v1107_v9 = vmul.f32 %v2952_v0, %v1106_v8  ;;  %v1110_v10 = vstv %s3036_s21  ;;  %s3065_s13 = sld [smem:[#allocation2 + $0x9c]]  ;;  %v1100_v11 = vadd.f32 %v1099_v23, %v1082_v34  ;;  %v1267_v63 = vperm.slane %v3067_v2, 0 }
 0x19c   : > { %v1111_v17 = vmul.f32 %v2952_v0, %v1110_v10  ;;  %v1114_v14 = vstv %s3039_s29  ;;  %s3071_s10 = sld [smem:[#allocation2 + $0x9d]]  ;;  %v3073_v39 = vadd.f32 %v1103_v7, %v1088_v45  ;;  %v1268_v49 = vperm.slane %v3067_v2, 1 }
 0x19d   : > { %v1115_v35 = vmul.f32 %v2952_v0, %v1114_v14  ;;  %v1120_v61 = vstv %s3042_s2  ;;  %s3077_s22 = sld [smem:[#allocation2 + $0x9e]]  ;;  %v3080_v21 = vadd.f32 %v1107_v9, %v1092_v30 }
 0x19e   : > { %v1121_v18 = vmul.f32 %v3063_v56, %v1120_v61  ;;  %v1124_v19 = vstv %s3045_s7  ;;  %s3084_s8 = sld [smem:[#allocation2 + $0x9f]]  ;;  %v3087_v27 = vadd.f32 %v1111_v17, %v1096_v26  ;;  %v1272_v34 = vperm.slane %v3073_v39, 0 }
 0x19f   : > { %v1125_v0 = vmul.f32 %v3063_v56, %v1124_v19  ;;  %v1128_v29 = vstv %s3050_s14  ;;  %s3092_s16 = sld [smem:[#allocation2 + $0xac]]  ;;  %v3101_v3 = vadd.f32 %v1115_v35, %v1100_v11  ;;  %v1273_v23 = vperm.slane %v3073_v39, 1 }
 0x1a0   : > { %v1122_v51 = vadd.f32 %v1121_v18, %v2901_v22  ;;  %v1129_v58 = vmul.f32 %v3063_v56, %v1128_v29  ;;  %v1132_v38 = vstv %s3056_s9  ;;  %s3098_s27 = sld [smem:[#allocation2 + $0xad]]  ;;  %v1277_v7 = vperm.slane %v3080_v21, 0 }
 0x1a1   : > { %v1133_v62 = vmul.f32 %v3063_v56, %v1132_v38  ;;  %v1138_v12 = vstv %s3065_s13  ;;  %s3105_s1 = sld [smem:[#allocation2 + $0xae]]  ;;  %v1126_v22 = vadd.f32 %v1125_v0, %v2912_v24  ;;  %v1278_v10 = vperm.slane %v3080_v21, 1 }
 0x1a2   : > { %v1139_v44 = vmul.f32 %v1728_v47, %v1138_v12  ;;  %v1142_v15 = vstv %s3071_s10  ;;  %s3110_s19 = sld [smem:[#allocation2 + $0xaf]]  ;;  %v1130_v32 = vadd.f32 %v1129_v58, %v2964_v53  ;;  %v1282_v35 = vperm.slane %v3087_v27, 0  ;;  %v1741_v58 = vld [vmem:[%s2098_s18 + $0x43] ss:$8 sm:$0x3] }
 0x1a3   : > { %v1143_v5 = vmul.f32 %v1728_v47, %v1142_v15  ;;  %v1146_v33 = vstv %s3077_s22  ;;  %s3115_s23 = sld [smem:[#allocation2 + $0xbc]]  ;;  %v1134_v50 = vadd.f32 %v1133_v62, %v2967_v20  ;;  %v1283_v0 = vperm.slane %v3087_v27, 1 }
 0x1a4   : > { %v1140_v36 = vadd.f32 %v1139_v44, %v1122_v51  ;;  %v1147_v48 = vmul.f32 %v1728_v47, %v1146_v33  ;;  %v1150_v24 = vstv %s3084_s8  ;;  %s3119_s17 = sld [smem:[#allocation2 + $0xbd]] }
 0x1a5   : > { %v1151_v54 = vmul.f32 %v1728_v47, %v1150_v24  ;;  %v1154_v53 = vstv %s3092_s16  ;;  %s3124_s12 = sld [smem:[#allocation2 + $0xbe]]  ;;  %v1144_v28 = vadd.f32 %v1143_v5, %v1126_v22  ;;  %v1287_v22 = vperm.slane %v3101_v3, 0 }
 0x1a6   : > { %v1155_v1 = vmul.f32 %v2896_v52, %v1154_v53  ;;  %v1158_v45 = vstv %s3098_s27  ;;  %s3129_s11 = sld [smem:[#allocation2 + $0xbf]]  ;;  %v1148_v16 = vadd.f32 %v1147_v48, %v1130_v32  ;;  %v1288_v5 = vperm.slane %v3101_v3, 1 }
 0x1a7   : > { %v1159_v30 = vmul.f32 %v2896_v52, %v1158_v45  ;;  %v1162_v20 = vstv %s3105_s1  ;;  %s3134_s6 = sld [smem:[#allocation2 + $0xcc]]  ;;  %v1152_v11 = vadd.f32 %v1151_v54, %v1134_v50  ;;  %v1332_v24 = vsel %vm1331_vm0, %v1252_v60, %v1257_v31 }
 0x1a8   : > { %v1156_v8 = vadd.f32 %v1155_v1, %v1140_v36  ;;  %v1163_v26 = vmul.f32 %v2896_v52, %v1162_v20  ;;  %v1166_v9 = vstv %s3110_s19  ;;  %s3139_s20 = sld [smem:[#allocation2 + $0xcd]]  ;;  %v1333_v53 = vsel %vm1331_vm0, %v1253_v25, %v1258_v40 }
 0x1a9   : > { %v1167_v17 = vmul.f32 %v2896_v52, %v1166_v9  ;;  %v1170_v14 = vstv %s3115_s23  ;;  %s3144_s24 = sld [smem:[#allocation2 + $0xce]]  ;;  %v1160_v61 = vadd.f32 %v1159_v30, %v1144_v28 }
 0x1aa   : > { %v1171_v18 = vmul.f32 %v2925_v55, %v1170_v14  ;;  %v1174_v19 = vstv %s3119_s17  ;;  %s3149_s3 = sld [smem:[#allocation2 + $0xcf]]  ;;  %v1164_v29 = vadd.f32 %v1163_v26, %v1148_v16 }
 0x1ab   : > { %v1175_v47 = vmul.f32 %v2925_v55, %v1174_v19  ;;  %v1178_v51 = vstv %s3124_s12  ;;  %s3155_s30 = sld [smem:[#allocation2 + $0xdc]]  ;;  %v1168_v44 = vadd.f32 %v1167_v17, %v1152_v11 }
 0x1ac   : > { %v3157_v38 = vadd.f32 %v1171_v18, %v1156_v8  ;;  %v1179_v62 = vmul.f32 %v2925_v55, %v1178_v51  ;;  %v1182_v12 = vstv %s3129_s11  ;;  %s3161_s25 = sld [smem:[#allocation2 + $0xdd]] }
 0x1ad   : > { %v1183_v15 = vmul.f32 %v2925_v55, %v1182_v12  ;;  %v1188_v32 = vstv %s3134_s6  ;;  %s3166_s26 = sld [smem:[#allocation2 + $0xde]]  ;;  %v3169_v33 = vadd.f32 %v1175_v47, %v1160_v61  ;;  %v1335_v12 = vsel %vm1334_vm1, %v1332_v24, %v1262_v42 }
 0x1ae   : > { %v1189_v36 = vmul.f32 %v1741_v58, %v1188_v32  ;;  %v1192_v48 = vstv %s3139_s20  ;;  %s3172_s18 = sld [smem:[#allocation2 + $0xdf]]  ;;  %v3179_v55 = vadd.f32 %v1179_v62, %v1164_v29  ;;  %v1292_v60 = vperm.slane %v3157_v38, 0 }
 0x1af   : > { %v1193_v50 = vmul.f32 %v1741_v58, %v1192_v48  ;;  %v1196_v54 = vstv %s3144_s24  ;;  %s3182_s15 = sld [smem:[#allocation2 + $0xec]]  ;;  %v3194_v31 = vadd.f32 %v1183_v15, %v1168_v44  ;;  %v1293_v40 = vperm.slane %v3157_v38, 1 }
 0x1b0   : > { %v1190_v28 = vadd.f32 %v1189_v36, %v2973_v57  ;;  %v1197_v1 = vmul.f32 %v1741_v58, %v1196_v54  ;;  %v1200_v45 = vstv %s3149_s3  ;;  %s3191_s28 = sld [smem:[#allocation2 + $0xed]]  ;;  %v1297_v26 = vperm.slane %v3169_v33, 0 }
 0x1b1   : > { %v1194_v16 = vadd.f32 %v1193_v50, %v2986_v41  ;;  %v1201_v30 = vmul.f32 %v1741_v58, %v1200_v45  ;;  %v1204_v4 = vstv %s3155_s30  ;;  %s3198_s0 = sld [smem:[#allocation2 + $0xee]]  ;;  %v1298_v17 = vperm.slane %v3169_v33, 1 }
 0x1b2   : > { %v1198_v13 = vadd.f32 %v1197_v1, %v2988_v43  ;;  %v1205_v57 = vmul.f32 %v3063_v56, %v1204_v4  ;;  %v1208_v25 = vstv %s3161_s25  ;;  %s3203_s5 = sld [smem:[#allocation2 + $0xef]]  ;;  %v1302_v18 = vperm.slane %v3179_v55, 0 }
 0x1b3   : > { %v1202_v20 = vadd.f32 %v1201_v30, %v2990_v6  ;;  %v1209_v8 = vmul.f32 %v3063_v56, %v1208_v25  ;;  %v1212_v41 = vstv %s3166_s26  ;;  %s1754_s4 = sld [smem:[#allocation2 + $0xfc]]  ;;  %v1336_v32 = vsel %vm1334_vm1, %v1333_v53, %v1263_v46 }
 0x1b4   : > { %v1206_v9 = vadd.f32 %v1205_v57, %v1190_v28  ;;  %v1213_v43 = vmul.f32 %v3063_v56, %v1212_v41  ;;  %v1216_v11 = vstv %s3172_s18  ;;  %s1755_s21 = sld [smem:[#allocation2 + $0xfd]]  ;;  %v1338_v42 = vsel %vm1337_vm2, %v1335_v12, %v1267_v63 }
 0x1b5   : > { %v1210_v14 = vadd.f32 %v1209_v8, %v1194_v16  ;;  %v1217_v61 = vmul.f32 %v3063_v56, %v1216_v11  ;;  %v1220_v6 = vstv %s3182_s15  ;;  %s1756_s29 = sld [smem:[#allocation2 + $0xfe]]  ;;  %v1341_v63 = vsel %vm1340_vm3, %v1338_v42, %v1272_v34 }
 0x1b6   : > { %v1214_v19 = vadd.f32 %v1213_v43, %v1198_v13  ;;  %v1221_v29 = vmul.f32 %v2977_v37, %v1220_v6  ;;  %v1224_v47 = vstv %s3191_s28  ;;  %s1757_s2 = sld [smem:[#allocation2 + $0xff]]  ;;  %v1307_v57 = vperm.slane %v3194_v31, 0 }
 0x1b7   : > { %v1218_v51 = vadd.f32 %v1217_v61, %v1202_v20  ;;  %s3504_s7 = sld [smem:[#allocation9_spill]]  ;;  %v1225_v58 = vmul.f32 %v2977_v37, %v1224_v47  ;;  %v1228_v62 = vstv %s3198_s0  ;;  %v1344_v39 = vsel %vm1343_vm4, %v1341_v63, %v1277_v7 }
 0x1b8   : > { %v1222_v56 = vadd.f32 %v1221_v29, %v1206_v9  ;;  %v1229_v44 = vmul.f32 %v2977_v37, %v1228_v62  ;;  %v1232_v15 = vstv %s3203_s5  ;;  %s3505_s9 = sld [smem:[#allocation12_spill]]  ;;  %v1352_v21 = vsel %vm1331_vm0, %v1292_v60, %v1297_v26 }
 0x1b9   : > { %v1226_v36 = vadd.f32 %v1225_v58, %v1210_v14  ;;  %v1233_v48 = vmul.f32 %v2977_v37, %v1232_v15  ;;  %v1236_v50 = vstv %s1754_s4  ;;  %v1339_v37 = vsel %vm1337_vm2, %v1336_v32, %v1268_v49  ;;  %s3506_s16 = sld [smem:[#allocation61_spill]] }
 0x1ba   : > { %v1230_v54 = vadd.f32 %v1229_v44, %v1214_v19  ;;  %v1237_v28 = vmul.f32 %v2896_v52, %v1236_v50  ;;  %v1240_v1 = vstv %s1755_s21  ;;  %v1342_v13 = vsel %vm1340_vm3, %v1339_v37, %v1273_v23 }
 0x1bb   : > { %v1234_v24 = vadd.f32 %v1233_v48, %v1218_v51  ;;  %v1241_v59 = vmul.f32 %v2896_v52, %v1240_v1  ;;  %v1244_v46 = vstv %s1756_s29  ;;  %v1303_v49 = vperm.slane %v3179_v55, 1 }
 0x1bc   : > { %v1238_v53 = vadd.f32 %v1237_v28, %v1222_v56  ;;  %v1245_v45 = vmul.f32 %v2896_v52, %v1244_v46  ;;  %v1248_v16 = vstv %s1757_s2  ;;  %v1345_v8 = vsel %vm1343_vm4, %v1342_v13, %v1278_v10 }
 0x1bd   : > { %s148_s14 = sand.u32 1, %s3504_s7   ;;  %v1242_v30 = vadd.f32 %v1241_v59, %v1226_v36  ;;  %v1249_v4 = vmul.f32 %v2896_v52, %v1248_v16  ;;  %v1308_v52 = vperm.slane %v3194_v31, 1  ;;  %v1347_v31 = vsel %vm1346_vm5, %v1344_v39, %v1282_v35 }
 0x1be   : > { %s3248_s13 = sshll.u32 %s148_s14, 5  ;;  %v1246_v2 = vadd.f32 %v1245_v45, %v1230_v54  ;;  %s1763_s10 = sshll.u32 %s3505_s9, 5  ;;  %v1312_v25 = vperm.slane %v1238_v53, 0  ;;  %v1313_v20 = vperm.slane %v1238_v53, 1  ;;  %v1348_v9 = vsel %vm1346_vm5, %v1345_v8, %v1283_v0 }
 0x1bf   : > { %v1250_v34 = vadd.f32 %v1249_v4, %v1234_v24  ;;  %v1317_v23 = vperm.slane %v1242_v30, 0  ;;  %v1318_v55 = vperm.slane %v1242_v30, 1  ;;  %s1382_s27 = scalar_lea.hbm %s3506_s16, %s1763_s10  ;;  %v1353_v27 = vsel %vm1331_vm0, %v1293_v40, %v1298_v17  ;;  %s150_s1 = scalar_lea.vmem [#allocation5], %s3248_s13 }
 0x1c0   : > { %v1322_v41 = vperm.slane %v1246_v2, 0  ;;  %v1323_v7 = vperm.slane %v1246_v2, 1  ;;  %v1350_v10 = vsel %vm1349_vm6, %v1347_v31, %v1287_v22  ;;  %v1351_v35 = vsel %vm1349_vm6, %v1348_v9, %v1288_v5  ;;  %s1383_s19 = sshll.u32 %s150_s1, 4  ;;  %s1385_s23 = sshll.u32 %s1382_s27, 4  ;;  %s1384_s19 = int_to_ptr.vmem [resolvable:$true] %s1383_s19  ;;  %s1386_s23 = int_to_ptr.hbm [resolvable:$true] %s1385_s23 }
 0x1c1   : > { %v1354_v0 = vsel %vm1334_vm1, %v1352_v21, %v1302_v18  ;;  %v1355_v43 = vsel %vm1334_vm1, %v1353_v27, %v1303_v49  ;;  %v1327_v11 = vperm.slane %v1250_v34, 0  ;;  %v1328_v60 = vperm.slane %v1250_v34, 1  ;;  %1366 = vst [vmem:[%s150_s1] sm:$0xff] %v1350_v10  ;;  %s1371_s12 = scalar_lea.sflag [#allocation3], %s148_s14  ;;  %s1846_s11 = sshra.s32 %s1386_s23, 4  ;;  %s1847_s11 = int_to_ptr.hbm [resolvable:$true] %s1846_s11 }
 0x1c2   : > { %v1356_v33 = vsel %vm1337_vm2, %v1354_v0, %v1307_v57  ;;  %v1357_v38 = vsel %vm1337_vm2, %v1355_v43, %v1308_v52  ;;  %1367 = vst [vmem:[%s150_s1 + $0x8] sm:$0xff] %v1351_v35  ;;  %s1848_s6 = scalar_lea.hbm %s1847_s11, 32  ;;  %s1852_s3 = scalar_lea.hbm %s3506_s16, 64 }
 0x1c3   : > { %v1358_v22 = vsel %vm1340_vm3, %v1356_v33, %v1312_v25  ;;  %v1359_v3 = vsel %vm1340_vm3, %v1357_v38, %v1313_v20  ;;  %p1849_p0 = scmp.ne.s32.totalorder %s1847_s11, %s1848_s6  ;;  %p1853_p3 = scmp.lt.s32.totalorder %s1847_s11, %s3506_s16 }
 0x1c4   : > { %v1360_v5 = vsel %vm1343_vm4, %v1358_v22, %v1317_v23  ;;  %v1361_v40 = vsel %vm1343_vm4, %v1359_v3, %v1318_v55  ;;  %p1854_p4 = scmp.lt.s32.totalorder %s1852_s3, %s1848_s6 }
 0x1c5   : > { %v1362_v26 = vsel %vm1346_vm5, %v1360_v5, %v1322_v41  ;;  %v1363_v17 = vsel %vm1346_vm5, %v1361_v40, %v1323_v7  ;;  %p1850_p1 = pnand %p1849_p0, %p1956_p5 }
 0x1c6   : > { %v1364_v14 = vsel %vm1349_vm6, %v1362_v26, %v1327_v11  ;;  %v1365_v61 = vsel %vm1349_vm6, %v1363_v17, %v1328_v60  ;;  %p1855_p7 = por %p1854_p4, %p1853_p3 }
 0x1c7   : > { %1368 = vst [vmem:[%s150_s1 + $0x10] sm:$0xff] %v1364_v14  ;;  %p1851_p2 = pneg %p1850_p1 }
 0x1c8   : > { %1369 = vst [vmem:[%s150_s1 + $0x18] sm:$0xff] %v1365_v61 }
 0x1c9   : > { %p1856_p8 = pnand %p1855_p7, %p1851_p2 }
 0x1cb   : > { %1859 = shalt.err (!%p1856_p8)
}
 0x1cc   : > { %s1901_s26 = smov 256   ;;  %s1902_s18 = smov 16  }
 0x1cd   : > { %1769 = dma.vmem_to_hbm [thread:$0]  (%p1956_p5), %s1384_s19, 512, %s1386_s23, %s1371_s12, %s1901_s26, %s1901_s26, %s1902_s18  }
 0x1ce PF: > { %s3508_s15 = sld [smem:[#allocation11_spill]] }
 0x1cf   : > { %s3509_s28 = sld [smem:[#allocation8_spill]] }
 0x1d4   : > { %p1781_p9 = scmp.ge.s32.totalorder %s3508_s15, 2 }
 0x1d5   : > { %s1400_s5 = sand.u32 1, %s3509_s28  }
 0x1d6   : > { %p1776_p10 = pnand %p1781_p9, %p1960_p6  ;;  %s1401_s4 = scalar_lea.sflag [#allocation3], %s1400_s5 }
 0x1d8   : > { %p1777_p11 = pneg %p1776_p10 }
 0x1da   : > { %1881 = dma.done.wait (%p1777_p11), %s1401_s4, 512  }
 0x1db   : > { %1883 = vsyncadd (%p1777_p11), %s1401_s4, 4294966784  ;;  %s3511_s12 = sld [smem:[#allocation13_spill]] }
 0x1dc   : > { %s3512_s9 = sld [smem:[#allocation9_spill]] }
 0x1dd   : > { %s3513_s10 = sld [smem:[#allocation10_spill]] }
 0x1de   : > { %s3514_s11 = sld [smem:[#allocation14_spill]] }
 0x1e1   : > { %p13_p12 = scmp.ge.s32.totalorder %s3511_s12, 4  }
 0x1e3   :  { %15 = sbr.rel (!%p13_p12) target bundleno = 8 (0x8), region = 103 }
 0x1e8   :  { %1407 = vsyncpa [#allocation3], 1 }
 0x1e9   :  { %1409 = vsyncpa [#allocation3 + $0x1], 1 }
 0x1ea   :  { %1410 = vsyncpa [#allocation4], 1 }
 0x1eb   :  { %1412 = vsyncpa [#allocation4 + $0x1], 1 }

</bundles_post_ra>
